<compile_context>
chip_gen: v7x
topology: tpu7x:2x2x1
jax: 0.10.0
libtpu: 0.0.40
codegen_flags: <defaults>
</compile_context>

<pallas_src>
import jax
import jax.numpy as jnp
from jax import lax
from jax.experimental import pallas as pl
from jax.experimental.pallas import tpu as pltpu

_LANE = 128
_SUBLANE = 8
_UNROLL_SEQ_MAX = 32          # fully unroll the time loop up to this seq_len

# PyTorch LSTM gate order is [i, f, g, o]; we repack to [i, f, o, g] so the three
# sigmoid gates form one contiguous slab (single wide EUP dispatch per cell).
_GATE_PERM = (0, 1, 3, 2)


def _round_up(n, m):
    return ((n + m - 1) // m) * m


def _pack_weight(w, hidden, hp, in_dim, in_p):
    """PyTorch (4*hidden, in_dim) -> (in_p, 4*hp), gate-major cols [i|f|o|g], zero-padded."""
    w4 = jnp.asarray(w, jnp.float32).reshape(4, hidden, in_dim)
    w4 = w4[jnp.array(_GATE_PERM)]
    w4 = jnp.pad(w4, ((0, 0), (0, hp - hidden), (0, in_p - in_dim)))
    return jnp.transpose(w4, (2, 0, 1)).reshape(in_p, 4 * hp)


def _pack_bias(b_ih, b_hh, hidden, hp):
    """Fused b_ih + b_hh, repacked to [i|f|o|g] and padded per gate to hp lanes -> (1, 4*hp)."""
    b = (jnp.asarray(b_ih, jnp.float32) + jnp.asarray(b_hh, jnp.float32)).reshape(4, hidden)
    b = b[jnp.array(_GATE_PERM)]
    b = jnp.pad(b, ((0, 0), (0, hp - hidden)))
    return b.reshape(1, 4 * hp)


def _lstm_cell(z, c, hp):
    # Gate layout [i | f | o | g]: one wide sigmoid over the 3 sigmoid gates.
    sig = jax.nn.sigmoid(z[:, : 3 * hp])
    i_g = sig[:, 0 * hp:1 * hp]
    f_g = sig[:, 1 * hp:2 * hp]
    o_g = sig[:, 2 * hp:3 * hp]
    g_g = jnp.tanh(z[:, 3 * hp:4 * hp])
    c_new = f_g * c + i_g * g_g
    h_new = o_g * jnp.tanh(c_new)
    return h_new, c_new
    # Padded-lane invariant: padded gate cols/bias are 0 => z_pad = 0 =>
    # i,f,o = 0.5, g = 0 => c_pad stays 0 and h_pad stays 0 given zero init.


def _encoder_kernel(x_ref, wih1_ref, whh1_ref, b1_ref,
                    wih2_ref, whh2_ref, b2_ref,
                    out_ref, zin1_scr):
    seq_len = x_ref.shape[0]
    hp1 = whh1_ref.shape[0]   # padded hidden of layer 1
    hp2 = whh2_ref.shape[0]   # padded hidden of layer 2

    # ---- layer-1 input projection hoisted off the recurrence -------------------
    # One (seq_len, in_p) @ (in_p, 4*hp1) matmul with K = 8 (sublane-padded only).
    zin1_scr[...] = (jnp.dot(x_ref[...], wih1_ref[...],
                             preferred_element_type=jnp.float32) + b1_ref[...])

    # ---- single interleaved time loop over BOTH layers --------------------------
    def step(z1_in, h1, c1, h2, c2):
        # layer-1 step t: only h1 @ whh1 sits on the serial critical path
        z1 = z1_in + jnp.dot(h1, whh1_ref[...], preferred_element_type=jnp.float32)
        h1, c1 = _lstm_cell(z1, c1, hp1)
        # layer-2 step t fused right behind it (its matvecs overlap layer-1's gates)
        z2 = (jnp.dot(h1, wih2_ref[...], preferred_element_type=jnp.float32)
              + jnp.dot(h2, whh2_ref[...], preferred_element_type=jnp.float32)
              + b2_ref[...])
        h2, c2 = _lstm_cell(z2, c2, hp2)
        return h1, c1, h2, c2

    h1 = jnp.zeros((1, hp1), jnp.float32)
    c1 = jnp.zeros((1, hp1), jnp.float32)
    h2 = jnp.zeros((1, hp2), jnp.float32)
    c2 = jnp.zeros((1, hp2), jnp.float32)

    if seq_len <= _UNROLL_SEQ_MAX:
        # Fully unrolled; static row slices of the VMEM-resident zin1.
        for t in range(seq_len):
            h1, c1, h2, c2 = step(zin1_scr[t:t + 1, :], h1, c1, h2, c2)
    else:
        # Bounded vreg pressure / program size for long sequences.
        def body(t, carry):
            h1, c1, h2, c2 = carry
            z1_in = zin1_scr[pl.ds(t, 1), :]
            return step(z1_in, h1, c1, h2, c2)
        h1, c1, h2, c2 = lax.fori_loop(0, seq_len, body, (h1, c1, h2, c2), unroll=4)

    out_ref[...] = h2                                   # (1, hp2): lane-dense store


def encoder_forward(x, params, seq_len, n_features, embedding_dim):
    """Matches Encoder.forward: returns hidden_n.reshape(n_features, embedding_dim)."""
    hidden1 = 2 * embedding_dim
    hidden2 = embedding_dim
    hp1 = _round_up(hidden1, _LANE)
    hp2 = _round_up(hidden2, _LANE)
    in_p = _round_up(max(n_features, 1), _SUBLANE)      # sublane pad only (8), not 128

    x = jnp.asarray(x, jnp.float32).reshape(seq_len, n_features)
    x_p = jnp.pad(x, ((0, 0), (0, in_p - n_features)))

    p1, p2 = params["rnn1"], params["rnn2"]
    wih1 = _pack_weight(p1["w_ih"], hidden1, hp1, n_features, in_p)
    whh1 = _pack_weight(p1["w_hh"], hidden1, hp1, hidden1, hp1)
    b1 = _pack_bias(p1["b_ih"], p1["b_hh"], hidden1, hp1)
    wih2 = _pack_weight(p2["w_ih"], hidden2, hp2, hidden1, hp1)
    whh2 = _pack_weight(p2["w_hh"], hidden2, hp2, hidden2, hp2)
    b2 = _pack_bias(p2["b_ih"], p2["b_hh"], hidden2, hp2)

    out = pl.pallas_call(
        _encoder_kernel,
        out_shape=jax.ShapeDtypeStruct((1, hp2), jnp.float32),
        in_specs=[pl.BlockSpec(memory_space=pltpu.MemorySpace.VMEM) for _ in range(7)],
        out_specs=pl.BlockSpec(memory_space=pltpu.MemorySpace.VMEM),
        scratch_shapes=[pltpu.VMEM((seq_len, 4 * hp1), jnp.float32)],   # zin1 rows
    )(x_p, wih1, whh1, b1, wih2, whh2, b2)

    hidden_n = out[0, :hidden2]
    # As in the PyTorch module, this reshape is only valid when n_features == 1.
    return hidden_n.reshape(n_features, embedding_dim)


def init_encoder_params(key, seq_len, n_features, embedding_dim=64):
    """Deterministic parameter init mirroring the PyTorch module's shapes."""
    hidden_dim = 2 * embedding_dim

    def lstm_params(key, input_size, hidden_size):
        k1, k2, k3, k4 = jax.random.split(key, 4)
        s = 1.0 / jnp.sqrt(hidden_size)
        return dict(
            w_ih=jax.random.uniform(k1, (4 * hidden_size, input_size),
                                    jnp.float32, -s, s),
            w_hh=jax.random.uniform(k2, (4 * hidden_size, hidden_size),
                                    jnp.float32, -s, s),
            b_ih=jax.random.uniform(k3, (4 * hidden_size,), jnp.float32, -s, s),
            b_hh=jax.random.uniform(k4, (4 * hidden_size,), jnp.float32, -s, s),
        )

    kr1, kr2 = jax.random.split(key)
    return dict(
        rnn1=lstm_params(kr1, n_features, hidden_dim),
        rnn2=lstm_params(kr2, hidden_dim, embedding_dim),
    )


if __name__ == "__main__":
    seq_len, n_features, embedding_dim = 8, 1, 32  # hidden_dim = 64

    key = jax.random.PRNGKey(0)
    k_x, k_p = jax.random.split(key)

    x = jax.random.normal(k_x, (seq_len, n_features), jnp.float32)
    params = init_encoder_params(k_p, seq_len, n_features, embedding_dim)

    out = encoder_forward(x, params, seq_len, n_features, embedding_dim)
    out = jax.block_until_ready(out)

    assert out.shape == (n_features, embedding_dim)
    assert out.dtype == jnp.float32
    print("KERNEL_OK")
</pallas_src>

<mosaic_0001>
module attributes {stable_mosaic.version = 11 : i64} {
  func.func @_encoder_kernel(%arg0: memref<8x8xf32, #tpu.memory_space<vmem>>, %arg1: memref<8x512xf32, #tpu.memory_space<vmem>>, %arg2: memref<128x512xf32, #tpu.memory_space<vmem>>, %arg3: memref<1x512xf32, #tpu.memory_space<vmem>>, %arg4: memref<128x512xf32, #tpu.memory_space<vmem>>, %arg5: memref<128x512xf32, #tpu.memory_space<vmem>>, %arg6: memref<1x512xf32, #tpu.memory_space<vmem>>, %arg7: memref<1x128xf32, #tpu.memory_space<vmem>>, %arg8: memref<8x512xf32, #tpu.memory_space<vmem>>) attributes {dimension_semantics = [], scalar_prefetch = 0 : i64, scratch_operands = 1 : i64, tpu.core_type = #tpu.core_type<tc>} {
    %c0 = arith.constant 0 : index
    %c0_0 = arith.constant 0 : index
    %0 = vector.load %arg0[%c0, %c0_0] : memref<8x8xf32, #tpu.memory_space<vmem>>, vector<8x8xf32>
    %c0_1 = arith.constant 0 : index
    %c0_2 = arith.constant 0 : index
    %1 = vector.load %arg1[%c0_1, %c0_2] : memref<8x512xf32, #tpu.memory_space<vmem>>, vector<8x512xf32>
    %cst = arith.constant dense<0.000000e+00> : vector<8x512xf32>
    %2 = tpu.matmul %0, %1, %cst {dimension_numbers = #tpu.dot_dimension_numbers<[1], [0], [0], [1], [0, 0, 1, 1], [], []>} : vector<8x8xf32>, vector<8x512xf32>, vector<8x512xf32> -> vector<8x512xf32>
    %c0_3 = arith.constant 0 : index
    %c0_4 = arith.constant 0 : index
    %3 = vector.load %arg3[%c0_3, %c0_4] : memref<1x512xf32, #tpu.memory_space<vmem>>, vector<1x512xf32>
    %4 = vector.broadcast %3 : vector<1x512xf32> to vector<8x512xf32>
    %5 = arith.addf %2, %4 : vector<8x512xf32>
    %c0_5 = arith.constant 0 : index
    %c0_6 = arith.constant 0 : index
    %6 = vector.load %arg8[%c0_5, %c0_6] : memref<8x512xf32, #tpu.memory_space<vmem>>, vector<8x512xf32>
    tpu.vector_store %arg8[%c0_5, %c0_6], %5 {strides = array<i32>} : memref<8x512xf32, #tpu.memory_space<vmem>>, vector<8x512xf32>,
    %cst_7 = arith.constant 0.000000e+00 : f32
    %7 = vector.broadcast %cst_7 : f32 to vector<1x128xf32>
    %cst_8 = arith.constant 0.000000e+00 : f32
    %8 = vector.broadcast %cst_8 : f32 to vector<1x128xf32>
    %cst_9 = arith.constant 0.000000e+00 : f32
    %9 = vector.broadcast %cst_9 : f32 to vector<1x128xf32>
    %cst_10 = arith.constant 0.000000e+00 : f32
    %10 = vector.broadcast %cst_10 : f32 to vector<1x128xf32>
    %c0_11 = arith.constant 0 : index
    %c0_12 = arith.constant 0 : index
    %11 = vector.load %arg8[%c0_11, %c0_12] : memref<8x512xf32, #tpu.memory_space<vmem>>, vector<1x512xf32>
    %c0_13 = arith.constant 0 : index
    %c0_14 = arith.constant 0 : index
    %12 = vector.load %arg2[%c0_13, %c0_14] : memref<128x512xf32, #tpu.memory_space<vmem>>, vector<128x512xf32>
    %cst_15 = arith.constant dense<0.000000e+00> : vector<1x512xf32>
    %13 = tpu.matmul %7, %12, %cst_15 {dimension_numbers = #tpu.dot_dimension_numbers<[1], [0], [0], [1], [0, 0, 1, 1], [], []>} : vector<1x128xf32>, vector<128x512xf32>, vector<1x512xf32> -> vector<1x512xf32>
    %14 = arith.addf %11, %13 : vector<1x512xf32>
    %15 = vector.extract_strided_slice %14 {offsets = [0, 0], sizes = [1, 384], strides = [1, 1]} : vector<1x512xf32> to vector<1x384xf32>
    %16 = arith.negf %15 : vector<1x384xf32>
    %17 = math.exp %16 : vector<1x384xf32>
    %cst_16 = arith.constant 1.000000e+00 : f32
    %18 = vector.broadcast %cst_16 : f32 to vector<1x384xf32>
    %19 = arith.addf %18, %17 : vector<1x384xf32>
    %20 = arith.divf %18, %19 : vector<1x384xf32>
    %21 = vector.extract_strided_slice %20 {offsets = [0, 0], sizes = [1, 128], strides = [1, 1]} : vector<1x384xf32> to vector<1x128xf32>
    %22 = vector.extract_strided_slice %20 {offsets = [0, 128], sizes = [1, 128], strides = [1, 1]} : vector<1x384xf32> to vector<1x128xf32>
    %23 = vector.extract_strided_slice %20 {offsets = [0, 256], sizes = [1, 128], strides = [1, 1]} : vector<1x384xf32> to vector<1x128xf32>
    %24 = vector.extract_strided_slice %14 {offsets = [0, 384], sizes = [1, 128], strides = [1, 1]} : vector<1x512xf32> to vector<1x128xf32>
    %25 = math.tanh %24 : vector<1x128xf32>
    %26 = arith.mulf %22, %8 : vector<1x128xf32>
    %27 = arith.mulf %21, %25 : vector<1x128xf32>
    %28 = arith.addf %26, %27 : vector<1x128xf32>
    %29 = math.tanh %28 : vector<1x128xf32>
    %30 = arith.mulf %23, %29 : vector<1x128xf32>
    %c0_17 = arith.constant 0 : index
    %c0_18 = arith.constant 0 : index
    %31 = vector.load %arg4[%c0_17, %c0_18] : memref<128x512xf32, #tpu.memory_space<vmem>>, vector<128x512xf32>
    %cst_19 = arith.constant dense<0.000000e+00> : vector<1x512xf32>
    %32 = tpu.matmul %30, %31, %cst_19 {dimension_numbers = #tpu.dot_dimension_numbers<[1], [0], [0], [1], [0, 0, 1, 1], [], []>} : vector<1x128xf32>, vector<128x512xf32>, vector<1x512xf32> -> vector<1x512xf32>
    %c0_20 = arith.constant 0 : index
    %c0_21 = arith.constant 0 : index
    %33 = vector.load %arg5[%c0_20, %c0_21] : memref<128x512xf32, #tpu.memory_space<vmem>>, vector<128x512xf32>
    %cst_22 = arith.constant dense<0.000000e+00> : vector<1x512xf32>
    %34 = tpu.matmul %9, %33, %cst_22 {dimension_numbers = #tpu.dot_dimension_numbers<[1], [0], [0], [1], [0, 0, 1, 1], [], []>} : vector<1x128xf32>, vector<128x512xf32>, vector<1x512xf32> -> vector<1x512xf32>
    %35 = arith.addf %32, %34 : vector<1x512xf32>
    %c0_23 = arith.constant 0 : index
    %c0_24 = arith.constant 0 : index
    %36 = vector.load %arg6[%c0_23, %c0_24] : memref<1x512xf32, #tpu.memory_space<vmem>>, vector<1x512xf32>
    %37 = arith.addf %35, %36 : vector<1x512xf32>
    %38 = vector.extract_strided_slice %37 {offsets = [0, 0], sizes = [1, 384], strides = [1, 1]} : vector<1x512xf32> to vector<1x384xf32>
    %39 = arith.negf %38 : vector<1x384xf32>
    %40 = math.exp %39 : vector<1x384xf32>
    %cst_25 = arith.constant 1.000000e+00 : f32
    %41 = vector.broadcast %cst_25 : f32 to vector<1x384xf32>
    %42 = arith.addf %41, %40 : vector<1x384xf32>
    %43 = arith.divf %41, %42 : vector<1x384xf32>
    %44 = vector.extract_strided_slice %43 {offsets = [0, 0], sizes = [1, 128], strides = [1, 1]} : vector<1x384xf32> to vector<1x128xf32>
    %45 = vector.extract_strided_slice %43 {offsets = [0, 128], sizes = [1, 128], strides = [1, 1]} : vector<1x384xf32> to vector<1x128xf32>
    %46 = vector.extract_strided_slice %43 {offsets = [0, 256], sizes = [1, 128], strides = [1, 1]} : vector<1x384xf32> to vector<1x128xf32>
    %47 = vector.extract_strided_slice %37 {offsets = [0, 384], sizes = [1, 128], strides = [1, 1]} : vector<1x512xf32> to vector<1x128xf32>
    %48 = math.tanh %47 : vector<1x128xf32>
    %49 = arith.mulf %45, %10 : vector<1x128xf32>
    %50 = arith.mulf %44, %48 : vector<1x128xf32>
    %51 = arith.addf %49, %50 : vector<1x128xf32>
    %52 = math.tanh %51 : vector<1x128xf32>
    %53 = arith.mulf %46, %52 : vector<1x128xf32>
    %c1 = arith.constant 1 : index
    %c0_26 = arith.constant 0 : index
    %54 = vector.load %arg8[%c1, %c0_26] : memref<8x512xf32, #tpu.memory_space<vmem>>, vector<1x512xf32>
    %c0_27 = arith.constant 0 : index
    %c0_28 = arith.constant 0 : index
    %55 = vector.load %arg2[%c0_27, %c0_28] : memref<128x512xf32, #tpu.memory_space<vmem>>, vector<128x512xf32>
    %cst_29 = arith.constant dense<0.000000e+00> : vector<1x512xf32>
    %56 = tpu.matmul %30, %55, %cst_29 {dimension_numbers = #tpu.dot_dimension_numbers<[1], [0], [0], [1], [0, 0, 1, 1], [], []>} : vector<1x128xf32>, vector<128x512xf32>, vector<1x512xf32> -> vector<1x512xf32>
    %57 = arith.addf %54, %56 : vector<1x512xf32>
    %58 = vector.extract_strided_slice %57 {offsets = [0, 0], sizes = [1, 384], strides = [1, 1]} : vector<1x512xf32> to vector<1x384xf32>
    %59 = arith.negf %58 : vector<1x384xf32>
    %60 = math.exp %59 : vector<1x384xf32>
    %cst_30 = arith.constant 1.000000e+00 : f32
    %61 = vector.broadcast %cst_30 : f32 to vector<1x384xf32>
    %62 = arith.addf %61, %60 : vector<1x384xf32>
    %63 = arith.divf %61, %62 : vector<1x384xf32>
    %64 = vector.extract_strided_slice %63 {offsets = [0, 0], sizes = [1, 128], strides = [1, 1]} : vector<1x384xf32> to vector<1x128xf32>
    %65 = vector.extract_strided_slice %63 {offsets = [0, 128], sizes = [1, 128], strides = [1, 1]} : vector<1x384xf32> to vector<1x128xf32>
    %66 = vector.extract_strided_slice %63 {offsets = [0, 256], sizes = [1, 128], strides = [1, 1]} : vector<1x384xf32> to vector<1x128xf32>
    %67 = vector.extract_strided_slice %57 {offsets = [0, 384], sizes = [1, 128], strides = [1, 1]} : vector<1x512xf32> to vector<1x128xf32>
    %68 = math.tanh %67 : vector<1x128xf32>
    %69 = arith.mulf %65, %28 : vector<1x128xf32>
    %70 = arith.mulf %64, %68 : vector<1x128xf32>
    %71 = arith.addf %69, %70 : vector<1x128xf32>
    %72 = math.tanh %71 : vector<1x128xf32>
    %73 = arith.mulf %66, %72 : vector<1x128xf32>
    %c0_31 = arith.constant 0 : index
    %c0_32 = arith.constant 0 : index
    %74 = vector.load %arg4[%c0_31, %c0_32] : memref<128x512xf32, #tpu.memory_space<vmem>>, vector<128x512xf32>
    %cst_33 = arith.constant dense<0.000000e+00> : vector<1x512xf32>
    %75 = tpu.matmul %73, %74, %cst_33 {dimension_numbers = #tpu.dot_dimension_numbers<[1], [0], [0], [1], [0, 0, 1, 1], [], []>} : vector<1x128xf32>, vector<128x512xf32>, vector<1x512xf32> -> vector<1x512xf32>
    %c0_34 = arith.constant 0 : index
    %c0_35 = arith.constant 0 : index
    %76 = vector.load %arg5[%c0_34, %c0_35] : memref<128x512xf32, #tpu.memory_space<vmem>>, vector<128x512xf32>
    %cst_36 = arith.constant dense<0.000000e+00> : vector<1x512xf32>
    %77 = tpu.matmul %53, %76, %cst_36 {dimension_numbers = #tpu.dot_dimension_numbers<[1], [0], [0], [1], [0, 0, 1, 1], [], []>} : vector<1x128xf32>, vector<128x512xf32>, vector<1x512xf32> -> vector<1x512xf32>
    %78 = arith.addf %75, %77 : vector<1x512xf32>
    %c0_37 = arith.constant 0 : index
    %c0_38 = arith.constant 0 : index
    %79 = vector.load %arg6[%c0_37, %c0_38] : memref<1x512xf32, #tpu.memory_space<vmem>>, vector<1x512xf32>
    %80 = arith.addf %78, %79 : vector<1x512xf32>
    %81 = vector.extract_strided_slice %80 {offsets = [0, 0], sizes = [1, 384], strides = [1, 1]} : vector<1x512xf32> to vector<1x384xf32>
    %82 = arith.negf %81 : vector<1x384xf32>
    %83 = math.exp %82 : vector<1x384xf32>
    %cst_39 = arith.constant 1.000000e+00 : f32
    %84 = vector.broadcast %cst_39 : f32 to vector<1x384xf32>
    %85 = arith.addf %84, %83 : vector<1x384xf32>
    %86 = arith.divf %84, %85 : vector<1x384xf32>
    %87 = vector.extract_strided_slice %86 {offsets = [0, 0], sizes = [1, 128], strides = [1, 1]} : vector<1x384xf32> to vector<1x128xf32>
    %88 = vector.extract_strided_slice %86 {offsets = [0, 128], sizes = [1, 128], strides = [1, 1]} : vector<1x384xf32> to vector<1x128xf32>
    %89 = vector.extract_strided_slice %86 {offsets = [0, 256], sizes = [1, 128], strides = [1, 1]} : vector<1x384xf32> to vector<1x128xf32>
    %90 = vector.extract_strided_slice %80 {offsets = [0, 384], sizes = [1, 128], strides = [1, 1]} : vector<1x512xf32> to vector<1x128xf32>
    %91 = math.tanh %90 : vector<1x128xf32>
    %92 = arith.mulf %88, %51 : vector<1x128xf32>
    %93 = arith.mulf %87, %91 : vector<1x128xf32>
    %94 = arith.addf %92, %93 : vector<1x128xf32>
    %95 = math.tanh %94 : vector<1x128xf32>
    %96 = arith.mulf %89, %95 : vector<1x128xf32>
    %c2 = arith.constant 2 : index
    %c0_40 = arith.constant 0 : index
    %97 = vector.load %arg8[%c2, %c0_40] : memref<8x512xf32, #tpu.memory_space<vmem>>, vector<1x512xf32>
    %c0_41 = arith.constant 0 : index
    %c0_42 = arith.constant 0 : index
    %98 = vector.load %arg2[%c0_41, %c0_42] : memref<128x512xf32, #tpu.memory_space<vmem>>, vector<128x512xf32>
    %cst_43 = arith.constant dense<0.000000e+00> : vector<1x512xf32>
    %99 = tpu.matmul %73, %98, %cst_43 {dimension_numbers = #tpu.dot_dimension_numbers<[1], [0], [0], [1], [0, 0, 1, 1], [], []>} : vector<1x128xf32>, vector<128x512xf32>, vector<1x512xf32> -> vector<1x512xf32>
    %100 = arith.addf %97, %99 : vector<1x512xf32>
    %101 = vector.extract_strided_slice %100 {offsets = [0, 0], sizes = [1, 384], strides = [1, 1]} : vector<1x512xf32> to vector<1x384xf32>
    %102 = arith.negf %101 : vector<1x384xf32>
    %103 = math.exp %102 : vector<1x384xf32>
    %cst_44 = arith.constant 1.000000e+00 : f32
    %104 = vector.broadcast %cst_44 : f32 to vector<1x384xf32>
    %105 = arith.addf %104, %103 : vector<1x384xf32>
    %106 = arith.divf %104, %105 : vector<1x384xf32>
    %107 = vector.extract_strided_slice %106 {offsets = [0, 0], sizes = [1, 128], strides = [1, 1]} : vector<1x384xf32> to vector<1x128xf32>
    %108 = vector.extract_strided_slice %106 {offsets = [0, 128], sizes = [1, 128], strides = [1, 1]} : vector<1x384xf32> to vector<1x128xf32>
    %109 = vector.extract_strided_slice %106 {offsets = [0, 256], sizes = [1, 128], strides = [1, 1]} : vector<1x384xf32> to vector<1x128xf32>
    %110 = vector.extract_strided_slice %100 {offsets = [0, 384], sizes = [1, 128], strides = [1, 1]} : vector<1x512xf32> to vector<1x128xf32>
    %111 = math.tanh %110 : vector<1x128xf32>
    %112 = arith.mulf %108, %71 : vector<1x128xf32>
    %113 = arith.mulf %107, %111 : vector<1x128xf32>
    %114 = arith.addf %112, %113 : vector<1x128xf32>
    %115 = math.tanh %114 : vector<1x128xf32>
    %116 = arith.mulf %109, %115 : vector<1x128xf32>
    %c0_45 = arith.constant 0 : index
    %c0_46 = arith.constant 0 : index
    %117 = vector.load %arg4[%c0_45, %c0_46] : memref<128x512xf32, #tpu.memory_space<vmem>>, vector<128x512xf32>
    %cst_47 = arith.constant dense<0.000000e+00> : vector<1x512xf32>
    %118 = tpu.matmul %116, %117, %cst_47 {dimension_numbers = #tpu.dot_dimension_numbers<[1], [0], [0], [1], [0, 0, 1, 1], [], []>} : vector<1x128xf32>, vector<128x512xf32>, vector<1x512xf32> -> vector<1x512xf32>
    %c0_48 = arith.constant 0 : index
    %c0_49 = arith.constant 0 : index
    %119 = vector.load %arg5[%c0_48, %c0_49] : memref<128x512xf32, #tpu.memory_space<vmem>>, vector<128x512xf32>
    %cst_50 = arith.constant dense<0.000000e+00> : vector<1x512xf32>
    %120 = tpu.matmul %96, %119, %cst_50 {dimension_numbers = #tpu.dot_dimension_numbers<[1], [0], [0], [1], [0, 0, 1, 1], [], []>} : vector<1x128xf32>, vector<128x512xf32>, vector<1x512xf32> -> vector<1x512xf32>
    %121 = arith.addf %118, %120 : vector<1x512xf32>
    %c0_51 = arith.constant 0 : index
    %c0_52 = arith.constant 0 : index
    %122 = vector.load %arg6[%c0_51, %c0_52] : memref<1x512xf32, #tpu.memory_space<vmem>>, vector<1x512xf32>
    %123 = arith.addf %121, %122 : vector<1x512xf32>
    %124 = vector.extract_strided_slice %123 {offsets = [0, 0], sizes = [1, 384], strides = [1, 1]} : vector<1x512xf32> to vector<1x384xf32>
    %125 = arith.negf %124 : vector<1x384xf32>
    %126 = math.exp %125 : vector<1x384xf32>
    %cst_53 = arith.constant 1.000000e+00 : f32
    %127 = vector.broadcast %cst_53 : f32 to vector<1x384xf32>
    %128 = arith.addf %127, %126 : vector<1x384xf32>
    %129 = arith.divf %127, %128 : vector<1x384xf32>
    %130 = vector.extract_strided_slice %129 {offsets = [0, 0], sizes = [1, 128], strides = [1, 1]} : vector<1x384xf32> to vector<1x128xf32>
    %131 = vector.extract_strided_slice %129 {offsets = [0, 128], sizes = [1, 128], strides = [1, 1]} : vector<1x384xf32> to vector<1x128xf32>
    %132 = vector.extract_strided_slice %129 {offsets = [0, 256], sizes = [1, 128], strides = [1, 1]} : vector<1x384xf32> to vector<1x128xf32>
    %133 = vector.extract_strided_slice %123 {offsets = [0, 384], sizes = [1, 128], strides = [1, 1]} : vector<1x512xf32> to vector<1x128xf32>
    %134 = math.tanh %133 : vector<1x128xf32>
    %135 = arith.mulf %131, %94 : vector<1x128xf32>
    %136 = arith.mulf %130, %134 : vector<1x128xf32>
    %137 = arith.addf %135, %136 : vector<1x128xf32>
    %138 = math.tanh %137 : vector<1x128xf32>
    %139 = arith.mulf %132, %138 : vector<1x128xf32>
    %c3 = arith.constant 3 : index
    %c0_54 = arith.constant 0 : index
    %140 = vector.load %arg8[%c3, %c0_54] : memref<8x512xf32, #tpu.memory_space<vmem>>, vector<1x512xf32>
    %c0_55 = arith.constant 0 : index
    %c0_56 = arith.constant 0 : index
    %141 = vector.load %arg2[%c0_55, %c0_56] : memref<128x512xf32, #tpu.memory_space<vmem>>, vector<128x512xf32>
    %cst_57 = arith.constant dense<0.000000e+00> : vector<1x512xf32>
    %142 = tpu.matmul %116, %141, %cst_57 {dimension_numbers = #tpu.dot_dimension_numbers<[1], [0], [0], [1], [0, 0, 1, 1], [], []>} : vector<1x128xf32>, vector<128x512xf32>, vector<1x512xf32> -> vector<1x512xf32>
    %143 = arith.addf %140, %142 : vector<1x512xf32>
    %144 = vector.extract_strided_slice %143 {offsets = [0, 0], sizes = [1, 384], strides = [1, 1]} : vector<1x512xf32> to vector<1x384xf32>
    %145 = arith.negf %144 : vector<1x384xf32>
    %146 = math.exp %145 : vector<1x384xf32>
    %cst_58 = arith.constant 1.000000e+00 : f32
    %147 = vector.broadcast %cst_58 : f32 to vector<1x384xf32>
    %148 = arith.addf %147, %146 : vector<1x384xf32>
    %149 = arith.divf %147, %148 : vector<1x384xf32>
    %150 = vector.extract_strided_slice %149 {offsets = [0, 0], sizes = [1, 128], strides = [1, 1]} : vector<1x384xf32> to vector<1x128xf32>
    %151 = vector.extract_strided_slice %149 {offsets = [0, 128], sizes = [1, 128], strides = [1, 1]} : vector<1x384xf32> to vector<1x128xf32>
    %152 = vector.extract_strided_slice %149 {offsets = [0, 256], sizes = [1, 128], strides = [1, 1]} : vector<1x384xf32> to vector<1x128xf32>
    %153 = vector.extract_strided_slice %143 {offsets = [0, 384], sizes = [1, 128], strides = [1, 1]} : vector<1x512xf32> to vector<1x128xf32>
    %154 = math.tanh %153 : vector<1x128xf32>
    %155 = arith.mulf %151, %114 : vector<1x128xf32>
    %156 = arith.mulf %150, %154 : vector<1x128xf32>
    %157 = arith.addf %155, %156 : vector<1x128xf32>
    %158 = math.tanh %157 : vector<1x128xf32>
    %159 = arith.mulf %152, %158 : vector<1x128xf32>
    %c0_59 = arith.constant 0 : index
    %c0_60 = arith.constant 0 : index
    %160 = vector.load %arg4[%c0_59, %c0_60] : memref<128x512xf32, #tpu.memory_space<vmem>>, vector<128x512xf32>
    %cst_61 = arith.constant dense<0.000000e+00> : vector<1x512xf32>
    %161 = tpu.matmul %159, %160, %cst_61 {dimension_numbers = #tpu.dot_dimension_numbers<[1], [0], [0], [1], [0, 0, 1, 1], [], []>} : vector<1x128xf32>, vector<128x512xf32>, vector<1x512xf32> -> vector<1x512xf32>
    %c0_62 = arith.constant 0 : index
    %c0_63 = arith.constant 0 : index
    %162 = vector.load %arg5[%c0_62, %c0_63] : memref<128x512xf32, #tpu.memory_space<vmem>>, vector<128x512xf32>
    %cst_64 = arith.constant dense<0.000000e+00> : vector<1x512xf32>
    %163 = tpu.matmul %139, %162, %cst_64 {dimension_numbers = #tpu.dot_dimension_numbers<[1], [0], [0], [1], [0, 0, 1, 1], [], []>} : vector<1x128xf32>, vector<128x512xf32>, vector<1x512xf32> -> vector<1x512xf32>
    %164 = arith.addf %161, %163 : vector<1x512xf32>
    %c0_65 = arith.constant 0 : index
    %c0_66 = arith.constant 0 : index
    %165 = vector.load %arg6[%c0_65, %c0_66] : memref<1x512xf32, #tpu.memory_space<vmem>>, vector<1x512xf32>
    %166 = arith.addf %164, %165 : vector<1x512xf32>
    %167 = vector.extract_strided_slice %166 {offsets = [0, 0], sizes = [1, 384], strides = [1, 1]} : vector<1x512xf32> to vector<1x384xf32>
    %168 = arith.negf %167 : vector<1x384xf32>
    %169 = math.exp %168 : vector<1x384xf32>
    %cst_67 = arith.constant 1.000000e+00 : f32
    %170 = vector.broadcast %cst_67 : f32 to vector<1x384xf32>
    %171 = arith.addf %170, %169 : vector<1x384xf32>
    %172 = arith.divf %170, %171 : vector<1x384xf32>
    %173 = vector.extract_strided_slice %172 {offsets = [0, 0], sizes = [1, 128], strides = [1, 1]} : vector<1x384xf32> to vector<1x128xf32>
    %174 = vector.extract_strided_slice %172 {offsets = [0, 128], sizes = [1, 128], strides = [1, 1]} : vector<1x384xf32> to vector<1x128xf32>
    %175 = vector.extract_strided_slice %172 {offsets = [0, 256], sizes = [1, 128], strides = [1, 1]} : vector<1x384xf32> to vector<1x128xf32>
    %176 = vector.extract_strided_slice %166 {offsets = [0, 384], sizes = [1, 128], strides = [1, 1]} : vector<1x512xf32> to vector<1x128xf32>
    %177 = math.tanh %176 : vector<1x128xf32>
    %178 = arith.mulf %174, %137 : vector<1x128xf32>
    %179 = arith.mulf %173, %177 : vector<1x128xf32>
    %180 = arith.addf %178, %179 : vector<1x128xf32>
    %181 = math.tanh %180 : vector<1x128xf32>
    %182 = arith.mulf %175, %181 : vector<1x128xf32>
    %c4 = arith.constant 4 : index
    %c0_68 = arith.constant 0 : index
    %183 = vector.load %arg8[%c4, %c0_68] : memref<8x512xf32, #tpu.memory_space<vmem>>, vector<1x512xf32>
    %c0_69 = arith.constant 0 : index
    %c0_70 = arith.constant 0 : index
    %184 = vector.load %arg2[%c0_69, %c0_70] : memref<128x512xf32, #tpu.memory_space<vmem>>, vector<128x512xf32>
    %cst_71 = arith.constant dense<0.000000e+00> : vector<1x512xf32>
    %185 = tpu.matmul %159, %184, %cst_71 {dimension_numbers = #tpu.dot_dimension_numbers<[1], [0], [0], [1], [0, 0, 1, 1], [], []>} : vector<1x128xf32>, vector<128x512xf32>, vector<1x512xf32> -> vector<1x512xf32>
    %186 = arith.addf %183, %185 : vector<1x512xf32>
    %187 = vector.extract_strided_slice %186 {offsets = [0, 0], sizes = [1, 384], strides = [1, 1]} : vector<1x512xf32> to vector<1x384xf32>
    %188 = arith.negf %187 : vector<1x384xf32>
    %189 = math.exp %188 : vector<1x384xf32>
    %cst_72 = arith.constant 1.000000e+00 : f32
    %190 = vector.broadcast %cst_72 : f32 to vector<1x384xf32>
    %191 = arith.addf %190, %189 : vector<1x384xf32>
    %192 = arith.divf %190, %191 : vector<1x384xf32>
    %193 = vector.extract_strided_slice %192 {offsets = [0, 0], sizes = [1, 128], strides = [1, 1]} : vector<1x384xf32> to vector<1x128xf32>
    %194 = vector.extract_strided_slice %192 {offsets = [0, 128], sizes = [1, 128], strides = [1, 1]} : vector<1x384xf32> to vector<1x128xf32>
    %195 = vector.extract_strided_slice %192 {offsets = [0, 256], sizes = [1, 128], strides = [1, 1]} : vector<1x384xf32> to vector<1x128xf32>
    %196 = vector.extract_strided_slice %186 {offsets = [0, 384], sizes = [1, 128], strides = [1, 1]} : vector<1x512xf32> to vector<1x128xf32>
    %197 = math.tanh %196 : vector<1x128xf32>
    %198 = arith.mulf %194, %157 : vector<1x128xf32>
    %199 = arith.mulf %193, %197 : vector<1x128xf32>
    %200 = arith.addf %198, %199 : vector<1x128xf32>
    %201 = math.tanh %200 : vector<1x128xf32>
    %202 = arith.mulf %195, %201 : vector<1x128xf32>
    %c0_73 = arith.constant 0 : index
    %c0_74 = arith.constant 0 : index
    %203 = vector.load %arg4[%c0_73, %c0_74] : memref<128x512xf32, #tpu.memory_space<vmem>>, vector<128x512xf32>
    %cst_75 = arith.constant dense<0.000000e+00> : vector<1x512xf32>
    %204 = tpu.matmul %202, %203, %cst_75 {dimension_numbers = #tpu.dot_dimension_numbers<[1], [0], [0], [1], [0, 0, 1, 1], [], []>} : vector<1x128xf32>, vector<128x512xf32>, vector<1x512xf32> -> vector<1x512xf32>
    %c0_76 = arith.constant 0 : index
    %c0_77 = arith.constant 0 : index
    %205 = vector.load %arg5[%c0_76, %c0_77] : memref<128x512xf32, #tpu.memory_space<vmem>>, vector<128x512xf32>
    %cst_78 = arith.constant dense<0.000000e+00> : vector<1x512xf32>
    %206 = tpu.matmul %182, %205, %cst_78 {dimension_numbers = #tpu.dot_dimension_numbers<[1], [0], [0], [1], [0, 0, 1, 1], [], []>} : vector<1x128xf32>, vector<128x512xf32>, vector<1x512xf32> -> vector<1x512xf32>
    %207 = arith.addf %204, %206 : vector<1x512xf32>
    %c0_79 = arith.constant 0 : index
    %c0_80 = arith.constant 0 : index
    %208 = vector.load %arg6[%c0_79, %c0_80] : memref<1x512xf32, #tpu.memory_space<vmem>>, vector<1x512xf32>
    %209 = arith.addf %207, %208 : vector<1x512xf32>
    %210 = vector.extract_strided_slice %209 {offsets = [0, 0], sizes = [1, 384], strides = [1, 1]} : vector<1x512xf32> to vector<1x384xf32>
    %211 = arith.negf %210 : vector<1x384xf32>
    %212 = math.exp %211 : vector<1x384xf32>
    %cst_81 = arith.constant 1.000000e+00 : f32
    %213 = vector.broadcast %cst_81 : f32 to vector<1x384xf32>
    %214 = arith.addf %213, %212 : vector<1x384xf32>
    %215 = arith.divf %213, %214 : vector<1x384xf32>
    %216 = vector.extract_strided_slice %215 {offsets = [0, 0], sizes = [1, 128], strides = [1, 1]} : vector<1x384xf32> to vector<1x128xf32>
    %217 = vector.extract_strided_slice %215 {offsets = [0, 128], sizes = [1, 128], strides = [1, 1]} : vector<1x384xf32> to vector<1x128xf32>
    %218 = vector.extract_strided_slice %215 {offsets = [0, 256], sizes = [1, 128], strides = [1, 1]} : vector<1x384xf32> to vector<1x128xf32>
    %219 = vector.extract_strided_slice %209 {offsets = [0, 384], sizes = [1, 128], strides = [1, 1]} : vector<1x512xf32> to vector<1x128xf32>
    %220 = math.tanh %219 : vector<1x128xf32>
    %221 = arith.mulf %217, %180 : vector<1x128xf32>
    %222 = arith.mulf %216, %220 : vector<1x128xf32>
    %223 = arith.addf %221, %222 : vector<1x128xf32>
    %224 = math.tanh %223 : vector<1x128xf32>
    %225 = arith.mulf %218, %224 : vector<1x128xf32>
    %c5 = arith.constant 5 : index
    %c0_82 = arith.constant 0 : index
    %226 = vector.load %arg8[%c5, %c0_82] : memref<8x512xf32, #tpu.memory_space<vmem>>, vector<1x512xf32>
    %c0_83 = arith.constant 0 : index
    %c0_84 = arith.constant 0 : index
    %227 = vector.load %arg2[%c0_83, %c0_84] : memref<128x512xf32, #tpu.memory_space<vmem>>, vector<128x512xf32>
    %cst_85 = arith.constant dense<0.000000e+00> : vector<1x512xf32>
    %228 = tpu.matmul %202, %227, %cst_85 {dimension_numbers = #tpu.dot_dimension_numbers<[1], [0], [0], [1], [0, 0, 1, 1], [], []>} : vector<1x128xf32>, vector<128x512xf32>, vector<1x512xf32> -> vector<1x512xf32>
    %229 = arith.addf %226, %228 : vector<1x512xf32>
    %230 = vector.extract_strided_slice %229 {offsets = [0, 0], sizes = [1, 384], strides = [1, 1]} : vector<1x512xf32> to vector<1x384xf32>
    %231 = arith.negf %230 : vector<1x384xf32>
    %232 = math.exp %231 : vector<1x384xf32>
    %cst_86 = arith.constant 1.000000e+00 : f32
    %233 = vector.broadcast %cst_86 : f32 to vector<1x384xf32>
    %234 = arith.addf %233, %232 : vector<1x384xf32>
    %235 = arith.divf %233, %234 : vector<1x384xf32>
    %236 = vector.extract_strided_slice %235 {offsets = [0, 0], sizes = [1, 128], strides = [1, 1]} : vector<1x384xf32> to vector<1x128xf32>
    %237 = vector.extract_strided_slice %235 {offsets = [0, 128], sizes = [1, 128], strides = [1, 1]} : vector<1x384xf32> to vector<1x128xf32>
    %238 = vector.extract_strided_slice %235 {offsets = [0, 256], sizes = [1, 128], strides = [1, 1]} : vector<1x384xf32> to vector<1x128xf32>
    %239 = vector.extract_strided_slice %229 {offsets = [0, 384], sizes = [1, 128], strides = [1, 1]} : vector<1x512xf32> to vector<1x128xf32>
    %240 = math.tanh %239 : vector<1x128xf32>
    %241 = arith.mulf %237, %200 : vector<1x128xf32>
    %242 = arith.mulf %236, %240 : vector<1x128xf32>
    %243 = arith.addf %241, %242 : vector<1x128xf32>
    %244 = math.tanh %243 : vector<1x128xf32>
    %245 = arith.mulf %238, %244 : vector<1x128xf32>
    %c0_87 = arith.constant 0 : index
    %c0_88 = arith.constant 0 : index
    %246 = vector.load %arg4[%c0_87, %c0_88] : memref<128x512xf32, #tpu.memory_space<vmem>>, vector<128x512xf32>
    %cst_89 = arith.constant dense<0.000000e+00> : vector<1x512xf32>
    %247 = tpu.matmul %245, %246, %cst_89 {dimension_numbers = #tpu.dot_dimension_numbers<[1], [0], [0], [1], [0, 0, 1, 1], [], []>} : vector<1x128xf32>, vector<128x512xf32>, vector<1x512xf32> -> vector<1x512xf32>
    %c0_90 = arith.constant 0 : index
    %c0_91 = arith.constant 0 : index
    %248 = vector.load %arg5[%c0_90, %c0_91] : memref<128x512xf32, #tpu.memory_space<vmem>>, vector<128x512xf32>
    %cst_92 = arith.constant dense<0.000000e+00> : vector<1x512xf32>
    %249 = tpu.matmul %225, %248, %cst_92 {dimension_numbers = #tpu.dot_dimension_numbers<[1], [0], [0], [1], [0, 0, 1, 1], [], []>} : vector<1x128xf32>, vector<128x512xf32>, vector<1x512xf32> -> vector<1x512xf32>
    %250 = arith.addf %247, %249 : vector<1x512xf32>
    %c0_93 = arith.constant 0 : index
    %c0_94 = arith.constant 0 : index
    %251 = vector.load %arg6[%c0_93, %c0_94] : memref<1x512xf32, #tpu.memory_space<vmem>>, vector<1x512xf32>
    %252 = arith.addf %250, %251 : vector<1x512xf32>
    %253 = vector.extract_strided_slice %252 {offsets = [0, 0], sizes = [1, 384], strides = [1, 1]} : vector<1x512xf32> to vector<1x384xf32>
    %254 = arith.negf %253 : vector<1x384xf32>
    %255 = math.exp %254 : vector<1x384xf32>
    %cst_95 = arith.constant 1.000000e+00 : f32
    %256 = vector.broadcast %cst_95 : f32 to vector<1x384xf32>
    %257 = arith.addf %256, %255 : vector<1x384xf32>
    %258 = arith.divf %256, %257 : vector<1x384xf32>
    %259 = vector.extract_strided_slice %258 {offsets = [0, 0], sizes = [1, 128], strides = [1, 1]} : vector<1x384xf32> to vector<1x128xf32>
    %260 = vector.extract_strided_slice %258 {offsets = [0, 128], sizes = [1, 128], strides = [1, 1]} : vector<1x384xf32> to vector<1x128xf32>
    %261 = vector.extract_strided_slice %258 {offsets = [0, 256], sizes = [1, 128], strides = [1, 1]} : vector<1x384xf32> to vector<1x128xf32>
    %262 = vector.extract_strided_slice %252 {offsets = [0, 384], sizes = [1, 128], strides = [1, 1]} : vector<1x512xf32> to vector<1x128xf32>
    %263 = math.tanh %262 : vector<1x128xf32>
    %264 = arith.mulf %260, %223 : vector<1x128xf32>
    %265 = arith.mulf %259, %263 : vector<1x128xf32>
    %266 = arith.addf %264, %265 : vector<1x128xf32>
    %267 = math.tanh %266 : vector<1x128xf32>
    %268 = arith.mulf %261, %267 : vector<1x128xf32>
    %c6 = arith.constant 6 : index
    %c0_96 = arith.constant 0 : index
    %269 = vector.load %arg8[%c6, %c0_96] : memref<8x512xf32, #tpu.memory_space<vmem>>, vector<1x512xf32>
    %c0_97 = arith.constant 0 : index
    %c0_98 = arith.constant 0 : index
    %270 = vector.load %arg2[%c0_97, %c0_98] : memref<128x512xf32, #tpu.memory_space<vmem>>, vector<128x512xf32>
    %cst_99 = arith.constant dense<0.000000e+00> : vector<1x512xf32>
    %271 = tpu.matmul %245, %270, %cst_99 {dimension_numbers = #tpu.dot_dimension_numbers<[1], [0], [0], [1], [0, 0, 1, 1], [], []>} : vector<1x128xf32>, vector<128x512xf32>, vector<1x512xf32> -> vector<1x512xf32>
    %272 = arith.addf %269, %271 : vector<1x512xf32>
    %273 = vector.extract_strided_slice %272 {offsets = [0, 0], sizes = [1, 384], strides = [1, 1]} : vector<1x512xf32> to vector<1x384xf32>
    %274 = arith.negf %273 : vector<1x384xf32>
    %275 = math.exp %274 : vector<1x384xf32>
    %cst_100 = arith.constant 1.000000e+00 : f32
    %276 = vector.broadcast %cst_100 : f32 to vector<1x384xf32>
    %277 = arith.addf %276, %275 : vector<1x384xf32>
    %278 = arith.divf %276, %277 : vector<1x384xf32>
    %279 = vector.extract_strided_slice %278 {offsets = [0, 0], sizes = [1, 128], strides = [1, 1]} : vector<1x384xf32> to vector<1x128xf32>
    %280 = vector.extract_strided_slice %278 {offsets = [0, 128], sizes = [1, 128], strides = [1, 1]} : vector<1x384xf32> to vector<1x128xf32>
    %281 = vector.extract_strided_slice %278 {offsets = [0, 256], sizes = [1, 128], strides = [1, 1]} : vector<1x384xf32> to vector<1x128xf32>
    %282 = vector.extract_strided_slice %272 {offsets = [0, 384], sizes = [1, 128], strides = [1, 1]} : vector<1x512xf32> to vector<1x128xf32>
    %283 = math.tanh %282 : vector<1x128xf32>
    %284 = arith.mulf %280, %243 : vector<1x128xf32>
    %285 = arith.mulf %279, %283 : vector<1x128xf32>
    %286 = arith.addf %284, %285 : vector<1x128xf32>
    %287 = math.tanh %286 : vector<1x128xf32>
    %288 = arith.mulf %281, %287 : vector<1x128xf32>
    %c0_101 = arith.constant 0 : index
    %c0_102 = arith.constant 0 : index
    %289 = vector.load %arg4[%c0_101, %c0_102] : memref<128x512xf32, #tpu.memory_space<vmem>>, vector<128x512xf32>
    %cst_103 = arith.constant dense<0.000000e+00> : vector<1x512xf32>
    %290 = tpu.matmul %288, %289, %cst_103 {dimension_numbers = #tpu.dot_dimension_numbers<[1], [0], [0], [1], [0, 0, 1, 1], [], []>} : vector<1x128xf32>, vector<128x512xf32>, vector<1x512xf32> -> vector<1x512xf32>
    %c0_104 = arith.constant 0 : index
    %c0_105 = arith.constant 0 : index
    %291 = vector.load %arg5[%c0_104, %c0_105] : memref<128x512xf32, #tpu.memory_space<vmem>>, vector<128x512xf32>
    %cst_106 = arith.constant dense<0.000000e+00> : vector<1x512xf32>
    %292 = tpu.matmul %268, %291, %cst_106 {dimension_numbers = #tpu.dot_dimension_numbers<[1], [0], [0], [1], [0, 0, 1, 1], [], []>} : vector<1x128xf32>, vector<128x512xf32>, vector<1x512xf32> -> vector<1x512xf32>
    %293 = arith.addf %290, %292 : vector<1x512xf32>
    %c0_107 = arith.constant 0 : index
    %c0_108 = arith.constant 0 : index
    %294 = vector.load %arg6[%c0_107, %c0_108] : memref<1x512xf32, #tpu.memory_space<vmem>>, vector<1x512xf32>
    %295 = arith.addf %293, %294 : vector<1x512xf32>
    %296 = vector.extract_strided_slice %295 {offsets = [0, 0], sizes = [1, 384], strides = [1, 1]} : vector<1x512xf32> to vector<1x384xf32>
    %297 = arith.negf %296 : vector<1x384xf32>
    %298 = math.exp %297 : vector<1x384xf32>
    %cst_109 = arith.constant 1.000000e+00 : f32
    %299 = vector.broadcast %cst_109 : f32 to vector<1x384xf32>
    %300 = arith.addf %299, %298 : vector<1x384xf32>
    %301 = arith.divf %299, %300 : vector<1x384xf32>
    %302 = vector.extract_strided_slice %301 {offsets = [0, 0], sizes = [1, 128], strides = [1, 1]} : vector<1x384xf32> to vector<1x128xf32>
    %303 = vector.extract_strided_slice %301 {offsets = [0, 128], sizes = [1, 128], strides = [1, 1]} : vector<1x384xf32> to vector<1x128xf32>
    %304 = vector.extract_strided_slice %301 {offsets = [0, 256], sizes = [1, 128], strides = [1, 1]} : vector<1x384xf32> to vector<1x128xf32>
    %305 = vector.extract_strided_slice %295 {offsets = [0, 384], sizes = [1, 128], strides = [1, 1]} : vector<1x512xf32> to vector<1x128xf32>
    %306 = math.tanh %305 : vector<1x128xf32>
    %307 = arith.mulf %303, %266 : vector<1x128xf32>
    %308 = arith.mulf %302, %306 : vector<1x128xf32>
    %309 = arith.addf %307, %308 : vector<1x128xf32>
    %310 = math.tanh %309 : vector<1x128xf32>
    %311 = arith.mulf %304, %310 : vector<1x128xf32>
    %c7 = arith.constant 7 : index
    %c0_110 = arith.constant 0 : index
    %312 = vector.load %arg8[%c7, %c0_110] : memref<8x512xf32, #tpu.memory_space<vmem>>, vector<1x512xf32>
    %c0_111 = arith.constant 0 : index
    %c0_112 = arith.constant 0 : index
    %313 = vector.load %arg2[%c0_111, %c0_112] : memref<128x512xf32, #tpu.memory_space<vmem>>, vector<128x512xf32>
    %cst_113 = arith.constant dense<0.000000e+00> : vector<1x512xf32>
    %314 = tpu.matmul %288, %313, %cst_113 {dimension_numbers = #tpu.dot_dimension_numbers<[1], [0], [0], [1], [0, 0, 1, 1], [], []>} : vector<1x128xf32>, vector<128x512xf32>, vector<1x512xf32> -> vector<1x512xf32>
    %315 = arith.addf %312, %314 : vector<1x512xf32>
    %316 = vector.extract_strided_slice %315 {offsets = [0, 0], sizes = [1, 384], strides = [1, 1]} : vector<1x512xf32> to vector<1x384xf32>
    %317 = arith.negf %316 : vector<1x384xf32>
    %318 = math.exp %317 : vector<1x384xf32>
    %cst_114 = arith.constant 1.000000e+00 : f32
    %319 = vector.broadcast %cst_114 : f32 to vector<1x384xf32>
    %320 = arith.addf %319, %318 : vector<1x384xf32>
    %321 = arith.divf %319, %320 : vector<1x384xf32>
    %322 = vector.extract_strided_slice %321 {offsets = [0, 0], sizes = [1, 128], strides = [1, 1]} : vector<1x384xf32> to vector<1x128xf32>
    %323 = vector.extract_strided_slice %321 {offsets = [0, 128], sizes = [1, 128], strides = [1, 1]} : vector<1x384xf32> to vector<1x128xf32>
    %324 = vector.extract_strided_slice %321 {offsets = [0, 256], sizes = [1, 128], strides = [1, 1]} : vector<1x384xf32> to vector<1x128xf32>
    %325 = vector.extract_strided_slice %315 {offsets = [0, 384], sizes = [1, 128], strides = [1, 1]} : vector<1x512xf32> to vector<1x128xf32>
    %326 = math.tanh %325 : vector<1x128xf32>
    %327 = arith.mulf %323, %286 : vector<1x128xf32>
    %328 = arith.mulf %322, %326 : vector<1x128xf32>
    %329 = arith.addf %327, %328 : vector<1x128xf32>
    %330 = math.tanh %329 : vector<1x128xf32>
    %331 = arith.mulf %324, %330 : vector<1x128xf32>
    %c0_115 = arith.constant 0 : index
    %c0_116 = arith.constant 0 : index
    %332 = vector.load %arg4[%c0_115, %c0_116] : memref<128x512xf32, #tpu.memory_space<vmem>>, vector<128x512xf32>
    %cst_117 = arith.constant dense<0.000000e+00> : vector<1x512xf32>
    %333 = tpu.matmul %331, %332, %cst_117 {dimension_numbers = #tpu.dot_dimension_numbers<[1], [0], [0], [1], [0, 0, 1, 1], [], []>} : vector<1x128xf32>, vector<128x512xf32>, vector<1x512xf32> -> vector<1x512xf32>
    %c0_118 = arith.constant 0 : index
    %c0_119 = arith.constant 0 : index
    %334 = vector.load %arg5[%c0_118, %c0_119] : memref<128x512xf32, #tpu.memory_space<vmem>>, vector<128x512xf32>
    %cst_120 = arith.constant dense<0.000000e+00> : vector<1x512xf32>
    %335 = tpu.matmul %311, %334, %cst_120 {dimension_numbers = #tpu.dot_dimension_numbers<[1], [0], [0], [1], [0, 0, 1, 1], [], []>} : vector<1x128xf32>, vector<128x512xf32>, vector<1x512xf32> -> vector<1x512xf32>
    %336 = arith.addf %333, %335 : vector<1x512xf32>
    %c0_121 = arith.constant 0 : index
    %c0_122 = arith.constant 0 : index
    %337 = vector.load %arg6[%c0_121, %c0_122] : memref<1x512xf32, #tpu.memory_space<vmem>>, vector<1x512xf32>
    %338 = arith.addf %336, %337 : vector<1x512xf32>
    %339 = vector.extract_strided_slice %338 {offsets = [0, 0], sizes = [1, 384], strides = [1, 1]} : vector<1x512xf32> to vector<1x384xf32>
    %340 = arith.negf %339 : vector<1x384xf32>
    %341 = math.exp %340 : vector<1x384xf32>
    %cst_123 = arith.constant 1.000000e+00 : f32
    %342 = vector.broadcast %cst_123 : f32 to vector<1x384xf32>
    %343 = arith.addf %342, %341 : vector<1x384xf32>
    %344 = arith.divf %342, %343 : vector<1x384xf32>
    %345 = vector.extract_strided_slice %344 {offsets = [0, 0], sizes = [1, 128], strides = [1, 1]} : vector<1x384xf32> to vector<1x128xf32>
    %346 = vector.extract_strided_slice %344 {offsets = [0, 128], sizes = [1, 128], strides = [1, 1]} : vector<1x384xf32> to vector<1x128xf32>
    %347 = vector.extract_strided_slice %344 {offsets = [0, 256], sizes = [1, 128], strides = [1, 1]} : vector<1x384xf32> to vector<1x128xf32>
    %348 = vector.extract_strided_slice %338 {offsets = [0, 384], sizes = [1, 128], strides = [1, 1]} : vector<1x512xf32> to vector<1x128xf32>
    %349 = math.tanh %348 : vector<1x128xf32>
    %350 = arith.mulf %346, %309 : vector<1x128xf32>
    %351 = arith.mulf %345, %349 : vector<1x128xf32>
    %352 = arith.addf %350, %351 : vector<1x128xf32>
    %353 = math.tanh %352 : vector<1x128xf32>
    %354 = arith.mulf %347, %353 : vector<1x128xf32>
    %c0_124 = arith.constant 0 : index
    %c0_125 = arith.constant 0 : index
    %355 = vector.load %arg7[%c0_124, %c0_125] : memref<1x128xf32, #tpu.memory_space<vmem>>, vector<1x128xf32>
    tpu.vector_store %arg7[%c0_124, %c0_125], %354 {strides = array<i32>} : memref<1x128xf32, #tpu.memory_space<vmem>>, vector<1x128xf32>,
    return
  }
}

</mosaic_0001>

<bundles_post_ra>
// kernel: tpu_custom_call.1
= control target key start
LH: loop header
LB: loop body
LE: loop exit
PB: predicated region body
PF: predicated region fallthrough
CT: control target
= control target key end

     0   :  { %12 = vsyncpa [#allocation4], 0  ;;  %s7787_s0 = inlined_call_operand.hbm [shape: f32[8,8], index: 0, kind: input, shape index: {}]   ;;  %s7788_s1 = inlined_call_operand.hbm [shape: f32[8,512], index: 1, kind: input, shape index: {}]   ;;  %s7789_s2 = inlined_call_operand.hbm [shape: f32[128,512], index: 2, kind: input, shape index: {}]   ;;  %s7790_s3 = inlined_call_operand.vmem [shape: f32[1,512], index: 3, kind: input, shape index: {}]   ;;  %s7791_s4 = inlined_call_operand.hbm [shape: f32[128,512], index: 4, kind: input, shape index: {}]   ;;  %s7792_s5 = inlined_call_operand.hbm [shape: f32[128,512], index: 5, kind: input, shape index: {}]   ;;  %s7793_s6 = inlined_call_operand.vmem [shape: f32[1,512], index: 6, kind: input, shape index: {}]   ;;  %s7794_s7 = inlined_call_operand.hbm [shape: f32[1,128], index: 7, kind: output, shape index: {}]  }
   0x1   :  { %13 = vsyncpa [#allocation7], 0 }
   0x2   :  { %14 = vsyncpa [#allocation10], 0 }
   0x3   :  { %15 = vsyncpa [#allocation5], 0  ;;  %s6491_s24 = smov [#allocation6]   ;;  %s6351_s28 = scalar_lea.hbm %s7788_s1, 512 }
   0x4   :  { %s32_s25 = sshll.u32 %s6491_s24, 4  ;;  %p6352_p0 = scmp.ne.s32.totalorder %s7788_s1, %s6351_s28  ;;  %s33_s25 = int_to_ptr.vmem [resolvable:$true] %s32_s25 }
   0x5   :  { %p6355_p1 = scmp.lt.u32.totalorder %s6351_s28, %s7788_s1 }
   0x7   :  { %p6357_p2 = pnand %p6355_p1, %p6352_p0 }
   0x9   :  { %6360 = shalt.err (!%p6357_p2)
}
   0xa   :  { %s6361_s10 = scalar_lea.vmem %s33_s25, 512  ;;  %p6366_p4 = scmp.lt.s32.totalorder %s33_s25, %s33_s25 }
   0xb   :  { %p6362_p3 = scmp.ne.s32.totalorder %s33_s25, %s6361_s10  ;;  %p6367_p5 = scmp.lt.s32.totalorder %s6361_s10, %s6361_s10 }
   0xd   :  { %p6368_p6 = por %p6367_p5, %p6366_p4 }
   0xf   :  { %p6369_p7 = pnand %p6368_p6, %p6362_p3 }
  0x11   :  { %6372 = shalt.err (!%p6369_p7)
}
  0x12   :  { %35 = dma.hbm_to_vmem [thread:$0]  %s7788_s1, 512, %s33_s25, [#allocation7]  }
  0x13   :  { %s6492_s13 = smov [#allocation9]   ;;  %s6493_s15 = smov [#allocation3]  }
  0x14   :  { %s55_s14 = sshll.u32 %s6492_s13, 4  ;;  %s22_s16 = sshll.u32 %s6493_s15, 4  ;;  %s56_s14 = int_to_ptr.vmem [resolvable:$true] %s55_s14  ;;  %s23_s16 = int_to_ptr.vmem [resolvable:$true] %s22_s16 }
  0x15   :  { %s6373_s19 = scalar_lea.hbm %s7791_s4, 8192 }
  0x16   :  { %p6374_p8 = scmp.ne.s32.totalorder %s7791_s4, %s6373_s19  ;;  %p6377_p9 = scmp.lt.u32.totalorder %s6373_s19, %s7791_s4 }
  0x18   :  { %p6379_p10 = pnand %p6377_p9, %p6374_p8 }
  0x1a   :  { %6382 = shalt.err (!%p6379_p10)
}
  0x1b   :  { %s6383_s1 = scalar_lea.vmem %s56_s14, 8192  ;;  %p6388_p12 = scmp.lt.s32.totalorder %s56_s14, %s56_s14 }
  0x1c   :  { %p6384_p11 = scmp.ne.s32.totalorder %s56_s14, %s6383_s1  ;;  %p6389_p13 = scmp.lt.s32.totalorder %s6383_s1, %s6383_s1 }
  0x1e   :  { %p6390_p0 = por %p6389_p13, %p6388_p12 }
  0x20   :  { %p6391_p1 = pnand %p6390_p0, %p6384_p11 }
  0x22   :  { %6394 = shalt.err (!%p6391_p1)
}
  0x23   :  { %s6494_s24 = smov 512   ;;  %s6495_s25 = smov 32  }
  0x24   :  { %61 = dma.hbm_to_vmem [thread:$0]  %s7791_s4, 8192, %s56_s14, [#allocation10], %s6494_s24, %s6494_s24, %s6495_s25  }
  0x25   :  { %s6395_s30 = scalar_lea.hbm %s7787_s0, 128 }
  0x26   :  { %p6396_p2 = scmp.ne.s32.totalorder %s7787_s0, %s6395_s30  ;;  %p6399_p3 = scmp.lt.u32.totalorder %s6395_s30, %s7787_s0 }
  0x28   :  { %p6401_p4 = pnand %p6399_p3, %p6396_p2 }
  0x2a   :  { %6404 = shalt.err (!%p6401_p4)
}
  0x2b   :  { %s6405_s12 = scalar_lea.vmem %s23_s16, 128  ;;  %p6410_p6 = scmp.lt.s32.totalorder %s23_s16, %s23_s16 }
  0x2c   :  { %p6406_p5 = scmp.ne.s32.totalorder %s23_s16, %s6405_s12  ;;  %p6411_p7 = scmp.lt.s32.totalorder %s6405_s12, %s6405_s12 }
  0x2e   :  { %p6412_p8 = por %p6411_p7, %p6410_p6 }
  0x30   :  { %p6413_p9 = pnand %p6412_p8, %p6406_p5 }
  0x32   :  { %6416 = shalt.err (!%p6413_p9)
}
  0x33   :  { %25 = dma.hbm_to_vmem [thread:$0]  %s7787_s0, 128, %s23_s16, [#allocation4]  }
  0x34   :  { %s6496_s14 = smov [#allocation8]   ;;  %s6497_s17 = smov [#allocation11]  }
  0x35   :  { %s41_s15 = sshll.u32 %s6496_s14, 4  ;;  %s67_s18 = sshll.u32 %s6497_s17, 4  ;;  %s42_s15 = int_to_ptr.vmem [resolvable:$true] %s41_s15  ;;  %s68_s18 = int_to_ptr.vmem [resolvable:$true] %s67_s18 }
  0x36   :  { %s6417_s21 = scalar_lea.hbm %s7789_s2, 8192 }
  0x37   :  { %p6418_p10 = scmp.ne.s32.totalorder %s7789_s2, %s6417_s21  ;;  %p6421_p11 = scmp.lt.u32.totalorder %s6417_s21, %s7789_s2 }
  0x39   :  { %p6423_p12 = pnand %p6421_p11, %p6418_p10 }
  0x3b   :  { %6426 = shalt.err (!%p6423_p12)
}
  0x3c   :  { %s6427_s0 = scalar_lea.vmem %s42_s15, 8192  ;;  %p6432_p0 = scmp.lt.s32.totalorder %s42_s15, %s42_s15 }
  0x3d   :  { %p6428_p13 = scmp.ne.s32.totalorder %s42_s15, %s6427_s0  ;;  %p6433_p1 = scmp.lt.s32.totalorder %s6427_s0, %s6427_s0 }
  0x3f   :  { %p6434_p2 = por %p6433_p1, %p6432_p0 }
  0x41   :  { %p6435_p3 = pnand %p6434_p2, %p6428_p13 }
  0x43   :  { %6438 = shalt.err (!%p6435_p3)
}
  0x44   :  { %47 = dma.hbm_to_vmem [thread:$0]  %s7789_s2, 8192, %s42_s15, [#allocation7], %s6494_s24, %s6494_s24, %s6495_s25  }
  0x45   :  { %s6439_s30 = scalar_lea.hbm %s7792_s5, 8192 }
  0x46   :  { %p6440_p4 = scmp.ne.s32.totalorder %s7792_s5, %s6439_s30  ;;  %p6443_p5 = scmp.lt.u32.totalorder %s6439_s30, %s7792_s5 }
  0x48   :  { %p6445_p6 = pnand %p6443_p5, %p6440_p4 }
  0x4a   :  { %6448 = shalt.err (!%p6445_p6)
}
  0x4b   :  { %s6449_s12 = scalar_lea.vmem %s68_s18, 8192  ;;  %p6454_p8 = scmp.lt.s32.totalorder %s68_s18, %s68_s18 }
  0x4c   :  { %p6450_p7 = scmp.ne.s32.totalorder %s68_s18, %s6449_s12  ;;  %p6455_p9 = scmp.lt.s32.totalorder %s6449_s12, %s6449_s12 }
  0x4e   :  { %p6456_p10 = por %p6455_p9, %p6454_p8 }
  0x50   :  { %p6457_p11 = pnand %p6456_p10, %p6450_p7 }
  0x52   :  { %6460 = shalt.err (!%p6457_p11)
}
  0x53   :  { %73 = dma.hbm_to_vmem [thread:$0]  %s7792_s5, 8192, %s68_s18, [#allocation10], %s6494_s24, %s6494_s24, %s6495_s25  }
  0x54   :  { %6483 = dma.done.wait [#allocation4], 128  }
  0x55   :  { %6484 = vsyncadd [#allocation4], 4294967168 }
  0x56   :  { %6485 = dma.done.wait [#allocation7], 8704  }
  0x57   :  { %6486 = vsyncadd [#allocation7], 4294958592 }
  0x58   :  { %6487 = dma.done.wait [#allocation10], 16384  }
  0x59   :  { %6488 = vsyncadd [#allocation10], 4294950912  ;;  %v7795_v0 = vmov 0.0   ;;  %v93_v1 = vld [vmem:[#allocation6 + $0x8] sm:$0xff]  ;;  %v95_v2 = vld [vmem:[#allocation6 + $0x18] sm:$0xff]  ;;  %vm118_vm0 = vcmask 64512  }
  0x5a   :  { %186 = vmatprep.mubr.f32.mxu0 %v7795_v0  ;;  %257 = vmatprep.mubr.f32.mxu1 %v7795_v0  ;;  %v92_v3 = vld [vmem:[#allocation6] sm:$0xff]  ;;  %v94_v4 = vld [vmem:[#allocation6 + $0x10] sm:$0xff]  ;;  %v91_v5 = vld [vmem:[#allocation3] sm:$0xff] }
  0x5b   :  { %122 = vmatprep.subr.mxu0 %v93_v1  ;;  %193 = vmatprep.subr.mxu1 %v95_v2  ;;  %v270_v6 = vld [vmem:[#allocation8 + $0x8] sm:$0xff]  ;;  %v272_v8 = vld [vmem:[#allocation8 + $0x18] sm:$0xff]  ;;  %v269_v12 = vld [vmem:[#allocation8] sm:$0xff] }
  0x5c   :  { %123 = vmatpush1.msra.mxu0 %v92_v3  ;;  %194 = vmatpush1.msra.mxu1 %v94_v4  ;;  %v274_v7 = vld [vmem:[#allocation8 + $0x28] sm:$0xff]  ;;  %v276_v9 = vld [vmem:[#allocation8 + $0x38] sm:$0xff]  ;;  %v273_v13 = vld [vmem:[#allocation8 + $0x20] sm:$0xff] }
  0x5d   :  { %4547 = vmatmul.mubr.msk.f32.vlgmr.msra.gmra.mrb[0].mxu0 %vm118_vm0, %v91_v5  ;;  %4548 = vmatmul.mubr.msk.f32.vlgmr.msra.gmra.mrb[0].mxu1 %vm118_vm0, %v91_v5  ;;  %v6612_v10 = vpack.c.bf16 %v274_v7, %v270_v6  ;;  %v6614_v11 = vpack.c.bf16 %v276_v9, %v272_v8  ;;  %v271_v14 = vld [vmem:[#allocation8 + $0x10] sm:$0xff]  ;;  %v6616_v15 = vpack.c.bf16 %v273_v13, %v269_v12  ;;  %v278_v17 = vld [vmem:[#allocation8 + $0x48] sm:$0xff]  ;;  %v280_v21 = vld [vmem:[#allocation8 + $0x58] sm:$0xff] }
  0x5e   :  { %v275_v16 = vld [vmem:[#allocation8 + $0x30] sm:$0xff]  ;;  %v282_v18 = vld [vmem:[#allocation8 + $0x68] sm:$0xff]  ;;  %397 = vmatprep.mubr.f32.mxu0 %v7795_v0  ;;  %468 = vmatprep.mubr.f32.mxu1 %v7795_v0  ;;  %v284_v22 = vld [vmem:[#allocation8 + $0x78] sm:$0xff] }
  0x5f   :  { %7981 = vst [vmem:[#allocation17_spill] sm:$0xff] %v6612_v10  ;;  %7982 = vst [vmem:[#allocation18_spill] sm:$0xff] %v6614_v11  ;;  %4582 = vmatprep.subr.bf16.mxu0 %v6612_v10  ;;  %4614 = vmatprep.subr.bf16.mxu1 %v6614_v11  ;;  %v6622_v19 = vpack.c.bf16 %v275_v16, %v271_v14  ;;  %v6624_v20 = vpack.c.bf16 %v282_v18, %v278_v17  ;;  %v277_v23 = vld [vmem:[#allocation8 + $0x40] sm:$0xff]  ;;  %v279_v26 = vld [vmem:[#allocation8 + $0x50] sm:$0xff] }
  0x60   :  { %4584 = vmatpush1.bf16.msra.mxu0 %v6616_v15  ;;  %v6627_v24 = vpack.c.bf16 %v284_v22, %v280_v21  ;;  %v281_v25 = vld [vmem:[#allocation8 + $0x60] sm:$0xff]  ;;  %v283_v27 = vld [vmem:[#allocation8 + $0x70] sm:$0xff]  ;;  %v286_v30 = vld [vmem:[#allocation8 + $0x88] sm:$0xff] }
  0x61   :  { %4616 = vmatpush1.bf16.msra.mxu1 %v6622_v19  ;;  %4586 = vmatprep.subr.bf16.mxu0 %v6624_v20  ;;  %v6631_v28 = vpack.c.bf16 %v281_v25, %v277_v23  ;;  %v6633_v29 = vpack.c.bf16 %v283_v27, %v279_v26  ;;  %v290_v31 = vld [vmem:[#allocation8 + $0xa8] sm:$0xff]  ;;  %v288_v32 = vld [vmem:[#allocation8 + $0x98] sm:$0xff]  ;;  %v285_v35 = vld [vmem:[#allocation8 + $0x80] sm:$0xff] }
  0x62   :  { %4618 = vmatprep.subr.bf16.mxu1 %v6627_v24  ;;  %v6636_v33 = vpack.c.bf16 %v290_v31, %v286_v30  ;;  %v292_v34 = vld [vmem:[#allocation8 + $0xb8] sm:$0xff]  ;;  %v289_v36 = vld [vmem:[#allocation8 + $0xa0] sm:$0xff]  ;;  %v287_v38 = vld [vmem:[#allocation8 + $0x90] sm:$0xff] }
  0x63   :  { %v6638_v37 = vpack.c.bf16 %v292_v34, %v288_v32  ;;  %v291_v39 = vld [vmem:[#allocation8 + $0xb0] sm:$0xff]  ;;  %v294_v40 = vld [vmem:[#allocation8 + $0xc8] sm:$0xff]  ;;  %v6641_v41 = vpack.c.bf16 %v289_v36, %v285_v35  ;;  %v296_v43 = vld [vmem:[#allocation8 + $0xd8] sm:$0xff] }
  0x64   :  { %4588 = vmatpush1.bf16.msra.mxu0 %v6631_v28  ;;  %v298_v42 = vld [vmem:[#allocation8 + $0xe8] sm:$0xff]  ;;  %v300_v44 = vld [vmem:[#allocation8 + $0xf8] sm:$0xff]  ;;  %v6645_v45 = vpack.c.bf16 %v291_v39, %v287_v38  ;;  %v293_v47 = vld [vmem:[#allocation8 + $0xc0] sm:$0xff] }
  0x65   :  { %4620 = vmatpush1.bf16.msra.mxu1 %v6633_v29  ;;  %4590 = vmatprep.subr.bf16.mxu0 %v6636_v33  ;;  %v6647_v46 = vpack.c.bf16 %v298_v42, %v294_v40  ;;  %v297_v48 = vld [vmem:[#allocation8 + $0xe0] sm:$0xff]  ;;  %v295_v49 = vld [vmem:[#allocation8 + $0xd0] sm:$0xff]  ;;  %v6650_v50 = vpack.c.bf16 %v300_v44, %v296_v43  ;;  %v302_v52 = vld [vmem:[#allocation8 + $0x108] sm:$0xff] }
  0x66   :  { %7983 = vst [vmem:[#allocation19_spill] sm:$0xff] %v6645_v45  ;;  %4622 = vmatprep.subr.bf16.mxu1 %v6638_v37  ;;  %v299_v51 = vld [vmem:[#allocation8 + $0xf0] sm:$0xff]  ;;  %v306_v53 = vld [vmem:[#allocation8 + $0x128] sm:$0xff]  ;;  %v304_v54 = vld [vmem:[#allocation8 + $0x118] sm:$0xff]  ;;  %v6653_v56 = vpack.c.bf16 %v297_v48, %v293_v47 }
  0x67   :  { %7984 = vst [vmem:[#allocation20_spill] sm:$0xff] %v6647_v46  ;;  %7985 = vst [vmem:[#allocation21_spill] sm:$0xff] %v6650_v50  ;;  %v308_v55 = vld [vmem:[#allocation8 + $0x138] sm:$0xff]  ;;  %v6657_v57 = vpack.c.bf16 %v299_v51, %v295_v49  ;;  %v6659_v58 = vpack.c.bf16 %v306_v53, %v302_v52  ;;  %v301_v59 = vld [vmem:[#allocation8 + $0x100] sm:$0xff] }
  0x68   :  { %4592 = vmatpush1.bf16.msra.mxu0 %v6641_v41  ;;  %7986 = vst [vmem:[#allocation22_spill] sm:$0xff] %v6653_v56  ;;  %v305_v60 = vld [vmem:[#allocation8 + $0x120] sm:$0xff]  ;;  %v303_v61 = vld [vmem:[#allocation8 + $0x110] sm:$0xff]  ;;  %v6662_v62 = vpack.c.bf16 %v308_v55, %v304_v54  ;;  %v310_v1 = vld [vmem:[#allocation8 + $0x148] sm:$0xff] }
  0x69   :  { %4624 = vmatpush1.bf16.msra.mxu1 %v6645_v45  ;;  %4594 = vmatprep.subr.bf16.mxu0 %v6647_v46  ;;  %7987 = vst [vmem:[#allocation23_spill] sm:$0xff] %v6657_v57  ;;  %7988 = vst [vmem:[#allocation24_spill] sm:$0xff] %v6659_v58  ;;  %v307_v63 = vld [vmem:[#allocation8 + $0x130] sm:$0xff]  ;;  %v314_v2 = vld [vmem:[#allocation8 + $0x168] sm:$0xff]  ;;  %v6665_v5 = vpack.c.bf16 %v305_v60, %v301_v59 }
  0x6a   :  { %4626 = vmatprep.subr.bf16.mxu1 %v6650_v50  ;;  %7989 = vst [vmem:[#allocation25_spill] sm:$0xff] %v6662_v62  ;;  %v312_v3 = vld [vmem:[#allocation8 + $0x158] sm:$0xff]  ;;  %v6669_v6 = vpack.c.bf16 %v307_v63, %v303_v61  ;;  %v6671_v7 = vpack.c.bf16 %v314_v2, %v310_v1  ;;  %v309_v8 = vld [vmem:[#allocation8 + $0x140] sm:$0xff]  ;;  %v311_v12 = vld [vmem:[#allocation8 + $0x150] sm:$0xff] }
  0x6b   :  { %v316_v4 = vld [vmem:[#allocation8 + $0x178] sm:$0xff]  ;;  %7990 = vst [vmem:[#allocation26_spill] sm:$0xff] %v6665_v5  ;;  %v313_v9 = vld [vmem:[#allocation8 + $0x160] sm:$0xff]  ;;  %v315_v14 = vld [vmem:[#allocation8 + $0x170] sm:$0xff] }
  0x6c   :  { %4596 = vmatpush1.bf16.msra.mxu0 %v6653_v56  ;;  %7991 = vst [vmem:[#allocation27_spill] sm:$0xff] %v6669_v6  ;;  %7992 = vst [vmem:[#allocation28_spill] sm:$0xff] %v6671_v7  ;;  %v6674_v13 = vpack.c.bf16 %v316_v4, %v312_v3  ;;  %v318_v16 = vld [vmem:[#allocation8 + $0x188] sm:$0xff]  ;;  %v320_v18 = vld [vmem:[#allocation8 + $0x198] sm:$0xff]  ;;  %v6677_v22 = vpack.c.bf16 %v313_v9, %v309_v8  ;;  %v6681_v23 = vpack.c.bf16 %v315_v14, %v311_v12 }
  0x6d   :  { %4628 = vmatpush1.bf16.msra.mxu1 %v6657_v57  ;;  %4598 = vmatprep.subr.bf16.mxu0 %v6659_v58  ;;  %v322_v17 = vld [vmem:[#allocation8 + $0x1a8] sm:$0xff]  ;;  %v324_v21 = vld [vmem:[#allocation8 + $0x1b8] sm:$0xff]  ;;  %v317_v26 = vld [vmem:[#allocation8 + $0x180] sm:$0xff] }
  0x6e   :  { %4630 = vmatprep.subr.bf16.mxu1 %v6662_v62  ;;  %7993 = vst [vmem:[#allocation29_spill] sm:$0xff] %v6674_v13  ;;  %7994 = vst [vmem:[#allocation30_spill] sm:$0xff] %v6677_v22  ;;  %v6683_v25 = vpack.c.bf16 %v322_v17, %v318_v16  ;;  %v321_v27 = vld [vmem:[#allocation8 + $0x1a0] sm:$0xff]  ;;  %v319_v30 = vld [vmem:[#allocation8 + $0x190] sm:$0xff]  ;;  %v6686_v31 = vpack.c.bf16 %v324_v21, %v320_v18 }
  0x6f   :  { %7995 = vst [vmem:[#allocation31_spill] sm:$0xff] %v6681_v23  ;;  %v323_v32 = vld [vmem:[#allocation8 + $0x1b0] sm:$0xff]  ;;  %v326_v34 = vld [vmem:[#allocation8 + $0x1c8] sm:$0xff]  ;;  %v328_v36 = vld [vmem:[#allocation8 + $0x1d8] sm:$0xff]  ;;  %v6689_v39 = vpack.c.bf16 %v321_v27, %v317_v26 }
  0x70   :  { %4600 = vmatpush1.bf16.msra.mxu0 %v6665_v5  ;;  %7996 = vst [vmem:[#allocation32_spill] sm:$0xff] %v6683_v25  ;;  %7997 = vst [vmem:[#allocation33_spill] sm:$0xff] %v6686_v31  ;;  %v330_v35 = vld [vmem:[#allocation8 + $0x1e8] sm:$0xff]  ;;  %v332_v38 = vld [vmem:[#allocation8 + $0x1f8] sm:$0xff]  ;;  %v6693_v40 = vpack.c.bf16 %v323_v32, %v319_v30 }
  0x71   :  { %4632 = vmatpush1.bf16.msra.mxu1 %v6669_v6  ;;  %4602 = vmatprep.subr.bf16.mxu0 %v6671_v7  ;;  %7998 = vst [vmem:[#allocation34_spill] sm:$0xff] %v6689_v39  ;;  %v6695_v42 = vpack.c.bf16 %v330_v35, %v326_v34  ;;  %v325_v43 = vld [vmem:[#allocation8 + $0x1c0] sm:$0xff]  ;;  %v6698_v47 = vpack.c.bf16 %v332_v38, %v328_v36  ;;  %v327_v48 = vld [vmem:[#allocation8 + $0x1d0] sm:$0xff]  ;;  %v590_v53 = vld [vmem:[#allocation11 + $0x8] sm:$0xff] }
  0x72   :  { %4634 = vmatprep.subr.bf16.mxu1 %v6674_v13  ;;  %7999 = vst [vmem:[#allocation35_spill] sm:$0xff] %v6693_v40  ;;  %v329_v44 = vld [vmem:[#allocation8 + $0x1e0] sm:$0xff]  ;;  %v331_v49 = vld [vmem:[#allocation8 + $0x1f0] sm:$0xff]  ;;  %v594_v54 = vld [vmem:[#allocation11 + $0x28] sm:$0xff] }
  0x73   :  { %8000 = vst [vmem:[#allocation36_spill] sm:$0xff] %v6695_v42  ;;  %8001 = vst [vmem:[#allocation37_spill] sm:$0xff] %v6698_v47  ;;  %v6701_v51 = vpack.c.bf16 %v329_v44, %v325_v43  ;;  %v6705_v52 = vpack.c.bf16 %v331_v49, %v327_v48  ;;  %v592_v55 = vld [vmem:[#allocation11 + $0x18] sm:$0xff]  ;;  %v6714_v59 = vpack.c.bf16 %v594_v54, %v590_v53  ;;  %v589_v61 = vld [vmem:[#allocation11] sm:$0xff] }
  0x74   :  { %4604 = vmatpush1.bf16.msra.mxu0 %v6677_v22  ;;  %v596_v60 = vld [vmem:[#allocation11 + $0x38] sm:$0xff]  ;;  %v593_v63 = vld [vmem:[#allocation11 + $0x20] sm:$0xff]  ;;  %v591_v3 = vld [vmem:[#allocation11 + $0x10] sm:$0xff] }
  0x75   :  { %4636 = vmatpush1.bf16.msra.mxu1 %v6681_v23  ;;  %4606 = vmatprep.subr.bf16.mxu0 %v6683_v25  ;;  %8002 = vst [vmem:[#allocation38_spill] sm:$0xff] %v6701_v51  ;;  %8003 = vst [vmem:[#allocation39_spill] sm:$0xff] %v6705_v52  ;;  %v6716_v1 = vpack.c.bf16 %v596_v60, %v592_v55  ;;  %v6718_v2 = vpack.c.bf16 %v593_v63, %v589_v61  ;;  %v595_v4 = vld [vmem:[#allocation11 + $0x30] sm:$0xff]  ;;  %v598_v8 = vld [vmem:[#allocation11 + $0x48] sm:$0xff] }
  0x76   :  { %4638 = vmatprep.subr.bf16.mxu1 %v6686_v31  ;;  %8004 = vst [vmem:[#allocation40_spill] sm:$0xff] %v6714_v59  ;;  %v6721_v9 = vpack.c.bf16 %v595_v4, %v591_v3  ;;  %v602_v12 = vld [vmem:[#allocation11 + $0x68] sm:$0xff]  ;;  %v600_v14 = vld [vmem:[#allocation11 + $0x58] sm:$0xff]  ;;  %v597_v21 = vld [vmem:[#allocation11 + $0x40] sm:$0xff] }
  0x77   :  { %8005 = vst [vmem:[#allocation41_spill] sm:$0xff] %v6716_v1  ;;  %8006 = vst [vmem:[#allocation42_spill] sm:$0xff] %v6718_v2  ;;  %v604_v16 = vld [vmem:[#allocation11 + $0x78] sm:$0xff]  ;;  %v6725_v17 = vpack.c.bf16 %v602_v12, %v598_v8  ;;  %v601_v26 = vld [vmem:[#allocation11 + $0x60] sm:$0xff] }
  0x78   :  { %4608 = vmatpush1.bf16.msra.mxu0 %v6689_v39  ;;  %8007 = vst [vmem:[#allocation43_spill] sm:$0xff] %v6721_v9  ;;  %v6727_v18 = vpack.c.bf16 %v604_v16, %v600_v14  ;;  %v599_v27 = vld [vmem:[#allocation11 + $0x50] sm:$0xff]  ;;  %v6730_v30 = vpack.c.bf16 %v601_v26, %v597_v21  ;;  %v606_v35 = vld [vmem:[#allocation11 + $0x88] sm:$0xff]  ;;  %v608_v38 = vld [vmem:[#allocation11 + $0x98] sm:$0xff] }
  0x79   :  { %4640 = vmatpush1.bf16.msra.mxu1 %v6693_v40  ;;  %4610 = vmatprep.subr.bf16.mxu0 %v6695_v42  ;;  %8008 = vst [vmem:[#allocation44_spill] sm:$0xff] %v6725_v17  ;;  %v603_v32 = vld [vmem:[#allocation11 + $0x70] sm:$0xff]  ;;  %v610_v36 = vld [vmem:[#allocation11 + $0xa8] sm:$0xff]  ;;  %v612_v44 = vld [vmem:[#allocation11 + $0xb8] sm:$0xff] }
  0x7a   :  { %4642 = vmatprep.subr.bf16.mxu1 %v6698_v47  ;;  %8009 = vst [vmem:[#allocation45_spill] sm:$0xff] %v6727_v18  ;;  %8010 = vst [vmem:[#allocation46_spill] sm:$0xff] %v6730_v30  ;;  %v6734_v34 = vpack.c.bf16 %v603_v32, %v599_v27  ;;  %v6738_v43 = vpack.c.bf16 %v610_v36, %v606_v35  ;;  %v6740_v48 = vpack.c.bf16 %v612_v44, %v608_v38  ;;  %v605_v49 = vld [vmem:[#allocation11 + $0x80] sm:$0xff]  ;;  %v607_v54 = vld [vmem:[#allocation11 + $0x90] sm:$0xff] }
  0x7b   :  { %v609_v53 = vld [vmem:[#allocation11 + $0xa0] sm:$0xff]  ;;  %v611_v60 = vld [vmem:[#allocation11 + $0xb0] sm:$0xff]  ;;  %v614_v63 = vld [vmem:[#allocation11 + $0xc8] sm:$0xff] }
  0x7c   :  { %4612 = vmatpush1.bf16.msra.mxu0 %v6701_v51  ;;  %8011 = vst [vmem:[#allocation47_spill] sm:$0xff] %v6734_v34  ;;  %8012 = vst [vmem:[#allocation48_spill] sm:$0xff] %v6738_v43  ;;  %v6743_v55 = vpack.c.bf16 %v609_v53, %v605_v49  ;;  %v6746_v61 = vpack.c.bf16 %v611_v60, %v607_v54  ;;  %v618_v3 = vld [vmem:[#allocation11 + $0xe8] sm:$0xff]  ;;  %v616_v4 = vld [vmem:[#allocation11 + $0xd8] sm:$0xff] }
  0x7d   :  { %4644 = vmatpush1.bf16.msra.mxu1 %v6705_v52  ;;  %4646 = vmatprep.subr.bf16.mxu0 %v6714_v59  ;;  %8013 = vst [vmem:[#allocation49_spill] sm:$0xff] %v6740_v48  ;;  %v6750_v8 = vpack.c.bf16 %v618_v3, %v614_v63  ;;  %v620_v12 = vld [vmem:[#allocation11 + $0xf8] sm:$0xff]  ;;  %v613_v14 = vld [vmem:[#allocation11 + $0xc0] sm:$0xff]  ;;  %v615_v27 = vld [vmem:[#allocation11 + $0xd0] sm:$0xff] }
  0x7e   :  { %4678 = vmatprep.subr.bf16.mxu1 %v6716_v1  ;;  %8014 = vst [vmem:[#allocation50_spill] sm:$0xff] %v6743_v55  ;;  %8015 = vst [vmem:[#allocation51_spill] sm:$0xff] %v6746_v61  ;;  %v617_v16 = vld [vmem:[#allocation11 + $0xe0] sm:$0xff]  ;;  %v6752_v21 = vpack.c.bf16 %v620_v12, %v616_v4  ;;  %v619_v32 = vld [vmem:[#allocation11 + $0xf0] sm:$0xff] }
  0x7f   :  { %398 = vmatmul.mubr.f32.vlgmr.msra.gmra.mrb[2].mxu0 %v7795_v0  ;;  %8016 = vst [vmem:[#allocation52_spill] sm:$0xff] %v6750_v8  ;;  %v6754_v26 = vpack.c.bf16 %v617_v16, %v613_v14  ;;  %v6757_v35 = vpack.c.bf16 %v619_v32, %v615_v27  ;;  %v622_v36 = vld [vmem:[#allocation11 + $0x108] sm:$0xff]  ;;  %v624_v44 = vld [vmem:[#allocation11 + $0x118] sm:$0xff]  ;;  %v621_v54 = vld [vmem:[#allocation11 + $0x100] sm:$0xff] }
  0x80   :  { %469 = vmatmul.mubr.f32.vlgmr.msra.gmra.mrb[2].mxu1 %v7795_v0  ;;  %717 = vmatprep.mubr.f32.mxu0 %v7795_v0  ;;  %8017 = vst [vmem:[#allocation53_spill] sm:$0xff] %v6752_v21  ;;  %v626_v38 = vld [vmem:[#allocation11 + $0x128] sm:$0xff]  ;;  %v628_v53 = vld [vmem:[#allocation11 + $0x138] sm:$0xff]  ;;  %v625_v60 = vld [vmem:[#allocation11 + $0x120] sm:$0xff] }
  0x81   :  { %788 = vmatprep.mubr.f32.mxu1 %v7795_v0  ;;  %4648 = vmatpush1.bf16.msra.mxu0 %v6718_v2  ;;  %8018 = vst [vmem:[#allocation54_spill] sm:$0xff] %v6754_v26  ;;  %8019 = vst [vmem:[#allocation55_spill] sm:$0xff] %v6757_v35  ;;  %v6762_v49 = vpack.c.bf16 %v626_v38, %v622_v36  ;;  %v6764_v63 = vpack.c.bf16 %v628_v53, %v624_v44  ;;  %v623_v4 = vld [vmem:[#allocation11 + $0x110] sm:$0xff]  ;;  %v630_v16 = vld [vmem:[#allocation11 + $0x148] sm:$0xff] }
  0x82   :  { %4680 = vmatpush1.bf16.msra.mxu1 %v6721_v9  ;;  %4650 = vmatprep.subr.bf16.mxu0 %v6725_v17  ;;  %v6766_v3 = vpack.c.bf16 %v625_v60, %v621_v54  ;;  %v627_v12 = vld [vmem:[#allocation11 + $0x130] sm:$0xff]  ;;  %v634_v27 = vld [vmem:[#allocation11 + $0x168] sm:$0xff]  ;;  %v632_v32 = vld [vmem:[#allocation11 + $0x158] sm:$0xff] }
  0x83   :  { %4682 = vmatprep.subr.bf16.mxu1 %v6727_v18  ;;  %8020 = vst [vmem:[#allocation56_spill] sm:$0xff] %v6762_v49  ;;  %8021 = vst [vmem:[#allocation57_spill] sm:$0xff] %v6764_v63  ;;  %v6769_v14 = vpack.c.bf16 %v627_v12, %v623_v4  ;;  %v6774_v36 = vpack.c.bf16 %v634_v27, %v630_v16  ;;  %v636_v38 = vld [vmem:[#allocation11 + $0x178] sm:$0xff]  ;;  %v629_v44 = vld [vmem:[#allocation11 + $0x140] sm:$0xff] }
  0x84   :  { %8022 = vst [vmem:[#allocation58_spill] sm:$0xff] %v6766_v3  ;;  %v633_v53 = vld [vmem:[#allocation11 + $0x160] sm:$0xff]  ;;  %v6776_v54 = vpack.c.bf16 %v636_v38, %v632_v32  ;;  %v631_v4 = vld [vmem:[#allocation11 + $0x150] sm:$0xff]  ;;  %v642_v16 = vld [vmem:[#allocation11 + $0x1a8] sm:$0xff] }
  0x85   :  { %4652 = vmatpush1.bf16.msra.mxu0 %v6730_v30  ;;  %8023 = vst [vmem:[#allocation59_spill] sm:$0xff] %v6769_v14  ;;  %8024 = vst [vmem:[#allocation60_spill] sm:$0xff] %v6774_v36  ;;  %v6778_v60 = vpack.c.bf16 %v633_v53, %v629_v44  ;;  %v635_v12 = vld [vmem:[#allocation11 + $0x170] sm:$0xff]  ;;  %v640_v27 = vld [vmem:[#allocation11 + $0x198] sm:$0xff] }
  0x86   :  { %4684 = vmatpush1.bf16.msra.mxu1 %v6734_v34  ;;  %4654 = vmatprep.subr.bf16.mxu0 %v6738_v43  ;;  %8025 = vst [vmem:[#allocation61_spill] sm:$0xff] %v6776_v54  ;;  %v6781_v0 = vpack.c.bf16 %v635_v12, %v631_v4  ;;  %v644_v32 = vld [vmem:[#allocation11 + $0x1b8] sm:$0xff]  ;;  %v637_v38 = vld [vmem:[#allocation11 + $0x180] sm:$0xff]  ;;  %v639_v4 = vld [vmem:[#allocation11 + $0x190] sm:$0xff] }
  0x87   :  { %4686 = vmatprep.subr.bf16.mxu1 %v6740_v48  ;;  %8026 = vst [vmem:[#allocation62_spill] sm:$0xff] %v6778_v60  ;;  %v641_v44 = vld [vmem:[#allocation11 + $0x1a0] sm:$0xff]  ;;  %v6788_v53 = vpack.c.bf16 %v644_v32, %v640_v27  ;;  %v643_v12 = vld [vmem:[#allocation11 + $0x1b0] sm:$0xff]  ;;  %v652_v27 = vld [vmem:[#allocation11 + $0x1f8] sm:$0xff] }
  0x88   :  { %8027 = vst [vmem:[#allocation63_spill] sm:$0xff] %v6781_v0  ;;  %v645_v32 = vld [vmem:[#allocation11 + $0x1c0] sm:$0xff] }
  0x89   :  { %4656 = vmatpush1.bf16.msra.mxu0 %v6743_v55  ;;  %8029 = vst [vmem:[#allocation65_spill] sm:$0xff] %v6788_v53 }
  0x8a   :  { %4688 = vmatpush1.bf16.msra.mxu1 %v6746_v61  ;;  %4658 = vmatprep.subr.bf16.mxu0 %v6750_v8  ;;  %v584_v8 = vld [vmem:[#allocation9 + $0x1d8] sm:$0xff]  ;;  %v587_v61 = vld [vmem:[#allocation9 + $0x1f0] sm:$0xff] }
  0x8b   :  { %4690 = vmatprep.subr.bf16.mxu1 %v6752_v21  ;;  %v586_v21 = vld [vmem:[#allocation9 + $0x1e8] sm:$0xff] }
  0x8d   :  { %4660 = vmatpush1.bf16.msra.mxu0 %v6754_v26  ;;  %v572_v26 = vld [vmem:[#allocation9 + $0x178] sm:$0xff] }
  0x8e   :  { %4692 = vmatpush1.bf16.msra.mxu1 %v6757_v35  ;;  %4662 = vmatprep.subr.bf16.mxu0 %v6762_v49  ;;  %v570_v35 = vld [vmem:[#allocation9 + $0x168] sm:$0xff] }
  0x8f   :  { %4694 = vmatprep.subr.bf16.mxu1 %v6764_v63  ;;  %v6790_v63 = vpack.c.bf16 %v641_v44, %v637_v38  ;;  %v649_v38 = vld [vmem:[#allocation11 + $0x1e0] sm:$0xff] }
  0x91   :  { %4664 = vmatpush1.bf16.msra.mxu0 %v6766_v3  ;;  %8030 = vst [vmem:[#allocation66_spill] sm:$0xff] %v6790_v63 }
  0x92   :  { %4696 = vmatpush1.bf16.msra.mxu1 %v6769_v14  ;;  %4666 = vmatprep.subr.bf16.mxu0 %v6774_v36  ;;  %v638_v14 = vld [vmem:[#allocation11 + $0x188] sm:$0xff]  ;;  %v6802_v36 = vpack.c.bf16 %v649_v38, %v645_v32  ;;  %v529_v32 = vld [vmem:[#allocation9 + $0x20] sm:$0xff] }
  0x93   :  { %4698 = vmatprep.subr.bf16.mxu1 %v6776_v54  ;;  %v6786_v3 = vpack.c.bf16 %v642_v16, %v638_v14  ;;  %v6793_v54 = vpack.c.bf16 %v643_v12, %v639_v4  ;;  %v650_v14 = vld [vmem:[#allocation11 + $0x1e8] sm:$0xff]  ;;  %v648_v16 = vld [vmem:[#allocation11 + $0x1d8] sm:$0xff]  ;;  %v647_v4 = vld [vmem:[#allocation11 + $0x1d0] sm:$0xff] }
  0x94   :  { %v6800_v44 = vpack.c.bf16 %v652_v27, %v648_v16  ;;  %8034 = vst [vmem:[#allocation70_spill] sm:$0xff] %v6802_v36  ;;  %v651_v12 = vld [vmem:[#allocation11 + $0x1f0] sm:$0xff]  ;;  %v532_v16 = vld [vmem:[#allocation9 + $0x38] sm:$0xff]  ;;  %v525_v27 = vld [vmem:[#allocation9] sm:$0xff] }
  0x95   :  { %4668 = vmatpush1.bf16.msra.mxu0 %v6778_v60  ;;  %8028 = vst [vmem:[#allocation64_spill] sm:$0xff] %v6786_v3  ;;  %8031 = vst [vmem:[#allocation67_spill] sm:$0xff] %v6793_v54 }
  0x96   :  { %4700 = vmatpush1.bf16.msra.mxu1 %v6781_v0  ;;  %4670 = vmatprep.subr.bf16.mxu0 %v6786_v3  ;;  %v646_v0 = vld [vmem:[#allocation11 + $0x1c8] sm:$0xff]  ;;  %8033 = vst [vmem:[#allocation69_spill] sm:$0xff] %v6800_v44  ;;  %v6814_v3 = vpack.c.bf16 %v529_v32, %v525_v27  ;;  %v533_v27 = vld [vmem:[#allocation9 + $0x40] sm:$0xff] }
  0x97   :  { %4702 = vmatprep.subr.bf16.mxu1 %v6788_v53  ;;  %v6798_v60 = vpack.c.bf16 %v650_v14, %v646_v0  ;;  %v6805_v53 = vpack.c.bf16 %v651_v12, %v647_v4  ;;  %v530_v0 = vld [vmem:[#allocation9 + $0x28] sm:$0xff]  ;;  %v528_v14 = vld [vmem:[#allocation9 + $0x18] sm:$0xff]  ;;  %v527_v4 = vld [vmem:[#allocation9 + $0x10] sm:$0xff] }
  0x98   :  { %v6812_v38 = vpack.c.bf16 %v532_v16, %v528_v14  ;;  %8038 = vst [vmem:[#allocation74_spill] sm:$0xff] %v6814_v3  ;;  %v531_v12 = vld [vmem:[#allocation9 + $0x30] sm:$0xff]  ;;  %v540_v16 = vld [vmem:[#allocation9 + $0x78] sm:$0xff]  ;;  %v537_v32 = vld [vmem:[#allocation9 + $0x60] sm:$0xff] }
  0x99   :  { %4672 = vmatpush1.bf16.msra.mxu0 %v6790_v63  ;;  %8032 = vst [vmem:[#allocation68_spill] sm:$0xff] %v6798_v60  ;;  %8035 = vst [vmem:[#allocation71_spill] sm:$0xff] %v6805_v53 }
  0x9a   :  { %4704 = vmatpush1.bf16.msra.mxu1 %v6793_v54  ;;  %4674 = vmatprep.subr.bf16.mxu0 %v6798_v60  ;;  %v526_v54 = vld [vmem:[#allocation9 + $0x8] sm:$0xff]  ;;  %8037 = vst [vmem:[#allocation73_spill] sm:$0xff] %v6812_v38 }
  0x9b   :  { %4706 = vmatprep.subr.bf16.mxu1 %v6800_v44  ;;  %v6810_v63 = vpack.c.bf16 %v530_v0, %v526_v54  ;;  %v8039_v44 = vmov 0.0   ;;  %v534_v54 = vld [vmem:[#allocation9 + $0x48] sm:$0xff] }
  0x9c   :  { %v538_v0 = vld [vmem:[#allocation9 + $0x68] sm:$0xff] }
  0x9d   :  { %4676 = vmatpush1.bf16.msra.mxu0 %v6802_v36  ;;  %8036 = vst [vmem:[#allocation72_spill] sm:$0xff] %v6810_v63  ;;  %v6818_v36 = vpack.c.bf16 %v531_v12, %v527_v4  ;;  %v6824_v14 = vpack.c.bf16 %v538_v0, %v534_v54  ;;  %v6828_v4 = vpack.c.bf16 %v537_v32, %v533_v27  ;;  %v535_v12 = vld [vmem:[#allocation9 + $0x50] sm:$0xff]  ;;  %v542_v54 = vld [vmem:[#allocation9 + $0x88] sm:$0xff]  ;;  %v541_v27 = vld [vmem:[#allocation9 + $0x80] sm:$0xff] }
  0x9e   :  { %4708 = vmatpush1.bf16.msra.mxu1 %v6805_v53  ;;  %4710 = vmatprep.subr.bf16.mxu0 %v6810_v63  ;;  %v536_v53 = vld [vmem:[#allocation9 + $0x58] sm:$0xff]  ;;  %v546_v0 = vld [vmem:[#allocation9 + $0xa8] sm:$0xff]  ;;  %v545_v32 = vld [vmem:[#allocation9 + $0xa0] sm:$0xff] }
  0x9f   :  { %8040 = vst [vmem:[#allocation75_spill] sm:$0xff] %v6818_v36  ;;  %4742 = vmatprep.subr.bf16.mxu1 %v6812_v38  ;;  %8041 = vst [vmem:[#allocation76_spill] sm:$0xff] %v6824_v14  ;;  %v6826_v63 = vpack.c.bf16 %v540_v16, %v536_v53  ;;  %v539_v38 = vld [vmem:[#allocation9 + $0x70] sm:$0xff]  ;;  %v6838_v53 = vpack.c.bf16 %v546_v0, %v542_v54  ;;  %v548_v16 = vld [vmem:[#allocation9 + $0xb8] sm:$0xff]  ;;  %v6842_v49 = vpack.c.bf16 %v545_v32, %v541_v27 }
  0xa0   :  { %718 = vmatmul.mubr.f32.vlgmr.msra.gmra.mrb[4].mxu0 %v8039_v44  ;;  %8043 = vst [vmem:[#allocation78_spill] sm:$0xff] %v6828_v4  ;;  %v549_v0 = vld [vmem:[#allocation9 + $0xc0] sm:$0xff] }
  0xa1   :  { %789 = vmatmul.mubr.f32.vlgmr.msra.gmra.mrb[4].mxu1 %v8039_v44  ;;  %4712 = vmatpush1.bf16.msra.mxu0 %v6814_v3  ;;  %8042 = vst [vmem:[#allocation77_spill] sm:$0xff] %v6826_v63  ;;  %v6833_v3 = vpack.c.bf16 %v539_v38, %v535_v12  ;;  %8045 = vst [vmem:[#allocation80_spill] sm:$0xff] %v6838_v53  ;;  %v543_v38 = vld [vmem:[#allocation9 + $0x90] sm:$0xff] }
  0xa2   :  { %4744 = vmatpush1.bf16.msra.mxu1 %v6818_v36  ;;  %859 = vmatprep.mubr.f32.mxu0 %v8039_v44  ;;  %v544_v36 = vld [vmem:[#allocation9 + $0x98] sm:$0xff]  ;;  %8047 = vst [vmem:[#allocation82_spill] sm:$0xff] %v6842_v49  ;;  %v547_v12 = vld [vmem:[#allocation9 + $0xb0] sm:$0xff] }
  0xa3   :  { %930 = vmatprep.mubr.f32.mxu1 %v8039_v44  ;;  %4714 = vmatprep.subr.bf16.mxu0 %v6824_v14  ;;  %8044 = vst [vmem:[#allocation79_spill] sm:$0xff] %v6833_v3  ;;  %v6840_v60 = vpack.c.bf16 %v548_v16, %v544_v36  ;;  %v554_v14 = vld [vmem:[#allocation9 + $0xe8] sm:$0xff]  ;;  %v556_v36 = vld [vmem:[#allocation9 + $0xf8] sm:$0xff]  ;;  %v553_v16 = vld [vmem:[#allocation9 + $0xe0] sm:$0xff] }
  0xa4   :  { %4746 = vmatprep.subr.bf16.mxu1 %v6826_v63  ;;  %v6845_v63 = vpack.c.bf16 %v547_v12, %v543_v38  ;;  %v6854_v32 = vpack.c.bf16 %v553_v16, %v549_v0  ;;  %v551_v38 = vld [vmem:[#allocation9 + $0xd0] sm:$0xff] }
  0xa5   :  { %4716 = vmatpush1.bf16.msra.mxu0 %v6828_v4  ;;  %8046 = vst [vmem:[#allocation81_spill] sm:$0xff] %v6840_v60  ;;  %v550_v4 = vld [vmem:[#allocation9 + $0xc8] sm:$0xff]  ;;  %v555_v12 = vld [vmem:[#allocation9 + $0xf0] sm:$0xff] }
  0xa6   :  { %4748 = vmatpush1.bf16.msra.mxu1 %v6833_v3  ;;  %4718 = vmatprep.subr.bf16.mxu0 %v6838_v53  ;;  %8048 = vst [vmem:[#allocation83_spill] sm:$0xff] %v6845_v63  ;;  %v552_v3 = vld [vmem:[#allocation9 + $0xd8] sm:$0xff]  ;;  %v6850_v54 = vpack.c.bf16 %v554_v14, %v550_v4  ;;  %8051 = vst [vmem:[#allocation86_spill] sm:$0xff] %v6854_v32  ;;  %v562_v53 = vld [vmem:[#allocation9 + $0x128] sm:$0xff] }
  0xa7   :  { %4750 = vmatprep.subr.bf16.mxu1 %v6840_v60  ;;  %v6852_v27 = vpack.c.bf16 %v556_v36, %v552_v3  ;;  %v6857_v60 = vpack.c.bf16 %v555_v12, %v551_v38  ;;  %v564_v3 = vld [vmem:[#allocation9 + $0x138] sm:$0xff]  ;;  %v557_v4 = vld [vmem:[#allocation9 + $0x100] sm:$0xff]  ;;  %v559_v38 = vld [vmem:[#allocation9 + $0x110] sm:$0xff] }
  0xa8   :  { %8049 = vst [vmem:[#allocation84_spill] sm:$0xff] %v6850_v54  ;;  %v561_v36 = vld [vmem:[#allocation9 + $0x120] sm:$0xff]  ;;  %v563_v12 = vld [vmem:[#allocation9 + $0x130] sm:$0xff] }
  0xa9   :  { %4720 = vmatpush1.bf16.msra.mxu0 %v6842_v49  ;;  %8050 = vst [vmem:[#allocation85_spill] sm:$0xff] %v6852_v27  ;;  %8052 = vst [vmem:[#allocation87_spill] sm:$0xff] %v6857_v60  ;;  %v558_v49 = vld [vmem:[#allocation9 + $0x108] sm:$0xff]  ;;  %v6866_v16 = vpack.c.bf16 %v561_v36, %v557_v4  ;;  %v567_v4 = vld [vmem:[#allocation9 + $0x150] sm:$0xff] }
  0xaa   :  { %4752 = vmatpush1.bf16.msra.mxu1 %v6845_v63  ;;  %4722 = vmatprep.subr.bf16.mxu0 %v6850_v54  ;;  %v560_v63 = vld [vmem:[#allocation9 + $0x118] sm:$0xff]  ;;  %v6862_v14 = vpack.c.bf16 %v562_v53, %v558_v49  ;;  %v566_v54 = vld [vmem:[#allocation9 + $0x148] sm:$0xff] }
  0xab   :  { %4754 = vmatprep.subr.bf16.mxu1 %v6852_v27  ;;  %v6864_v0 = vpack.c.bf16 %v564_v3, %v560_v63  ;;  %8055 = vst [vmem:[#allocation90_spill] sm:$0xff] %v6866_v16  ;;  %v6869_v27 = vpack.c.bf16 %v563_v12, %v559_v38  ;;  %v6872_v49 = vpack.c.bf16 %v570_v35, %v566_v54  ;;  %v565_v63 = vld [vmem:[#allocation9 + $0x140] sm:$0xff]  ;;  %v571_v38 = vld [vmem:[#allocation9 + $0x170] sm:$0xff]  ;;  %v574_v12 = vld [vmem:[#allocation9 + $0x188] sm:$0xff] }
  0xac   :  { %8053 = vst [vmem:[#allocation88_spill] sm:$0xff] %v6862_v14  ;;  %v569_v3 = vld [vmem:[#allocation9 + $0x160] sm:$0xff]  ;;  %v6882_v35 = vpack.c.bf16 %v571_v38, %v567_v4  ;;  %v576_v54 = vld [vmem:[#allocation9 + $0x198] sm:$0xff] }
  0xad   :  { %4724 = vmatpush1.bf16.msra.mxu0 %v6854_v32  ;;  %8054 = vst [vmem:[#allocation89_spill] sm:$0xff] %v6864_v0  ;;  %8056 = vst [vmem:[#allocation91_spill] sm:$0xff] %v6869_v27  ;;  %v568_v32 = vld [vmem:[#allocation9 + $0x158] sm:$0xff]  ;;  %v6878_v36 = vpack.c.bf16 %v569_v3, %v565_v63  ;;  %v579_v63 = vld [vmem:[#allocation9 + $0x1b0] sm:$0xff] }
  0xae   :  { %4756 = vmatpush1.bf16.msra.mxu1 %v6857_v60  ;;  %4726 = vmatprep.subr.bf16.mxu0 %v6862_v14  ;;  %8057 = vst [vmem:[#allocation92_spill] sm:$0xff] %v6872_v49  ;;  %v6874_v53 = vpack.c.bf16 %v572_v26, %v568_v32  ;;  %v578_v14 = vld [vmem:[#allocation9 + $0x1a8] sm:$0xff]  ;;  %8060 = vst [vmem:[#allocation95_spill] sm:$0xff] %v6882_v35  ;;  %v580_v32 = vld [vmem:[#allocation9 + $0x1b8] sm:$0xff] }
  0xaf   :  { %4758 = vmatprep.subr.bf16.mxu1 %v6864_v0  ;;  %8059 = vst [vmem:[#allocation94_spill] sm:$0xff] %v6878_v36  ;;  %v6884_v26 = vpack.c.bf16 %v578_v14, %v574_v12  ;;  %v573_v0 = vld [vmem:[#allocation9 + $0x180] sm:$0xff]  ;;  %v6886_v60 = vpack.c.bf16 %v580_v32, %v576_v54  ;;  %v582_v3 = vld [vmem:[#allocation9 + $0x1c8] sm:$0xff]  ;;  %v588_v14 = vld [vmem:[#allocation9 + $0x1f8] sm:$0xff] }
  0xb0   :  { %8058 = vst [vmem:[#allocation93_spill] sm:$0xff] %v6874_v53  ;;  %v581_v38 = vld [vmem:[#allocation9 + $0x1c0] sm:$0xff]  ;;  %v6896_v12 = vpack.c.bf16 %v586_v21, %v582_v3  ;;  %v6898_v54 = vpack.c.bf16 %v588_v14, %v584_v8  ;;  %v98_v8 = vlaneseq }
  0xb1   :  { %4728 = vmatpush1.bf16.msra.mxu0 %v6866_v16  ;;  %8061 = vst [vmem:[#allocation96_spill] sm:$0xff] %v6884_v26  ;;  %8062 = vst [vmem:[#allocation97_spill] sm:$0xff] %v6886_v60  ;;  %v577_v16 = vld [vmem:[#allocation9 + $0x1a0] sm:$0xff] }
  0xb2   :  { %4760 = vmatpush1.bf16.msra.mxu1 %v6869_v27  ;;  %4730 = vmatprep.subr.bf16.mxu0 %v6872_v49  ;;  %v575_v27 = vld [vmem:[#allocation9 + $0x190] sm:$0xff]  ;;  %8065 = vst [vmem:[#allocation100_spill] sm:$0xff] %v6896_v12  ;;  %8066 = vst [vmem:[#allocation101_spill] sm:$0xff] %v6898_v54  ;;  %v585_v32 = vld [vmem:[#allocation9 + $0x1e0] sm:$0xff]  ;;  %v6912_v21 = vshrl.u32 %v98_v8, 7 }
  0xb3   :  { %4762 = vmatprep.subr.bf16.mxu1 %v6874_v53  ;;  %v6890_v53 = vpack.c.bf16 %v577_v16, %v573_v0  ;;  %v6892_v4 = vpack.c.bf16 %v579_v63, %v575_v27  ;;  %v583_v49 = vld [vmem:[#allocation9 + $0x1d0] sm:$0xff]  ;;  %v6902_v0 = vpack.c.bf16 %v585_v32, %v581_v38 }
  0xb4   :  { %v6904_v27 = vpack.c.bf16 %v587_v61, %v583_v49  ;;  %v7899_v16 = vsub.s32 0, %v6912_v21  ;;  %v7900_v61 = vsub.s32 2, %v6912_v21  ;;  %v96_v49 = vld [vmem:[%s7790_s3] sm:$0xf]  ;;  %v7903_v63 = vsub.s32 1, %v6912_v21 }
  0xb5   :  { %4732 = vmatpush1.bf16.msra.mxu0 %v6878_v36  ;;  %8063 = vst [vmem:[#allocation98_spill] sm:$0xff] %v6890_v53  ;;  %8064 = vst [vmem:[#allocation99_spill] sm:$0xff] %v6892_v4  ;;  %v7906_v3 = vsub.s32 3, %v6912_v21 }
  0xb6   :  { %4764 = vmatpush1.bf16.msra.mxu1 %v6882_v35  ;;  %4734 = vmatprep.subr.bf16.mxu0 %v6884_v26  ;;  %8067 = vst [vmem:[#allocation102_spill] sm:$0xff] %v6902_v0  ;;  %8068 = vst [vmem:[#allocation103_spill] sm:$0xff] %v6904_v27  ;;  %v101_v14 = vrot.slane %v96_v49, %v7899_v16  ;;  %v109_v38 = vrot.slane %v96_v49, %v7900_v61  ;;  %v6499_v16 = vmov 1966171168  }
  0xb7   :  { %4766 = vmatprep.subr.bf16.mxu1 %v6886_v60  ;;  %v105_v32 = vrot.slane %v96_v49, %v7903_v63  ;;  %v113_v8 = vrot.slane %v96_v49, %v7906_v3  ;;  %v482_v61 = vunpack.c.l.s4 %v6499_v16 }
  0xb9   :  { %4736 = vmatpush1.bf16.msra.mxu0 %v6890_v53  ;;  %v483_v60 = vunpack.c.0.s8 %v482_v61 }
  0xba   :  { %4768 = vmatpush1.bf16.msra.mxu1 %v6892_v4  ;;  %4738 = vmatprep.subr.bf16.mxu0 %v6896_v12 }
  0xbb   :  { %4770 = vmatprep.subr.bf16.mxu1 %v6898_v54  ;;  %v6930_v63 = vsub.s32 %v483_v60, %v6912_v21 }
  0xbd   :  { %4740 = vmatpush1.bf16.msra.mxu0 %v6902_v0 }
  0xbe   :  { %4772 = vmatpush1.bf16.msra.mxu1 %v6904_v27  ;;  %4774 = vmatprep.subr.bf16.mxu0 %v6612_v10 }
  0xbf   :  { %4806 = vmatprep.subr.bf16.mxu1 %v6614_v11 }
 0x130   :  { %v188_v11 = vpop.f32.mrb[0].mxu0  ;;  %v259_v10 = vpop.f32.mrb[0].mxu1 }
 0x131   :  { %v189_v27 = vadd.f32 %v188_v11, %v101_v14  ;;  %v260_v0 = vadd.f32 %v259_v10, %v109_v38  ;;  %v190_v54 = vpop.f32.mrb[1].mxu0  ;;  %v261_v12 = vpop.f32.mrb[1].mxu1 }
 0x132   :  { %v191_v4 = vadd.f32 %v190_v54, %v105_v32  ;;  %v262_v53 = vadd.f32 %v261_v12, %v113_v8 }
 0x133   :  { %264 = vst [vmem:[#allocation2] sm:$0xff] %v189_v27  ;;  %266 = vst [vmem:[#allocation2 + $0x10] sm:$0xff] %v260_v0 }
 0x134   :  { %265 = vst [vmem:[#allocation2 + $0x8] sm:$0xff] %v191_v4  ;;  %267 = vst [vmem:[#allocation2 + $0x18] sm:$0xff] %v262_v53 }
 0x13b   :  { %v268_v53 = vld [vmem:[#allocation2] ss:$8 sm:$0xf] }
 0x152   :  { %v399_v26 = vpop.f32.mrb[2].mxu0 }
 0x153   :  { %v470_v49 = vpop.f32.mrb[2].mxu1  ;;  %v401_v3 = vpop.f32.mrb[3].mxu0 }
 0x154   :  { %v479_v35 = vcombine.low %v399_v26, %v401_v3  ;;  %v472_v11 = vpop.f32.mrb[3].mxu1 }
 0x155   :  { %v480_v10 = vcombine.low %v470_v49, %v472_v11 }
 0x156   :  { %v487_v14 = vrot.slane %v479_v35, %v6930_v63 }
 0x157   :  { %v494_v12 = vrot.slane %v480_v10, %v6930_v63 }
 0x159   :  { %v495_v54 = vcombine.low %v487_v14, %v494_v12  ;;  %v8069_v14 = vld [vmem:[#allocation51_spill] sm:$0xff]  ;;  %v8070_v12 = vld [vmem:[#allocation52_spill] sm:$0xff] }
 0x15b   :  { %v502_v4 = vrot.slane %v495_v54, %v6930_v63  ;;  %v8071_v54 = vld [vmem:[#allocation53_spill] sm:$0xff] }
 0x15d   :  { %v504_v0 = vadd.f32 %v502_v4, %v268_v53  ;;  %v8072_v4 = vld [vmem:[#allocation54_spill] sm:$0xff]  ;;  %v8073_v53 = vld [vmem:[#allocation55_spill] sm:$0xff] }
 0x15f   :  { %v4549_v27 = vmul.f32 -1.442695, %v504_v0  ;;  %v512_v61 = vrot.slane %v504_v0, 3  ;;  %v8074_v0 = vld [vmem:[#allocation56_spill] sm:$0xff] }
 0x161   :  { %6159 = vpow2.f32 %v4549_v27  ;;  %v8075_v27 = vld [vmem:[#allocation57_spill] sm:$0xff] }
 0x16b   :  { %v6160_v16 = vpop.eup %6159 }
 0x16c   :  { %v508_v60 = vadd.f32 1.0, %v6160_v16  ;;  %v8076_v16 = vld [vmem:[#allocation58_spill] sm:$0xff] }
 0x16e   :  { %6161 = vrcp.f32 %v508_v60  ;;  %v8077_v60 = vld [vmem:[#allocation59_spill] sm:$0xff] }
 0x16f   :  { %6163 = vtanh.f32 %v512_v61  ;;  %v8078_v61 = vld [vmem:[#allocation60_spill] sm:$0xff] }
 0x178   :  { %v6162_v38 = vpop.eup %6161 }
 0x179   :  { %v516_v26 = vrot.slane %v6162_v38, 1  ;;  %v6164_v3 = vpop.eup %6163  ;;  %v522_v49 = vrot.slane %v6162_v38, 2 }
 0x17a   :  { %v519_v32 = vmul.f32 %v6164_v3, %v6162_v38  ;;  %v8079_v38 = vld [vmem:[#allocation61_spill] sm:$0xff]  ;;  %v8081_v3 = vld [vmem:[#allocation63_spill] sm:$0xff] }
 0x17b   :  { %v518_v8 = vmul.f32 0.0, %v516_v26  ;;  %v8080_v26 = vld [vmem:[#allocation62_spill] sm:$0xff] }
 0x17d   :  { %v6935_v35 = vadd.f32 %v519_v32, %v518_v8  ;;  %v8082_v32 = vld [vmem:[#allocation64_spill] sm:$0xff]  ;;  %v8083_v8 = vld [vmem:[#allocation65_spill] sm:$0xff] }
 0x17f   :  { %6165 = vtanh.f32 %v6935_v35 }
 0x189   :  { %v6166_v11 = vpop.eup %6165 }
 0x18a   :  { %v524_v10 = vmul.f32 %v6166_v11, %v522_v49  ;;  %v8084_v49 = vld [vmem:[#allocation66_spill] sm:$0xff]  ;;  %v8085_v11 = vld [vmem:[#allocation67_spill] sm:$0xff] }
 0x18c   :  { %860 = vmatmul.mubr.f32.vlgmr.msra.gmra.mrb[4].mxu0 %v524_v10  ;;  %931 = vmatmul.mubr.f32.vlgmr.msra.gmra.mrb[4].mxu1 %v524_v10 }
 0x18d   :  { %4776 = vmatpush1.bf16.msra.mxu0 %v6616_v15  ;;  %4808 = vmatpush1.bf16.msra.mxu1 %v6622_v19 }
 0x18e   :  { %4778 = vmatprep.subr.bf16.mxu0 %v6624_v20  ;;  %4810 = vmatprep.subr.bf16.mxu1 %v6627_v24 }
 0x18f   :  { %1053 = vmatprep.mubr.f32.mxu0 %v8039_v44  ;;  %1124 = vmatprep.mubr.f32.mxu1 %v8039_v44 }
 0x191   :  { %4780 = vmatpush1.bf16.msra.mxu0 %v6631_v28  ;;  %4812 = vmatpush1.bf16.msra.mxu1 %v6633_v29 }
 0x192   :  { %4782 = vmatprep.subr.bf16.mxu0 %v6636_v33  ;;  %4814 = vmatprep.subr.bf16.mxu1 %v6638_v37 }
 0x195   :  { %4784 = vmatpush1.bf16.msra.mxu0 %v6641_v41  ;;  %4816 = vmatpush1.bf16.msra.mxu1 %v6645_v45 }
 0x196   :  { %4786 = vmatprep.subr.bf16.mxu0 %v6647_v46  ;;  %4818 = vmatprep.subr.bf16.mxu1 %v6650_v50 }
 0x199   :  { %4788 = vmatpush1.bf16.msra.mxu0 %v6653_v56  ;;  %4820 = vmatpush1.bf16.msra.mxu1 %v6657_v57 }
 0x19a   :  { %4790 = vmatprep.subr.bf16.mxu0 %v6659_v58  ;;  %4822 = vmatprep.subr.bf16.mxu1 %v6662_v62 }
 0x19d   :  { %4792 = vmatpush1.bf16.msra.mxu0 %v6665_v5  ;;  %4824 = vmatpush1.bf16.msra.mxu1 %v6669_v6 }
 0x19e   :  { %4794 = vmatprep.subr.bf16.mxu0 %v6671_v7  ;;  %4826 = vmatprep.subr.bf16.mxu1 %v6674_v13 }
 0x1a1   :  { %4796 = vmatpush1.bf16.msra.mxu0 %v6677_v22  ;;  %4828 = vmatpush1.bf16.msra.mxu1 %v6681_v23 }
 0x1a2   :  { %4798 = vmatprep.subr.bf16.mxu0 %v6683_v25  ;;  %4830 = vmatprep.subr.bf16.mxu1 %v6686_v31 }
 0x1a5   :  { %4800 = vmatpush1.bf16.msra.mxu0 %v6689_v39  ;;  %4832 = vmatpush1.bf16.msra.mxu1 %v6693_v40 }
 0x1a6   :  { %4802 = vmatprep.subr.bf16.mxu0 %v6695_v42  ;;  %4834 = vmatprep.subr.bf16.mxu1 %v6698_v47 }
 0x1a9   :  { %4804 = vmatpush1.bf16.msra.mxu0 %v6701_v51  ;;  %4836 = vmatpush1.bf16.msra.mxu1 %v6705_v52 }
 0x1aa   :  { %4838 = vmatprep.subr.bf16.mxu0 %v6714_v59  ;;  %4870 = vmatprep.subr.bf16.mxu1 %v6716_v1 }
 0x1ac   :  { %1054 = vmatmul.mubr.f32.vlgmr.msra.gmra.mrb[6].mxu0 %v524_v10  ;;  %1125 = vmatmul.mubr.f32.vlgmr.msra.gmra.mrb[6].mxu1 %v524_v10  ;;  %v8086_v10 = vld [vmem:[#allocation68_spill] sm:$0xff] }
 0x1ad   :  { %4840 = vmatpush1.bf16.msra.mxu0 %v6718_v2  ;;  %4872 = vmatpush1.bf16.msra.mxu1 %v6721_v9 }
 0x1ae   :  { %4842 = vmatprep.subr.bf16.mxu0 %v6725_v17  ;;  %4874 = vmatprep.subr.bf16.mxu1 %v6727_v18 }
 0x1af   :  { %1245 = vmatprep.mubr.f32.mxu0 %v8039_v44  ;;  %1316 = vmatprep.mubr.f32.mxu1 %v8039_v44 }
 0x1b1   :  { %4844 = vmatpush1.bf16.msra.mxu0 %v6730_v30  ;;  %4876 = vmatpush1.bf16.msra.mxu1 %v6734_v34 }
 0x1b2   :  { %4846 = vmatprep.subr.bf16.mxu0 %v6738_v43  ;;  %4878 = vmatprep.subr.bf16.mxu1 %v6740_v48 }
 0x1b5   :  { %4848 = vmatpush1.bf16.msra.mxu0 %v6743_v55  ;;  %4880 = vmatpush1.bf16.msra.mxu1 %v8069_v14 }
 0x1b6   :  { %4850 = vmatprep.subr.bf16.mxu0 %v8070_v12  ;;  %4882 = vmatprep.subr.bf16.mxu1 %v8071_v54 }
 0x1b9   :  { %4852 = vmatpush1.bf16.msra.mxu0 %v8072_v4  ;;  %4884 = vmatpush1.bf16.msra.mxu1 %v8073_v53  ;;  %v8096_v53 = vsub.s32 2, %v6912_v21 }
 0x1ba   :  { %4854 = vmatprep.subr.bf16.mxu0 %v8074_v0  ;;  %4886 = vmatprep.subr.bf16.mxu1 %v8075_v27 }
 0x1bd   :  { %4856 = vmatpush1.bf16.msra.mxu0 %v8076_v16  ;;  %4888 = vmatpush1.bf16.msra.mxu1 %v8077_v60  ;;  %v8087_v16 = vld [vmem:[#allocation69_spill] sm:$0xff]  ;;  %v8088_v60 = vld [vmem:[#allocation70_spill] sm:$0xff] }
 0x1be   :  { %4858 = vmatprep.subr.bf16.mxu0 %v8078_v61  ;;  %4890 = vmatprep.subr.bf16.mxu1 %v8079_v38  ;;  %v8089_v61 = vld [vmem:[#allocation71_spill] sm:$0xff]  ;;  %v8090_v38 = vld [vmem:[#allocation72_spill] sm:$0xff] }
 0x1c1   :  { %4860 = vmatpush1.bf16.msra.mxu0 %v8080_v26  ;;  %4892 = vmatpush1.bf16.msra.mxu1 %v8081_v3  ;;  %v8091_v26 = vld [vmem:[#allocation73_spill] sm:$0xff] }
 0x1c2   :  { %4862 = vmatprep.subr.bf16.mxu0 %v8082_v32  ;;  %4894 = vmatprep.subr.bf16.mxu1 %v8083_v8  ;;  %v937_v8 = vld [vmem:[%s7793_s6] sm:$0xf]  ;;  %s6500_s6 = smov [#allocation12]  }
 0x1c3   :  { %v7021_v4 = vrot.slane %v937_v8, %v8096_v53  ;;  %s4536_s13 = sshll.u32 %s6500_s6, 4  ;;  %s4537_s13 = int_to_ptr.vmem [resolvable:$true] %s4536_s13 }
 0x1c4   :  { %s6461_s14 = scalar_lea.vmem %s4537_s13, 16  ;;  %s6465_s15 = scalar_lea.vmem %s4537_s13, 32 }
 0x1c5   :  { %4864 = vmatpush1.bf16.msra.mxu0 %v8084_v49  ;;  %4896 = vmatpush1.bf16.msra.mxu1 %v8085_v11  ;;  %v8092_v49 = vsub.s32 0, %v6912_v21  ;;  %8097 = vst [vmem:[#allocation106_spill] sm:$0xff] %v7021_v4  ;;  %p6462_p12 = scmp.ne.s32.totalorder %s4537_s13, %s6461_s14  ;;  %p6466_p13 = scmp.lt.s32.totalorder %s4537_s13, %s4537_s13 }
 0x1c6   :  { %4866 = vmatprep.subr.bf16.mxu0 %v8086_v10  ;;  %4898 = vmatprep.subr.bf16.mxu1 %v8087_v16  ;;  %v8094_v10 = vsub.s32 1, %v6912_v21  ;;  %p6467_p0 = scmp.lt.s32.totalorder %s6465_s15, %s6461_s14 }
 0x1c7   :  { %v7011_v32 = vrot.slane %v937_v8, %v8092_v49  ;;  %v8098_v49 = vsub.s32 3, %v6912_v21 }
 0x1c8   :  { %v7015_v11 = vrot.slane %v937_v8, %v8094_v10  ;;  %p6468_p1 = por %p6467_p0, %p6466_p13 }
 0x1c9   :  { %4868 = vmatpush1.bf16.msra.mxu0 %v8088_v60  ;;  %4900 = vmatpush1.bf16.msra.mxu1 %v8089_v61  ;;  %8093 = vst [vmem:[#allocation104_spill] sm:$0xff] %v7011_v32  ;;  %v7025_v10 = vrot.slane %v937_v8, %v8098_v49 }
 0x1ca   :  { %4902 = vmatprep.subr.bf16.mxu0 %v8090_v38  ;;  %4934 = vmatprep.subr.bf16.mxu1 %v8091_v26  ;;  %8095 = vst [vmem:[#allocation105_spill] sm:$0xff] %v7015_v11  ;;  %p6469_p2 = pnand %p6468_p1, %p6462_p12 }
 0x25f   :  { %v861_v16 = vpop.f32.mrb[4].mxu0  ;;  %v932_v60 = vpop.f32.mrb[4].mxu1 }
 0x260   :  { %v959_v61 = vadd.f32 %v7011_v32, %v861_v16  ;;  %v863_v3 = vpop.f32.mrb[5].mxu0  ;;  %v934_v38 = vpop.f32.mrb[5].mxu1  ;;  %v961_v54 = vadd.f32 %v7021_v4, %v932_v60 }
 0x261   :  { %v960_v26 = vadd.f32 %v7015_v11, %v863_v3  ;;  %v962_v16 = vadd.f32 %v7025_v10, %v934_v38 }
 0x262   :  { %v4550_v27 = vmul.f32 -1.442695, %v959_v61  ;;  %v4552_v32 = vmul.f32 -1.442695, %v961_v54 }
 0x263   :  { %v4551_v0 = vmul.f32 -1.442695, %v960_v26 }
 0x264   :  { %6167 = vpow2.f32 %v4550_v27 }
 0x265   :  { %6169 = vpow2.f32 %v4551_v0 }
 0x266   :  { %6171 = vtanh.f32 %v962_v16 }
 0x267   :  { %6173 = vpow2.f32 %v4552_v32 }
 0x26e   :  { %v6168_v12 = vpop.eup %6167 }
 0x26f   :  { %v972_v14 = vadd.f32 1.0, %v6168_v12  ;;  %v6170_v61 = vpop.eup %6169 }
 0x270   :  { %v973_v26 = vadd.f32 1.0, %v6170_v61  ;;  %v6172_v53 = vpop.eup %6171 }
 0x271   :  { %6175 = vrcp.f32 %v972_v14  ;;  %v6174_v27 = vpop.eup %6173 }
 0x272   :  { %6177 = vrcp.f32 %v973_v26  ;;  %v974_v8 = vadd.f32 1.0, %v6174_v27 }
 0x274   :  { %6179 = vrcp.f32 %v974_v8  ;;  %v8100_v8 = vld [vmem:[#allocation75_spill] sm:$0xff] }
 0x27b   :  { %v6176_v0 = vpop.eup %6175 }
 0x27c   :  { %v983_v3 = vmul.f32 %v6176_v0, %v6172_v53  ;;  %v6178_v21 = vpop.eup %6177  ;;  %v988_v53 = vld [vmem:[#allocation2 + $0x1] ss:$8 sm:$0xf] }
 0x27d   :  { %v982_v49 = vmul.f32 0.0, %v6178_v21 }
 0x27e   :  { %v6180_v0 = vpop.eup %6179 }
 0x27f   :  { %v1055_v11 = vpop.f32.mrb[6].mxu0  ;;  %v1126_v60 = vpop.f32.mrb[6].mxu1  ;;  %v7029_v4 = vadd.f32 %v983_v3, %v982_v49 }
 0x280   :  { %v1057_v54 = vpop.f32.mrb[7].mxu0  ;;  %v1128_v38 = vpop.f32.mrb[7].mxu1 }
 0x281   :  { %v1135_v12 = vcombine.low %v1055_v11, %v1057_v54  ;;  %v1136_v16 = vcombine.low %v1126_v60, %v1128_v38  ;;  %6181 = vtanh.f32 %v7029_v4  ;;  %v8099_v11 = vld [vmem:[#allocation74_spill] sm:$0xff]  ;;  %v8101_v60 = vld [vmem:[#allocation76_spill] sm:$0xff]  ;;  %v8102_v54 = vld [vmem:[#allocation77_spill] sm:$0xff] }
 0x282   :  { %v8103_v38 = vld [vmem:[#allocation78_spill] sm:$0xff] }
 0x283   :  { %v1143_v14 = vrot.slane %v1135_v12, %v6930_v63  ;;  %v1150_v32 = vrot.slane %v1136_v16, %v6930_v63  ;;  %v8104_v12 = vld [vmem:[#allocation79_spill] sm:$0xff]  ;;  %v8105_v16 = vld [vmem:[#allocation80_spill] sm:$0xff] }
 0x285   :  { %v1151_v61 = vcombine.low %v1143_v14, %v1150_v32  ;;  %v8106_v14 = vld [vmem:[#allocation81_spill] sm:$0xff] }
 0x287   :  { %v1158_v26 = vrot.slane %v1151_v61, %v6930_v63 }
 0x289   :  { %v1160_v27 = vadd.f32 %v1158_v26, %v988_v53  ;;  %v8107_v53 = vld [vmem:[#allocation82_spill] sm:$0xff] }
 0x28b   :  { %v4553_v21 = vmul.f32 -1.442695, %v1160_v27  ;;  %v6182_v3 = vpop.eup %6181  ;;  %v1168_v26 = vrot.slane %v1160_v27, 3  ;;  %v8116_v27 = vld [vmem:[#allocation91_spill] sm:$0xff] }
 0x28c   :  { %v986_v49 = vmul.f32 %v6182_v3, %v6180_v0  ;;  %v8108_v0 = vld [vmem:[#allocation83_spill] sm:$0xff]  ;;  %v8110_v3 = vld [vmem:[#allocation85_spill] sm:$0xff] }
 0x28d   :  { %6183 = vpow2.f32 %v4553_v21  ;;  %v8109_v21 = vld [vmem:[#allocation84_spill] sm:$0xff] }
 0x28e   :  { %1246 = vmatmul.mubr.f32.vlgmr.msra.gmra.mrb[8].mxu0 %v986_v49  ;;  %1317 = vmatmul.mubr.f32.vlgmr.msra.gmra.mrb[8].mxu1 %v986_v49  ;;  %v8111_v49 = vld [vmem:[#allocation86_spill] sm:$0xff] }
 0x28f   :  { %4904 = vmatpush1.bf16.msra.mxu0 %v8099_v11  ;;  %4936 = vmatpush1.bf16.msra.mxu1 %v8100_v8 }
 0x290   :  { %4906 = vmatprep.subr.bf16.mxu0 %v8101_v60  ;;  %4938 = vmatprep.subr.bf16.mxu1 %v8102_v54 }
 0x291   :  { %1387 = vmatprep.mubr.f32.mxu0 %v8039_v44  ;;  %1458 = vmatprep.mubr.f32.mxu1 %v8039_v44 }
 0x293   :  { %4908 = vmatpush1.bf16.msra.mxu0 %v8103_v38  ;;  %4940 = vmatpush1.bf16.msra.mxu1 %v8104_v12  ;;  %v8112_v12 = vld [vmem:[#allocation87_spill] sm:$0xff] }
 0x294   :  { %4910 = vmatprep.subr.bf16.mxu0 %v8105_v16  ;;  %4942 = vmatprep.subr.bf16.mxu1 %v8106_v14  ;;  %v8113_v16 = vld [vmem:[#allocation88_spill] sm:$0xff]  ;;  %v8114_v14 = vld [vmem:[#allocation89_spill] sm:$0xff] }
 0x297   :  { %v6184_v32 = vpop.eup %6183  ;;  %4912 = vmatpush1.bf16.msra.mxu0 %v8107_v53  ;;  %4944 = vmatpush1.bf16.msra.mxu1 %v8108_v0  ;;  %v8117_v53 = vld [vmem:[#allocation92_spill] sm:$0xff]  ;;  %v8118_v0 = vld [vmem:[#allocation93_spill] sm:$0xff] }
 0x298   :  { %v1164_v61 = vadd.f32 1.0, %v6184_v32  ;;  %4914 = vmatprep.subr.bf16.mxu0 %v8109_v21  ;;  %4946 = vmatprep.subr.bf16.mxu1 %v8110_v3  ;;  %v8115_v32 = vld [vmem:[#allocation90_spill] sm:$0xff] }
 0x299   :  { %v8122_v3 = vld [vmem:[#allocation98_spill] sm:$0xff] }
 0x29a   :  { %6185 = vrcp.f32 %v1164_v61  ;;  %v8119_v61 = vld [vmem:[#allocation95_spill] sm:$0xff] }
 0x29b   :  { %6187 = vtanh.f32 %v1168_v26  ;;  %4916 = vmatpush1.bf16.msra.mxu0 %v8111_v49  ;;  %4948 = vmatpush1.bf16.msra.mxu1 %v8112_v12  ;;  %v8120_v26 = vld [vmem:[#allocation96_spill] sm:$0xff]  ;;  %v8121_v12 = vld [vmem:[#allocation97_spill] sm:$0xff] }
 0x29c   :  { %4918 = vmatprep.subr.bf16.mxu0 %v8113_v16  ;;  %4950 = vmatprep.subr.bf16.mxu1 %v8114_v14 }
 0x29f   :  { %4920 = vmatpush1.bf16.msra.mxu0 %v8115_v32  ;;  %4952 = vmatpush1.bf16.msra.mxu1 %v8116_v27  ;;  %v8123_v27 = vld [vmem:[#allocation99_spill] sm:$0xff] }
 0x2a0   :  { %4922 = vmatprep.subr.bf16.mxu0 %v8117_v53  ;;  %4954 = vmatprep.subr.bf16.mxu1 %v8118_v0  ;;  %v8124_v53 = vld [vmem:[#allocation100_spill] sm:$0xff]  ;;  %v8125_v0 = vld [vmem:[#allocation101_spill] sm:$0xff] }
 0x2a3   :  { %4924 = vmatpush1.bf16.msra.mxu0 %v6878_v36  ;;  %4956 = vmatpush1.bf16.msra.mxu1 %v8119_v61  ;;  %v8128_v61 = vld [vmem:[#allocation17_spill] sm:$0xff] }
 0x2a4   :  { %v6186_v21 = vpop.eup %6185  ;;  %4926 = vmatprep.subr.bf16.mxu0 %v8120_v26  ;;  %4958 = vmatprep.subr.bf16.mxu1 %v8121_v12  ;;  %v8126_v26 = vld [vmem:[#allocation102_spill] sm:$0xff]  ;;  %v8127_v12 = vld [vmem:[#allocation103_spill] sm:$0xff] }
 0x2a5   :  { %v1172_v16 = vrot.slane %v6186_v21, 1  ;;  %v6188_v49 = vpop.eup %6187 }
 0x2a6   :  { %v1175_v14 = vmul.f32 %v6188_v49, %v6186_v21  ;;  %v8129_v49 = vld [vmem:[#allocation18_spill] sm:$0xff] }
 0x2a7   :  { %v1174_v32 = vmul.f32 %v1172_v16, %v6935_v35  ;;  %4928 = vmatpush1.bf16.msra.mxu0 %v8122_v3  ;;  %4960 = vmatpush1.bf16.msra.mxu1 %v8123_v27  ;;  %v1178_v35 = vrot.slane %v6186_v21, 2  ;;  %v8131_v21 = vld [vmem:[#allocation52_spill] sm:$0xff] }
 0x2a8   :  { %4930 = vmatprep.subr.bf16.mxu0 %v8124_v53  ;;  %4962 = vmatprep.subr.bf16.mxu1 %v8125_v0 }
 0x2a9   :  { %v7066_v36 = vadd.f32 %v1175_v14, %v1174_v32  ;;  %v8130_v14 = vld [vmem:[#allocation51_spill] sm:$0xff]  ;;  %v8133_v32 = vld [vmem:[#allocation54_spill] sm:$0xff] }
 0x2ab   :  { %6189 = vtanh.f32 %v7066_v36  ;;  %4932 = vmatpush1.bf16.msra.mxu0 %v8126_v26  ;;  %4964 = vmatpush1.bf16.msra.mxu1 %v8127_v12 }
 0x2ac   :  { %4966 = vmatprep.subr.bf16.mxu0 %v8128_v61  ;;  %4998 = vmatprep.subr.bf16.mxu1 %v8129_v49 }
 0x2b5   :  { %v6190_v16 = vpop.eup %6189 }
 0x2b6   :  { %v1180_v3 = vmul.f32 %v6190_v16, %v1178_v35  ;;  %v8134_v35 = vld [vmem:[#allocation55_spill] sm:$0xff]  ;;  %v8135_v16 = vld [vmem:[#allocation56_spill] sm:$0xff] }
 0x2b8   :  { %1388 = vmatmul.mubr.f32.vlgmr.msra.gmra.mrb[8].mxu0 %v1180_v3  ;;  %1459 = vmatmul.mubr.f32.vlgmr.msra.gmra.mrb[8].mxu1 %v1180_v3 }
 0x2b9   :  { %4968 = vmatpush1.bf16.msra.mxu0 %v6616_v15  ;;  %5000 = vmatpush1.bf16.msra.mxu1 %v6622_v19 }
 0x2ba   :  { %4970 = vmatprep.subr.bf16.mxu0 %v6624_v20  ;;  %5002 = vmatprep.subr.bf16.mxu1 %v6627_v24 }
 0x2bb   :  { %1559 = vmatprep.mubr.f32.mxu0 %v8039_v44  ;;  %1630 = vmatprep.mubr.f32.mxu1 %v8039_v44 }
 0x2bd   :  { %4972 = vmatpush1.bf16.msra.mxu0 %v6631_v28  ;;  %5004 = vmatpush1.bf16.msra.mxu1 %v6633_v29 }
 0x2be   :  { %4974 = vmatprep.subr.bf16.mxu0 %v6636_v33  ;;  %5006 = vmatprep.subr.bf16.mxu1 %v6638_v37 }
 0x2c1   :  { %4976 = vmatpush1.bf16.msra.mxu0 %v6641_v41  ;;  %5008 = vmatpush1.bf16.msra.mxu1 %v6645_v45 }
 0x2c2   :  { %4978 = vmatprep.subr.bf16.mxu0 %v6647_v46  ;;  %5010 = vmatprep.subr.bf16.mxu1 %v6650_v50 }
 0x2c5   :  { %4980 = vmatpush1.bf16.msra.mxu0 %v6653_v56  ;;  %5012 = vmatpush1.bf16.msra.mxu1 %v6657_v57 }
 0x2c6   :  { %4982 = vmatprep.subr.bf16.mxu0 %v6659_v58  ;;  %5014 = vmatprep.subr.bf16.mxu1 %v6662_v62 }
 0x2c9   :  { %4984 = vmatpush1.bf16.msra.mxu0 %v6665_v5  ;;  %5016 = vmatpush1.bf16.msra.mxu1 %v6669_v6 }
 0x2ca   :  { %4986 = vmatprep.subr.bf16.mxu0 %v6671_v7  ;;  %5018 = vmatprep.subr.bf16.mxu1 %v6674_v13 }
 0x2cd   :  { %4988 = vmatpush1.bf16.msra.mxu0 %v6677_v22  ;;  %5020 = vmatpush1.bf16.msra.mxu1 %v6681_v23 }
 0x2ce   :  { %4990 = vmatprep.subr.bf16.mxu0 %v6683_v25  ;;  %5022 = vmatprep.subr.bf16.mxu1 %v6686_v31 }
 0x2d1   :  { %4992 = vmatpush1.bf16.msra.mxu0 %v6689_v39  ;;  %5024 = vmatpush1.bf16.msra.mxu1 %v6693_v40 }
 0x2d2   :  { %4994 = vmatprep.subr.bf16.mxu0 %v6695_v42  ;;  %5026 = vmatprep.subr.bf16.mxu1 %v6698_v47 }
 0x2d5   :  { %4996 = vmatpush1.bf16.msra.mxu0 %v6701_v51  ;;  %5028 = vmatpush1.bf16.msra.mxu1 %v6705_v52 }
 0x2d6   :  { %5030 = vmatprep.subr.bf16.mxu0 %v6714_v59  ;;  %5062 = vmatprep.subr.bf16.mxu1 %v6716_v1 }
 0x2d8   :  { %1560 = vmatmul.mubr.f32.vlgmr.msra.gmra.mrb[10].mxu0 %v1180_v3  ;;  %1631 = vmatmul.mubr.f32.vlgmr.msra.gmra.mrb[10].mxu1 %v1180_v3  ;;  %v8132_v3 = vld [vmem:[#allocation53_spill] sm:$0xff] }
 0x2d9   :  { %5032 = vmatpush1.bf16.msra.mxu0 %v6718_v2  ;;  %5064 = vmatpush1.bf16.msra.mxu1 %v6721_v9  ;;  %v8154_v9 = vld [vmem:[#allocation105_spill] sm:$0xff] }
 0x2da   :  { %5034 = vmatprep.subr.bf16.mxu0 %v6725_v17  ;;  %5066 = vmatprep.subr.bf16.mxu1 %v6727_v18  ;;  %v8153_v18 = vld [vmem:[#allocation104_spill] sm:$0xff] }
 0x2db   :  { %1751 = vmatprep.mubr.f32.mxu0 %v8039_v44  ;;  %1822 = vmatprep.mubr.f32.mxu1 %v8039_v44 }
 0x2dd   :  { %5036 = vmatpush1.bf16.msra.mxu0 %v6730_v30  ;;  %5068 = vmatpush1.bf16.msra.mxu1 %v6734_v34  ;;  %v8136_v30 = vld [vmem:[#allocation57_spill] sm:$0xff]  ;;  %v8137_v34 = vld [vmem:[#allocation58_spill] sm:$0xff] }
 0x2de   :  { %5038 = vmatprep.subr.bf16.mxu0 %v6738_v43  ;;  %5070 = vmatprep.subr.bf16.mxu1 %v6740_v48  ;;  %v8138_v43 = vld [vmem:[#allocation59_spill] sm:$0xff]  ;;  %v8139_v48 = vld [vmem:[#allocation60_spill] sm:$0xff] }
 0x2e1   :  { %5040 = vmatpush1.bf16.msra.mxu0 %v6743_v55  ;;  %5072 = vmatpush1.bf16.msra.mxu1 %v8130_v14  ;;  %v8140_v55 = vld [vmem:[#allocation61_spill] sm:$0xff]  ;;  %v8141_v14 = vld [vmem:[#allocation62_spill] sm:$0xff] }
 0x2e2   :  { %5042 = vmatprep.subr.bf16.mxu0 %v8131_v21  ;;  %5074 = vmatprep.subr.bf16.mxu1 %v8132_v3  ;;  %v8142_v21 = vld [vmem:[#allocation63_spill] sm:$0xff]  ;;  %v8143_v3 = vld [vmem:[#allocation64_spill] sm:$0xff] }
 0x2e5   :  { %5044 = vmatpush1.bf16.msra.mxu0 %v8133_v32  ;;  %5076 = vmatpush1.bf16.msra.mxu1 %v8134_v35  ;;  %v8144_v32 = vld [vmem:[#allocation65_spill] sm:$0xff]  ;;  %v8145_v35 = vld [vmem:[#allocation66_spill] sm:$0xff] }
 0x2e6   :  { %5046 = vmatprep.subr.bf16.mxu0 %v8135_v16  ;;  %5078 = vmatprep.subr.bf16.mxu1 %v8136_v30  ;;  %v8146_v16 = vld [vmem:[#allocation67_spill] sm:$0xff]  ;;  %v8147_v30 = vld [vmem:[#allocation68_spill] sm:$0xff] }
 0x2e9   :  { %5048 = vmatpush1.bf16.msra.mxu0 %v8137_v34  ;;  %5080 = vmatpush1.bf16.msra.mxu1 %v8138_v43  ;;  %v8148_v34 = vld [vmem:[#allocation69_spill] sm:$0xff]  ;;  %v8149_v43 = vld [vmem:[#allocation70_spill] sm:$0xff] }
 0x2ea   :  { %5050 = vmatprep.subr.bf16.mxu0 %v8139_v48  ;;  %5082 = vmatprep.subr.bf16.mxu1 %v8140_v55  ;;  %v8150_v48 = vld [vmem:[#allocation71_spill] sm:$0xff]  ;;  %v8151_v55 = vld [vmem:[#allocation72_spill] sm:$0xff] }
 0x2ed   :  { %5052 = vmatpush1.bf16.msra.mxu0 %v8141_v14  ;;  %5084 = vmatpush1.bf16.msra.mxu1 %v8142_v21  ;;  %v8152_v14 = vld [vmem:[#allocation73_spill] sm:$0xff] }
 0x2ee   :  { %5054 = vmatprep.subr.bf16.mxu0 %v8143_v3  ;;  %5086 = vmatprep.subr.bf16.mxu1 %v8144_v32 }
 0x2f1   :  { %5056 = vmatpush1.bf16.msra.mxu0 %v8145_v35  ;;  %5088 = vmatpush1.bf16.msra.mxu1 %v8146_v16 }
 0x2f2   :  { %5058 = vmatprep.subr.bf16.mxu0 %v8147_v30  ;;  %5090 = vmatprep.subr.bf16.mxu1 %v8148_v34  ;;  %v8155_v34 = vld [vmem:[#allocation106_spill] sm:$0xff] }
 0x2f5   :  { %5060 = vmatpush1.bf16.msra.mxu0 %v8149_v43  ;;  %5092 = vmatpush1.bf16.msra.mxu1 %v8150_v48 }
 0x2f6   :  { %5094 = vmatprep.subr.bf16.mxu0 %v8151_v55  ;;  %5126 = vmatprep.subr.bf16.mxu1 %v8152_v14 }
 0x38b   :  { %v1389_v21 = vpop.f32.mrb[8].mxu0  ;;  %v1460_v3 = vpop.f32.mrb[8].mxu1 }
 0x38c   :  { %v1465_v32 = vadd.f32 %v1389_v21, %v8153_v18  ;;  %v1391_v17 = vpop.f32.mrb[9].mxu0  ;;  %v1462_v35 = vpop.f32.mrb[9].mxu1  ;;  %v1467_v43 = vadd.f32 %v1460_v3, %v8155_v34 }
 0x38d   :  { %v1466_v16 = vadd.f32 %v1391_v17, %v8154_v9  ;;  %v1468_v48 = vadd.f32 %v1462_v35, %v7025_v10 }
 0x38e   :  { %v4554_v2 = vmul.f32 -1.442695, %v1465_v32  ;;  %v4556_v1 = vmul.f32 -1.442695, %v1467_v43 }
 0x38f   :  { %v4555_v30 = vmul.f32 -1.442695, %v1466_v16 }
 0x390   :  { %6191 = vpow2.f32 %v4554_v2 }
 0x391   :  { %6193 = vpow2.f32 %v4555_v30 }
 0x392   :  { %6195 = vtanh.f32 %v1468_v48 }
 0x393   :  { %6197 = vpow2.f32 %v4556_v1 }
 0x39a   :  { %v6192_v55 = vpop.eup %6191 }
 0x39b   :  { %v1478_v59 = vadd.f32 1.0, %v6192_v55  ;;  %v6194_v14 = vpop.eup %6193 }
 0x39c   :  { %v1479_v21 = vadd.f32 1.0, %v6194_v14  ;;  %v6196_v18 = vpop.eup %6195 }
 0x39d   :  { %6199 = vrcp.f32 %v1478_v59  ;;  %v6198_v52 = vpop.eup %6197 }
 0x39e   :  { %6201 = vrcp.f32 %v1479_v21  ;;  %v1480_v2 = vadd.f32 1.0, %v6198_v52  ;;  %v1494_v21 = vld [vmem:[#allocation2 + $0x2] ss:$8 sm:$0xf] }
 0x3a0   :  { %6203 = vrcp.f32 %v1480_v2  ;;  %v8157_v2 = vld [vmem:[#allocation80_spill] sm:$0xff] }
 0x3a7   :  { %v6200_v17 = vpop.eup %6199 }
 0x3a8   :  { %v1489_v32 = vmul.f32 %v6200_v17, %v6196_v18  ;;  %v6202_v16 = vpop.eup %6201 }
 0x3a9   :  { %v1488_v30 = vmul.f32 %v6202_v16, %v7029_v4 }
 0x3aa   :  { %v6204_v17 = vpop.eup %6203 }
 0x3ab   :  { %v1561_v3 = vpop.f32.mrb[10].mxu0  ;;  %v1632_v34 = vpop.f32.mrb[10].mxu1  ;;  %v7146_v35 = vadd.f32 %v1489_v32, %v1488_v30 }
 0x3ac   :  { %v1563_v43 = vpop.f32.mrb[11].mxu0  ;;  %v1634_v55 = vpop.f32.mrb[11].mxu1 }
 0x3ad   :  { %v1641_v48 = vcombine.low %v1561_v3, %v1563_v43  ;;  %v1642_v1 = vcombine.low %v1632_v34, %v1634_v55  ;;  %6205 = vtanh.f32 %v7146_v35  ;;  %v8156_v34 = vld [vmem:[#allocation79_spill] sm:$0xff]  ;;  %v8158_v3 = vld [vmem:[#allocation81_spill] sm:$0xff] }
 0x3af   :  { %v1649_v59 = vrot.slane %v1641_v48, %v6930_v63  ;;  %v1656_v14 = vrot.slane %v1642_v1, %v6930_v63  ;;  %v8159_v1 = vld [vmem:[#allocation82_spill] sm:$0xff] }
 0x3b1   :  { %v1657_v18 = vcombine.low %v1649_v59, %v1656_v14  ;;  %v8160_v59 = vld [vmem:[#allocation83_spill] sm:$0xff]  ;;  %v8161_v14 = vld [vmem:[#allocation84_spill] sm:$0xff] }
 0x3b3   :  { %v1664_v52 = vrot.slane %v1657_v18, %v6930_v63  ;;  %v8162_v18 = vld [vmem:[#allocation85_spill] sm:$0xff] }
 0x3b5   :  { %v1666_v4 = vadd.f32 %v1664_v52, %v1494_v21  ;;  %v8163_v52 = vld [vmem:[#allocation86_spill] sm:$0xff]  ;;  %v8164_v21 = vld [vmem:[#allocation87_spill] sm:$0xff] }
 0x3b7   :  { %v4557_v16 = vmul.f32 -1.442695, %v1666_v4  ;;  %v6206_v32 = vpop.eup %6205  ;;  %v1674_v48 = vrot.slane %v1666_v4, 3  ;;  %v8168_v4 = vld [vmem:[#allocation91_spill] sm:$0xff] }
 0x3b8   :  { %v1492_v30 = vmul.f32 %v6206_v32, %v6204_v17  ;;  %v8165_v17 = vld [vmem:[#allocation88_spill] sm:$0xff]  ;;  %v8167_v32 = vld [vmem:[#allocation90_spill] sm:$0xff] }
 0x3b9   :  { %6207 = vpow2.f32 %v4557_v16  ;;  %v8166_v16 = vld [vmem:[#allocation89_spill] sm:$0xff] }
 0x3ba   :  { %1752 = vmatmul.mubr.f32.vlgmr.msra.gmra.mrb[12].mxu0 %v1492_v30  ;;  %1823 = vmatmul.mubr.f32.vlgmr.msra.gmra.mrb[12].mxu1 %v1492_v30  ;;  %v8169_v30 = vld [vmem:[#allocation92_spill] sm:$0xff] }
 0x3bb   :  { %5096 = vmatpush1.bf16.msra.mxu0 %v8099_v11  ;;  %5128 = vmatpush1.bf16.msra.mxu1 %v8100_v8 }
 0x3bc   :  { %5098 = vmatprep.subr.bf16.mxu0 %v8101_v60  ;;  %5130 = vmatprep.subr.bf16.mxu1 %v8102_v54 }
 0x3bd   :  { %1893 = vmatprep.mubr.f32.mxu0 %v8039_v44  ;;  %1964 = vmatprep.mubr.f32.mxu1 %v8039_v44 }
 0x3bf   :  { %5100 = vmatpush1.bf16.msra.mxu0 %v8103_v38  ;;  %5132 = vmatpush1.bf16.msra.mxu1 %v8156_v34 }
 0x3c0   :  { %5102 = vmatprep.subr.bf16.mxu0 %v8157_v2  ;;  %5134 = vmatprep.subr.bf16.mxu1 %v8158_v3 }
 0x3c3   :  { %v6208_v43 = vpop.eup %6207  ;;  %5104 = vmatpush1.bf16.msra.mxu0 %v8159_v1  ;;  %5136 = vmatpush1.bf16.msra.mxu1 %v8160_v59  ;;  %v8175_v59 = vld [vmem:[#allocation98_spill] sm:$0xff] }
 0x3c4   :  { %v1670_v55 = vadd.f32 1.0, %v6208_v43  ;;  %5106 = vmatprep.subr.bf16.mxu0 %v8161_v14  ;;  %5138 = vmatprep.subr.bf16.mxu1 %v8162_v18  ;;  %v8170_v43 = vld [vmem:[#allocation93_spill] sm:$0xff]  ;;  %v8171_v18 = vld [vmem:[#allocation94_spill] sm:$0xff] }
 0x3c6   :  { %6209 = vrcp.f32 %v1670_v55  ;;  %v8172_v55 = vld [vmem:[#allocation95_spill] sm:$0xff] }
 0x3c7   :  { %6211 = vtanh.f32 %v1674_v48  ;;  %5108 = vmatpush1.bf16.msra.mxu0 %v8163_v52  ;;  %5140 = vmatpush1.bf16.msra.mxu1 %v8164_v21  ;;  %v8173_v48 = vld [vmem:[#allocation96_spill] sm:$0xff]  ;;  %v8174_v21 = vld [vmem:[#allocation97_spill] sm:$0xff] }
 0x3c8   :  { %5110 = vmatprep.subr.bf16.mxu0 %v8165_v17  ;;  %5142 = vmatprep.subr.bf16.mxu1 %v8166_v16 }
 0x3cb   :  { %5112 = vmatpush1.bf16.msra.mxu0 %v8167_v32  ;;  %5144 = vmatpush1.bf16.msra.mxu1 %v8168_v4 }
 0x3cc   :  { %5114 = vmatprep.subr.bf16.mxu0 %v8169_v30  ;;  %5146 = vmatprep.subr.bf16.mxu1 %v8170_v43 }
 0x3cf   :  { %5116 = vmatpush1.bf16.msra.mxu0 %v8171_v18  ;;  %5148 = vmatpush1.bf16.msra.mxu1 %v8172_v55 }
 0x3d0   :  { %v6210_v14 = vpop.eup %6209  ;;  %5118 = vmatprep.subr.bf16.mxu0 %v8173_v48  ;;  %5150 = vmatprep.subr.bf16.mxu1 %v8174_v21 }
 0x3d1   :  { %v1678_v17 = vrot.slane %v6210_v14, 1  ;;  %v6212_v52 = vpop.eup %6211 }
 0x3d2   :  { %v1681_v16 = vmul.f32 %v6212_v52, %v6210_v14 }
 0x3d3   :  { %v1680_v32 = vmul.f32 %v1678_v17, %v7066_v36  ;;  %5120 = vmatpush1.bf16.msra.mxu0 %v8175_v59  ;;  %5152 = vmatpush1.bf16.msra.mxu1 %v8123_v27  ;;  %v1684_v36 = vrot.slane %v6210_v14, 2  ;;  %v8176_v14 = vld [vmem:[#allocation39_spill] sm:$0xff] }
 0x3d4   :  { %5122 = vmatprep.subr.bf16.mxu0 %v8124_v53  ;;  %5154 = vmatprep.subr.bf16.mxu1 %v8125_v0 }
 0x3d5   :  { %v7183_v18 = vadd.f32 %v1681_v16, %v1680_v32  ;;  %v8177_v16 = vld [vmem:[#allocation40_spill] sm:$0xff]  ;;  %v8178_v32 = vld [vmem:[#allocation41_spill] sm:$0xff] }
 0x3d7   :  { %6213 = vtanh.f32 %v7183_v18  ;;  %5124 = vmatpush1.bf16.msra.mxu0 %v8126_v26  ;;  %5156 = vmatpush1.bf16.msra.mxu1 %v8127_v12 }
 0x3d8   :  { %5158 = vmatprep.subr.bf16.mxu0 %v8128_v61  ;;  %5190 = vmatprep.subr.bf16.mxu1 %v8129_v49 }
 0x3e1   :  { %v6214_v52 = vpop.eup %6213 }
 0x3e2   :  { %v1686_v17 = vmul.f32 %v6214_v52, %v1684_v36  ;;  %v8179_v36 = vld [vmem:[#allocation42_spill] sm:$0xff]  ;;  %v8180_v52 = vld [vmem:[#allocation43_spill] sm:$0xff] }
 0x3e4   :  { %1894 = vmatmul.mubr.f32.vlgmr.msra.gmra.mrb[12].mxu0 %v1686_v17  ;;  %1965 = vmatmul.mubr.f32.vlgmr.msra.gmra.mrb[12].mxu1 %v1686_v17 }
 0x3e5   :  { %5160 = vmatpush1.bf16.msra.mxu0 %v6616_v15  ;;  %5192 = vmatpush1.bf16.msra.mxu1 %v6622_v19 }
 0x3e6   :  { %5162 = vmatprep.subr.bf16.mxu0 %v6624_v20  ;;  %5194 = vmatprep.subr.bf16.mxu1 %v6627_v24 }
 0x3e7   :  { %2065 = vmatprep.mubr.f32.mxu0 %v8039_v44  ;;  %2136 = vmatprep.mubr.f32.mxu1 %v8039_v44 }
 0x3e9   :  { %5164 = vmatpush1.bf16.msra.mxu0 %v6631_v28  ;;  %5196 = vmatpush1.bf16.msra.mxu1 %v6633_v29 }
 0x3ea   :  { %5166 = vmatprep.subr.bf16.mxu0 %v6636_v33  ;;  %5198 = vmatprep.subr.bf16.mxu1 %v6638_v37 }
 0x3ed   :  { %5168 = vmatpush1.bf16.msra.mxu0 %v6641_v41  ;;  %5200 = vmatpush1.bf16.msra.mxu1 %v6645_v45 }
 0x3ee   :  { %5170 = vmatprep.subr.bf16.mxu0 %v6647_v46  ;;  %5202 = vmatprep.subr.bf16.mxu1 %v6650_v50 }
 0x3f1   :  { %5172 = vmatpush1.bf16.msra.mxu0 %v6653_v56  ;;  %5204 = vmatpush1.bf16.msra.mxu1 %v6657_v57 }
 0x3f2   :  { %5174 = vmatprep.subr.bf16.mxu0 %v6659_v58  ;;  %5206 = vmatprep.subr.bf16.mxu1 %v6662_v62 }
 0x3f5   :  { %5176 = vmatpush1.bf16.msra.mxu0 %v6665_v5  ;;  %5208 = vmatpush1.bf16.msra.mxu1 %v6669_v6 }
 0x3f6   :  { %5178 = vmatprep.subr.bf16.mxu0 %v6671_v7  ;;  %5210 = vmatprep.subr.bf16.mxu1 %v6674_v13 }
 0x3f9   :  { %5180 = vmatpush1.bf16.msra.mxu0 %v6677_v22  ;;  %5212 = vmatpush1.bf16.msra.mxu1 %v6681_v23 }
 0x3fa   :  { %5182 = vmatprep.subr.bf16.mxu0 %v6683_v25  ;;  %5214 = vmatprep.subr.bf16.mxu1 %v6686_v31  ;;  %v8211_v31 = vld [vmem:[#allocation104_spill] sm:$0xff] }
 0x3fd   :  { %5184 = vmatpush1.bf16.msra.mxu0 %v6689_v39  ;;  %5216 = vmatpush1.bf16.msra.mxu1 %v6693_v40  ;;  %v8181_v39 = vld [vmem:[#allocation44_spill] sm:$0xff]  ;;  %v8182_v40 = vld [vmem:[#allocation45_spill] sm:$0xff] }
 0x3fe   :  { %5186 = vmatprep.subr.bf16.mxu0 %v6695_v42  ;;  %5218 = vmatprep.subr.bf16.mxu1 %v6698_v47  ;;  %v8192_v47 = vld [vmem:[#allocation55_spill] sm:$0xff]  ;;  %v8193_v42 = vld [vmem:[#allocation56_spill] sm:$0xff] }
 0x401   :  { %5188 = vmatpush1.bf16.msra.mxu0 %v6701_v51  ;;  %5220 = vmatpush1.bf16.msra.mxu1 %v8176_v14  ;;  %v8183_v51 = vld [vmem:[#allocation46_spill] sm:$0xff]  ;;  %v8184_v14 = vld [vmem:[#allocation47_spill] sm:$0xff] }
 0x402   :  { %5222 = vmatprep.subr.bf16.mxu0 %v8177_v16  ;;  %5254 = vmatprep.subr.bf16.mxu1 %v8178_v32  ;;  %v8185_v16 = vld [vmem:[#allocation48_spill] sm:$0xff]  ;;  %v8186_v32 = vld [vmem:[#allocation49_spill] sm:$0xff] }
 0x404   :  { %2066 = vmatmul.mubr.f32.vlgmr.msra.gmra.mrb[14].mxu0 %v1686_v17  ;;  %2137 = vmatmul.mubr.f32.vlgmr.msra.gmra.mrb[14].mxu1 %v1686_v17  ;;  %v8187_v17 = vld [vmem:[#allocation50_spill] sm:$0xff] }
 0x405   :  { %5224 = vmatpush1.bf16.msra.mxu0 %v8179_v36  ;;  %5256 = vmatpush1.bf16.msra.mxu1 %v8180_v52  ;;  %v8188_v36 = vld [vmem:[#allocation51_spill] sm:$0xff]  ;;  %v8189_v52 = vld [vmem:[#allocation52_spill] sm:$0xff] }
 0x406   :  { %5226 = vmatprep.subr.bf16.mxu0 %v8181_v39  ;;  %5258 = vmatprep.subr.bf16.mxu1 %v8182_v40  ;;  %v8190_v39 = vld [vmem:[#allocation53_spill] sm:$0xff]  ;;  %v8191_v40 = vld [vmem:[#allocation54_spill] sm:$0xff] }
 0x407   :  { %2257 = vmatprep.mubr.f32.mxu0 %v8039_v44  ;;  %2328 = vmatprep.mubr.f32.mxu1 %v8039_v44 }
 0x409   :  { %5228 = vmatpush1.bf16.msra.mxu0 %v8183_v51  ;;  %5260 = vmatpush1.bf16.msra.mxu1 %v8184_v14  ;;  %v8194_v51 = vld [vmem:[#allocation57_spill] sm:$0xff]  ;;  %v8195_v14 = vld [vmem:[#allocation58_spill] sm:$0xff] }
 0x40a   :  { %5230 = vmatprep.subr.bf16.mxu0 %v8185_v16  ;;  %5262 = vmatprep.subr.bf16.mxu1 %v8186_v32  ;;  %v8196_v16 = vld [vmem:[#allocation59_spill] sm:$0xff]  ;;  %v8197_v32 = vld [vmem:[#allocation60_spill] sm:$0xff] }
 0x40d   :  { %5232 = vmatpush1.bf16.msra.mxu0 %v8187_v17  ;;  %5264 = vmatpush1.bf16.msra.mxu1 %v8188_v36  ;;  %v8198_v17 = vld [vmem:[#allocation61_spill] sm:$0xff]  ;;  %v8199_v36 = vld [vmem:[#allocation62_spill] sm:$0xff] }
 0x40e   :  { %5234 = vmatprep.subr.bf16.mxu0 %v8189_v52  ;;  %5266 = vmatprep.subr.bf16.mxu1 %v8190_v39  ;;  %v8200_v52 = vld [vmem:[#allocation63_spill] sm:$0xff]  ;;  %v8201_v39 = vld [vmem:[#allocation64_spill] sm:$0xff] }
 0x411   :  { %5236 = vmatpush1.bf16.msra.mxu0 %v8191_v40  ;;  %5268 = vmatpush1.bf16.msra.mxu1 %v8192_v47  ;;  %v8202_v40 = vld [vmem:[#allocation65_spill] sm:$0xff]  ;;  %v8203_v47 = vld [vmem:[#allocation66_spill] sm:$0xff] }
 0x412   :  { %5238 = vmatprep.subr.bf16.mxu0 %v8193_v42  ;;  %5270 = vmatprep.subr.bf16.mxu1 %v8194_v51  ;;  %v8204_v42 = vld [vmem:[#allocation67_spill] sm:$0xff]  ;;  %v8205_v51 = vld [vmem:[#allocation68_spill] sm:$0xff] }
 0x415   :  { %5240 = vmatpush1.bf16.msra.mxu0 %v8195_v14  ;;  %5272 = vmatpush1.bf16.msra.mxu1 %v8196_v16  ;;  %v8206_v14 = vld [vmem:[#allocation69_spill] sm:$0xff]  ;;  %v8207_v16 = vld [vmem:[#allocation70_spill] sm:$0xff] }
 0x416   :  { %5242 = vmatprep.subr.bf16.mxu0 %v8197_v32  ;;  %5274 = vmatprep.subr.bf16.mxu1 %v8198_v17  ;;  %v8208_v32 = vld [vmem:[#allocation71_spill] sm:$0xff]  ;;  %v8209_v17 = vld [vmem:[#allocation72_spill] sm:$0xff] }
 0x419   :  { %5244 = vmatpush1.bf16.msra.mxu0 %v8199_v36  ;;  %5276 = vmatpush1.bf16.msra.mxu1 %v8200_v52  ;;  %v8210_v36 = vld [vmem:[#allocation73_spill] sm:$0xff] }
 0x41a   :  { %5246 = vmatprep.subr.bf16.mxu0 %v8201_v39  ;;  %5278 = vmatprep.subr.bf16.mxu1 %v8202_v40 }
 0x41d   :  { %5248 = vmatpush1.bf16.msra.mxu0 %v8203_v47  ;;  %5280 = vmatpush1.bf16.msra.mxu1 %v8204_v42 }
 0x41e   :  { %5250 = vmatprep.subr.bf16.mxu0 %v8205_v51  ;;  %5282 = vmatprep.subr.bf16.mxu1 %v8206_v14  ;;  %v8212_v14 = vld [vmem:[#allocation106_spill] sm:$0xff] }
 0x421   :  { %5252 = vmatpush1.bf16.msra.mxu0 %v8207_v16  ;;  %5284 = vmatpush1.bf16.msra.mxu1 %v8208_v32 }
 0x422   :  { %5286 = vmatprep.subr.bf16.mxu0 %v8209_v17  ;;  %5318 = vmatprep.subr.bf16.mxu1 %v8210_v36 }
 0x4b7   :  { %v1895_v52 = vpop.f32.mrb[12].mxu0  ;;  %v1966_v39 = vpop.f32.mrb[12].mxu1 }
 0x4b8   :  { %v1971_v40 = vadd.f32 %v1895_v52, %v8211_v31  ;;  %v1897_v25 = vpop.f32.mrb[13].mxu0  ;;  %v1968_v47 = vpop.f32.mrb[13].mxu1  ;;  %v1973_v16 = vadd.f32 %v1966_v39, %v8212_v14 }
 0x4b9   :  { %v1972_v42 = vadd.f32 %v1897_v25, %v8154_v9  ;;  %v1974_v32 = vadd.f32 %v1968_v47, %v7025_v10 }
 0x4ba   :  { %v4558_v23 = vmul.f32 -1.442695, %v1971_v40  ;;  %v4560_v22 = vmul.f32 -1.442695, %v1973_v16 }
 0x4bb   :  { %v4559_v51 = vmul.f32 -1.442695, %v1972_v42 }
 0x4bc   :  { %6215 = vpow2.f32 %v4558_v23 }
 0x4bd   :  { %6217 = vpow2.f32 %v4559_v51 }
 0x4be   :  { %6219 = vtanh.f32 %v1974_v32 }
 0x4bf   :  { %6221 = vpow2.f32 %v4560_v22 }
 0x4c6   :  { %v6216_v17 = vpop.eup %6215 }
 0x4c7   :  { %v1984_v13 = vadd.f32 1.0, %v6216_v17  ;;  %v6218_v36 = vpop.eup %6217 }
 0x4c8   :  { %v1985_v52 = vadd.f32 1.0, %v6218_v36  ;;  %v6220_v31 = vpop.eup %6219 }
 0x4c9   :  { %6223 = vrcp.f32 %v1984_v13  ;;  %v6222_v7 = vpop.eup %6221 }
 0x4ca   :  { %6225 = vrcp.f32 %v1985_v52  ;;  %v1986_v23 = vadd.f32 1.0, %v6222_v7  ;;  %v2000_v52 = vld [vmem:[#allocation2 + $0x3] ss:$8 sm:$0xf] }
 0x4cc   :  { %6227 = vrcp.f32 %v1986_v23 }
 0x4d3   :  { %v6224_v25 = vpop.eup %6223 }
 0x4d4   :  { %v1995_v40 = vmul.f32 %v6224_v25, %v6220_v31  ;;  %v6226_v42 = vpop.eup %6225 }
 0x4d5   :  { %v1994_v51 = vmul.f32 %v6226_v42, %v7146_v35 }
 0x4d6   :  { %v6228_v25 = vpop.eup %6227 }
 0x4d7   :  { %v2067_v39 = vpop.f32.mrb[14].mxu0  ;;  %v2138_v14 = vpop.f32.mrb[14].mxu1  ;;  %v7263_v47 = vadd.f32 %v1995_v40, %v1994_v51 }
 0x4d8   :  { %v2069_v16 = vpop.f32.mrb[15].mxu0  ;;  %v2140_v17 = vpop.f32.mrb[15].mxu1 }
 0x4d9   :  { %v2147_v32 = vcombine.low %v2067_v39, %v2069_v16  ;;  %v2148_v22 = vcombine.low %v2138_v14, %v2140_v17  ;;  %6229 = vtanh.f32 %v7263_v47  ;;  %v8213_v16 = vld [vmem:[#allocation83_spill] sm:$0xff]  ;;  %v8214_v17 = vld [vmem:[#allocation84_spill] sm:$0xff] }
 0x4db   :  { %v2155_v13 = vrot.slane %v2147_v32, %v6930_v63  ;;  %v2162_v36 = vrot.slane %v2148_v22, %v6930_v63  ;;  %v8215_v32 = vld [vmem:[#allocation85_spill] sm:$0xff]  ;;  %v8216_v22 = vld [vmem:[#allocation86_spill] sm:$0xff] }
 0x4dd   :  { %v2163_v31 = vcombine.low %v2155_v13, %v2162_v36  ;;  %v8217_v13 = vld [vmem:[#allocation87_spill] sm:$0xff]  ;;  %v8218_v36 = vld [vmem:[#allocation88_spill] sm:$0xff] }
 0x4df   :  { %v2170_v7 = vrot.slane %v2163_v31, %v6930_v63  ;;  %v8219_v31 = vld [vmem:[#allocation89_spill] sm:$0xff] }
 0x4e1   :  { %v2172_v35 = vadd.f32 %v2170_v7, %v2000_v52  ;;  %v8220_v7 = vld [vmem:[#allocation90_spill] sm:$0xff] }
 0x4e3   :  { %v4561_v42 = vmul.f32 -1.442695, %v2172_v35  ;;  %v6230_v40 = vpop.eup %6229  ;;  %v2180_v39 = vrot.slane %v2172_v35, 3  ;;  %v8221_v35 = vld [vmem:[#allocation94_spill] sm:$0xff] }
 0x4e4   :  { %v1998_v51 = vmul.f32 %v6230_v40, %v6228_v25 }
 0x4e5   :  { %6231 = vpow2.f32 %v4561_v42 }
 0x4e6   :  { %2258 = vmatmul.mubr.f32.vlgmr.msra.gmra.mrb[16].mxu0 %v1998_v51  ;;  %2329 = vmatmul.mubr.f32.vlgmr.msra.gmra.mrb[16].mxu1 %v1998_v51 }
 0x4e7   :  { %5288 = vmatpush1.bf16.msra.mxu0 %v8099_v11  ;;  %5320 = vmatpush1.bf16.msra.mxu1 %v8100_v8 }
 0x4e8   :  { %5290 = vmatprep.subr.bf16.mxu0 %v8101_v60  ;;  %5322 = vmatprep.subr.bf16.mxu1 %v8102_v54 }
 0x4e9   :  { %2399 = vmatprep.mubr.f32.mxu0 %v8039_v44  ;;  %2470 = vmatprep.mubr.f32.mxu1 %v8039_v44 }
 0x4eb   :  { %5292 = vmatpush1.bf16.msra.mxu0 %v8103_v38  ;;  %5324 = vmatpush1.bf16.msra.mxu1 %v8156_v34 }
 0x4ec   :  { %5294 = vmatprep.subr.bf16.mxu0 %v8157_v2  ;;  %5326 = vmatprep.subr.bf16.mxu1 %v8158_v3 }
 0x4ef   :  { %v6232_v14 = vpop.eup %6231  ;;  %5296 = vmatpush1.bf16.msra.mxu0 %v8159_v1  ;;  %5328 = vmatpush1.bf16.msra.mxu1 %v8213_v16 }
 0x4f0   :  { %v2176_v23 = vadd.f32 1.0, %v6232_v14  ;;  %5298 = vmatprep.subr.bf16.mxu0 %v8214_v17  ;;  %5330 = vmatprep.subr.bf16.mxu1 %v8215_v32 }
 0x4f2   :  { %6233 = vrcp.f32 %v2176_v23 }
 0x4f3   :  { %6235 = vtanh.f32 %v2180_v39  ;;  %5300 = vmatpush1.bf16.msra.mxu0 %v8216_v22  ;;  %5332 = vmatpush1.bf16.msra.mxu1 %v8217_v13 }
 0x4f4   :  { %5302 = vmatprep.subr.bf16.mxu0 %v8218_v36  ;;  %5334 = vmatprep.subr.bf16.mxu1 %v8219_v31 }
 0x4f7   :  { %5304 = vmatpush1.bf16.msra.mxu0 %v8220_v7  ;;  %5336 = vmatpush1.bf16.msra.mxu1 %v8168_v4 }
 0x4f8   :  { %5306 = vmatprep.subr.bf16.mxu0 %v8169_v30  ;;  %5338 = vmatprep.subr.bf16.mxu1 %v8170_v43 }
 0x4fb   :  { %5308 = vmatpush1.bf16.msra.mxu0 %v8221_v35  ;;  %5340 = vmatpush1.bf16.msra.mxu1 %v8172_v55 }
 0x4fc   :  { %v6234_v52 = vpop.eup %6233  ;;  %5310 = vmatprep.subr.bf16.mxu0 %v8173_v48  ;;  %5342 = vmatprep.subr.bf16.mxu1 %v8174_v21 }
 0x4fd   :  { %v2184_v25 = vrot.slane %v6234_v52, 1  ;;  %v6236_v42 = vpop.eup %6235 }
 0x4fe   :  { %v2187_v40 = vmul.f32 %v6236_v42, %v6234_v52  ;;  %v8224_v42 = vld [vmem:[#allocation30_spill] sm:$0xff] }
 0x4ff   :  { %v2186_v51 = vmul.f32 %v2184_v25, %v7183_v18  ;;  %5312 = vmatpush1.bf16.msra.mxu0 %v8175_v59  ;;  %5344 = vmatpush1.bf16.msra.mxu1 %v8123_v27  ;;  %v2190_v18 = vrot.slane %v6234_v52, 2  ;;  %v8222_v52 = vld [vmem:[#allocation28_spill] sm:$0xff]  ;;  %v8223_v25 = vld [vmem:[#allocation29_spill] sm:$0xff] }
 0x500   :  { %5314 = vmatprep.subr.bf16.mxu0 %v8124_v53  ;;  %5346 = vmatprep.subr.bf16.mxu1 %v8125_v0 }
 0x501   :  { %v7300_v14 = vadd.f32 %v2187_v40, %v2186_v51  ;;  %v8225_v40 = vld [vmem:[#allocation31_spill] sm:$0xff]  ;;  %v8226_v51 = vld [vmem:[#allocation32_spill] sm:$0xff] }
 0x503   :  { %6237 = vtanh.f32 %v7300_v14  ;;  %5316 = vmatpush1.bf16.msra.mxu0 %v8126_v26  ;;  %5348 = vmatpush1.bf16.msra.mxu1 %v8127_v12 }
 0x504   :  { %5350 = vmatprep.subr.bf16.mxu0 %v8128_v61  ;;  %5382 = vmatprep.subr.bf16.mxu1 %v8129_v49 }
 0x50d   :  { %v6238_v23 = vpop.eup %6237 }
 0x50e   :  { %v2192_v39 = vmul.f32 %v6238_v23, %v2190_v18  ;;  %v8227_v18 = vld [vmem:[#allocation33_spill] sm:$0xff]  ;;  %v8228_v23 = vld [vmem:[#allocation34_spill] sm:$0xff] }
 0x510   :  { %2400 = vmatmul.mubr.f32.vlgmr.msra.gmra.mrb[16].mxu0 %v2192_v39  ;;  %2471 = vmatmul.mubr.f32.vlgmr.msra.gmra.mrb[16].mxu1 %v2192_v39 }
 0x511   :  { %5352 = vmatpush1.bf16.msra.mxu0 %v6616_v15  ;;  %5384 = vmatpush1.bf16.msra.mxu1 %v6622_v19 }
 0x512   :  { %5354 = vmatprep.subr.bf16.mxu0 %v6624_v20  ;;  %5386 = vmatprep.subr.bf16.mxu1 %v6627_v24 }
 0x513   :  { %2571 = vmatprep.mubr.f32.mxu0 %v8039_v44  ;;  %2642 = vmatprep.mubr.f32.mxu1 %v8039_v44 }
 0x515   :  { %5356 = vmatpush1.bf16.msra.mxu0 %v6631_v28  ;;  %5388 = vmatpush1.bf16.msra.mxu1 %v6633_v29 }
 0x516   :  { %5358 = vmatprep.subr.bf16.mxu0 %v6636_v33  ;;  %5390 = vmatprep.subr.bf16.mxu1 %v6638_v37 }
 0x519   :  { %5360 = vmatpush1.bf16.msra.mxu0 %v6641_v41  ;;  %5392 = vmatpush1.bf16.msra.mxu1 %v6645_v45 }
 0x51a   :  { %5362 = vmatprep.subr.bf16.mxu0 %v6647_v46  ;;  %5394 = vmatprep.subr.bf16.mxu1 %v6650_v50 }
 0x51d   :  { %5364 = vmatpush1.bf16.msra.mxu0 %v6653_v56  ;;  %5396 = vmatpush1.bf16.msra.mxu1 %v6657_v57 }
 0x51e   :  { %5366 = vmatprep.subr.bf16.mxu0 %v6659_v58  ;;  %5398 = vmatprep.subr.bf16.mxu1 %v6662_v62  ;;  %v8229_v58 = vld [vmem:[#allocation35_spill] sm:$0xff]  ;;  %v8230_v62 = vld [vmem:[#allocation36_spill] sm:$0xff] }
 0x521   :  { %5368 = vmatpush1.bf16.msra.mxu0 %v6665_v5  ;;  %5400 = vmatpush1.bf16.msra.mxu1 %v6669_v6  ;;  %v8231_v5 = vld [vmem:[#allocation37_spill] sm:$0xff]  ;;  %v8232_v6 = vld [vmem:[#allocation38_spill] sm:$0xff] }
 0x522   :  { %5370 = vmatprep.subr.bf16.mxu0 %v8222_v52  ;;  %5402 = vmatprep.subr.bf16.mxu1 %v8223_v25  ;;  %v8233_v52 = vld [vmem:[#allocation39_spill] sm:$0xff]  ;;  %v8234_v25 = vld [vmem:[#allocation40_spill] sm:$0xff] }
 0x525   :  { %5372 = vmatpush1.bf16.msra.mxu0 %v8224_v42  ;;  %5404 = vmatpush1.bf16.msra.mxu1 %v8225_v40  ;;  %v8235_v42 = vld [vmem:[#allocation41_spill] sm:$0xff]  ;;  %v8268_v40 = vld [vmem:[#allocation104_spill] sm:$0xff] }
 0x526   :  { %5374 = vmatprep.subr.bf16.mxu0 %v8226_v51  ;;  %5406 = vmatprep.subr.bf16.mxu1 %v8227_v18  ;;  %v8236_v51 = vld [vmem:[#allocation42_spill] sm:$0xff]  ;;  %v8237_v18 = vld [vmem:[#allocation43_spill] sm:$0xff] }
 0x529   :  { %5376 = vmatpush1.bf16.msra.mxu0 %v8228_v23  ;;  %5408 = vmatpush1.bf16.msra.mxu1 %v8229_v58  ;;  %v8238_v23 = vld [vmem:[#allocation44_spill] sm:$0xff]  ;;  %v8239_v58 = vld [vmem:[#allocation45_spill] sm:$0xff] }
 0x52a   :  { %5378 = vmatprep.subr.bf16.mxu0 %v8230_v62  ;;  %5410 = vmatprep.subr.bf16.mxu1 %v8231_v5  ;;  %v8249_v5 = vld [vmem:[#allocation55_spill] sm:$0xff]  ;;  %v8250_v62 = vld [vmem:[#allocation56_spill] sm:$0xff] }
 0x52d   :  { %5380 = vmatpush1.bf16.msra.mxu0 %v8232_v6  ;;  %5412 = vmatpush1.bf16.msra.mxu1 %v8233_v52  ;;  %v8240_v6 = vld [vmem:[#allocation46_spill] sm:$0xff]  ;;  %v8241_v52 = vld [vmem:[#allocation47_spill] sm:$0xff] }
 0x52e   :  { %5414 = vmatprep.subr.bf16.mxu0 %v8234_v25  ;;  %5446 = vmatprep.subr.bf16.mxu1 %v8235_v42  ;;  %v8242_v25 = vld [vmem:[#allocation48_spill] sm:$0xff]  ;;  %v8243_v42 = vld [vmem:[#allocation49_spill] sm:$0xff] }
 0x530   :  { %2572 = vmatmul.mubr.f32.vlgmr.msra.gmra.mrb[18].mxu0 %v2192_v39  ;;  %2643 = vmatmul.mubr.f32.vlgmr.msra.gmra.mrb[18].mxu1 %v2192_v39  ;;  %v8244_v39 = vld [vmem:[#allocation50_spill] sm:$0xff] }
 0x531   :  { %5416 = vmatpush1.bf16.msra.mxu0 %v8236_v51  ;;  %5448 = vmatpush1.bf16.msra.mxu1 %v8237_v18  ;;  %v8245_v51 = vld [vmem:[#allocation51_spill] sm:$0xff]  ;;  %v8246_v18 = vld [vmem:[#allocation52_spill] sm:$0xff] }
 0x532   :  { %5418 = vmatprep.subr.bf16.mxu0 %v8238_v23  ;;  %5450 = vmatprep.subr.bf16.mxu1 %v8239_v58  ;;  %v8247_v23 = vld [vmem:[#allocation53_spill] sm:$0xff]  ;;  %v8248_v58 = vld [vmem:[#allocation54_spill] sm:$0xff] }
 0x533   :  { %2763 = vmatprep.mubr.f32.mxu0 %v8039_v44  ;;  %2834 = vmatprep.mubr.f32.mxu1 %v8039_v44 }
 0x535   :  { %5420 = vmatpush1.bf16.msra.mxu0 %v8240_v6  ;;  %5452 = vmatpush1.bf16.msra.mxu1 %v8241_v52  ;;  %v8251_v6 = vld [vmem:[#allocation57_spill] sm:$0xff]  ;;  %v8252_v52 = vld [vmem:[#allocation58_spill] sm:$0xff] }
 0x536   :  { %5422 = vmatprep.subr.bf16.mxu0 %v8242_v25  ;;  %5454 = vmatprep.subr.bf16.mxu1 %v8243_v42  ;;  %v8253_v25 = vld [vmem:[#allocation59_spill] sm:$0xff]  ;;  %v8254_v42 = vld [vmem:[#allocation60_spill] sm:$0xff] }
 0x539   :  { %5424 = vmatpush1.bf16.msra.mxu0 %v8244_v39  ;;  %5456 = vmatpush1.bf16.msra.mxu1 %v8245_v51  ;;  %v8255_v39 = vld [vmem:[#allocation61_spill] sm:$0xff]  ;;  %v8256_v51 = vld [vmem:[#allocation62_spill] sm:$0xff] }
 0x53a   :  { %5426 = vmatprep.subr.bf16.mxu0 %v8246_v18  ;;  %5458 = vmatprep.subr.bf16.mxu1 %v8247_v23  ;;  %v8257_v18 = vld [vmem:[#allocation63_spill] sm:$0xff]  ;;  %v8258_v23 = vld [vmem:[#allocation64_spill] sm:$0xff] }
 0x53d   :  { %5428 = vmatpush1.bf16.msra.mxu0 %v8248_v58  ;;  %5460 = vmatpush1.bf16.msra.mxu1 %v8249_v5  ;;  %v8259_v58 = vld [vmem:[#allocation65_spill] sm:$0xff]  ;;  %v8260_v5 = vld [vmem:[#allocation66_spill] sm:$0xff] }
 0x53e   :  { %5430 = vmatprep.subr.bf16.mxu0 %v8250_v62  ;;  %5462 = vmatprep.subr.bf16.mxu1 %v8251_v6  ;;  %v8261_v62 = vld [vmem:[#allocation67_spill] sm:$0xff]  ;;  %v8262_v6 = vld [vmem:[#allocation68_spill] sm:$0xff] }
 0x541   :  { %5432 = vmatpush1.bf16.msra.mxu0 %v8252_v52  ;;  %5464 = vmatpush1.bf16.msra.mxu1 %v8253_v25  ;;  %v8263_v52 = vld [vmem:[#allocation69_spill] sm:$0xff]  ;;  %v8264_v25 = vld [vmem:[#allocation70_spill] sm:$0xff] }
 0x542   :  { %5434 = vmatprep.subr.bf16.mxu0 %v8254_v42  ;;  %5466 = vmatprep.subr.bf16.mxu1 %v8255_v39  ;;  %v8265_v42 = vld [vmem:[#allocation71_spill] sm:$0xff]  ;;  %v8266_v39 = vld [vmem:[#allocation72_spill] sm:$0xff] }
 0x545   :  { %5436 = vmatpush1.bf16.msra.mxu0 %v8256_v51  ;;  %5468 = vmatpush1.bf16.msra.mxu1 %v8257_v18  ;;  %v8267_v51 = vld [vmem:[#allocation73_spill] sm:$0xff] }
 0x546   :  { %5438 = vmatprep.subr.bf16.mxu0 %v8258_v23  ;;  %5470 = vmatprep.subr.bf16.mxu1 %v8259_v58 }
 0x549   :  { %5440 = vmatpush1.bf16.msra.mxu0 %v8260_v5  ;;  %5472 = vmatpush1.bf16.msra.mxu1 %v8261_v62 }
 0x54a   :  { %5442 = vmatprep.subr.bf16.mxu0 %v8262_v6  ;;  %5474 = vmatprep.subr.bf16.mxu1 %v8263_v52  ;;  %v8269_v52 = vld [vmem:[#allocation106_spill] sm:$0xff] }
 0x54d   :  { %5444 = vmatpush1.bf16.msra.mxu0 %v8264_v25  ;;  %5476 = vmatpush1.bf16.msra.mxu1 %v8265_v42 }
 0x54e   :  { %5478 = vmatprep.subr.bf16.mxu0 %v8266_v39  ;;  %5510 = vmatprep.subr.bf16.mxu1 %v8267_v51 }
 0x5e3   :  { %v2401_v18 = vpop.f32.mrb[16].mxu0  ;;  %v2472_v23 = vpop.f32.mrb[16].mxu1 }
 0x5e4   :  { %v2477_v58 = vadd.f32 %v2401_v18, %v8268_v40  ;;  %v2403_v57 = vpop.f32.mrb[17].mxu0  ;;  %v2474_v5 = vpop.f32.mrb[17].mxu1  ;;  %v2479_v25 = vadd.f32 %v2472_v23, %v8269_v52 }
 0x5e5   :  { %v2478_v62 = vadd.f32 %v2403_v57, %v8154_v9  ;;  %v2480_v42 = vadd.f32 %v2474_v5, %v7025_v10 }
 0x5e6   :  { %v4562_v56 = vmul.f32 -1.442695, %v2477_v58  ;;  %v4564_v50 = vmul.f32 -1.442695, %v2479_v25 }
 0x5e7   :  { %v4563_v6 = vmul.f32 -1.442695, %v2478_v62 }
 0x5e8   :  { %6239 = vpow2.f32 %v4562_v56 }
 0x5e9   :  { %6241 = vpow2.f32 %v4563_v6 }
 0x5ea   :  { %6243 = vtanh.f32 %v2480_v42 }
 0x5eb   :  { %6245 = vpow2.f32 %v4564_v50 }
 0x5f2   :  { %v6240_v39 = vpop.eup %6239 }
 0x5f3   :  { %v2490_v46 = vadd.f32 1.0, %v6240_v39  ;;  %v6242_v51 = vpop.eup %6241 }
 0x5f4   :  { %v2491_v18 = vadd.f32 1.0, %v6242_v51  ;;  %v6244_v40 = vpop.eup %6243 }
 0x5f5   :  { %6247 = vrcp.f32 %v2490_v46  ;;  %v6246_v45 = vpop.eup %6245 }
 0x5f6   :  { %6249 = vrcp.f32 %v2491_v18  ;;  %v2492_v56 = vadd.f32 1.0, %v6246_v45  ;;  %v2506_v18 = vld [vmem:[#allocation2 + $0x4] ss:$8 sm:$0xf] }
 0x5f8   :  { %6251 = vrcp.f32 %v2492_v56 }
 0x5ff   :  { %v6248_v57 = vpop.eup %6247 }
 0x600   :  { %v2501_v58 = vmul.f32 %v6248_v57, %v6244_v40  ;;  %v6250_v62 = vpop.eup %6249 }
 0x601   :  { %v2500_v6 = vmul.f32 %v6250_v62, %v7263_v47 }
 0x602   :  { %v6252_v57 = vpop.eup %6251 }
 0x603   :  { %v2573_v23 = vpop.f32.mrb[18].mxu0  ;;  %v2644_v52 = vpop.f32.mrb[18].mxu1  ;;  %v7380_v5 = vadd.f32 %v2501_v58, %v2500_v6 }
 0x604   :  { %v2575_v25 = vpop.f32.mrb[19].mxu0  ;;  %v2646_v39 = vpop.f32.mrb[19].mxu1 }
 0x605   :  { %v2653_v42 = vcombine.low %v2573_v23, %v2575_v25  ;;  %v2654_v50 = vcombine.low %v2644_v52, %v2646_v39  ;;  %6253 = vtanh.f32 %v7380_v5 }
 0x607   :  { %v2661_v46 = vrot.slane %v2653_v42, %v6930_v63  ;;  %v2668_v51 = vrot.slane %v2654_v50, %v6930_v63 }
 0x609   :  { %v2669_v40 = vcombine.low %v2661_v46, %v2668_v51 }
 0x60b   :  { %v2676_v45 = vrot.slane %v2669_v40, %v6930_v63 }
 0x60d   :  { %v2678_v47 = vadd.f32 %v2676_v45, %v2506_v18  ;;  %v8270_v18 = vld [vmem:[#allocation19_spill] sm:$0xff] }
 0x60f   :  { %v4565_v62 = vmul.f32 -1.442695, %v2678_v47  ;;  %v6254_v58 = vpop.eup %6253  ;;  %v2686_v23 = vrot.slane %v2678_v47, 3  ;;  %v8271_v47 = vld [vmem:[#allocation20_spill] sm:$0xff] }
 0x610   :  { %v2504_v6 = vmul.f32 %v6254_v58, %v6252_v57  ;;  %v8272_v57 = vld [vmem:[#allocation21_spill] sm:$0xff]  ;;  %v8274_v58 = vld [vmem:[#allocation23_spill] sm:$0xff] }
 0x611   :  { %6255 = vpow2.f32 %v4565_v62  ;;  %v8273_v62 = vld [vmem:[#allocation22_spill] sm:$0xff] }
 0x612   :  { %2764 = vmatmul.mubr.f32.vlgmr.msra.gmra.mrb[20].mxu0 %v2504_v6  ;;  %2835 = vmatmul.mubr.f32.vlgmr.msra.gmra.mrb[20].mxu1 %v2504_v6  ;;  %v8275_v6 = vld [vmem:[#allocation24_spill] sm:$0xff] }
 0x613   :  { %5480 = vmatpush1.bf16.msra.mxu0 %v8099_v11  ;;  %5512 = vmatpush1.bf16.msra.mxu1 %v8100_v8 }
 0x614   :  { %5482 = vmatprep.subr.bf16.mxu0 %v8101_v60  ;;  %5514 = vmatprep.subr.bf16.mxu1 %v8102_v54 }
 0x615   :  { %2905 = vmatprep.mubr.f32.mxu0 %v8039_v44  ;;  %2976 = vmatprep.mubr.f32.mxu1 %v8039_v44 }
 0x617   :  { %5484 = vmatpush1.bf16.msra.mxu0 %v8103_v38  ;;  %5516 = vmatpush1.bf16.msra.mxu1 %v8156_v34 }
 0x618   :  { %5486 = vmatprep.subr.bf16.mxu0 %v8157_v2  ;;  %5518 = vmatprep.subr.bf16.mxu1 %v8158_v3 }
 0x61b   :  { %v6256_v52 = vpop.eup %6255  ;;  %5488 = vmatpush1.bf16.msra.mxu0 %v8159_v1  ;;  %5520 = vmatpush1.bf16.msra.mxu1 %v8213_v16 }
 0x61c   :  { %v2682_v56 = vadd.f32 1.0, %v6256_v52  ;;  %5490 = vmatprep.subr.bf16.mxu0 %v8214_v17  ;;  %5522 = vmatprep.subr.bf16.mxu1 %v8215_v32  ;;  %v8276_v52 = vld [vmem:[#allocation25_spill] sm:$0xff] }
 0x61e   :  { %6257 = vrcp.f32 %v2682_v56  ;;  %v8277_v56 = vld [vmem:[#allocation26_spill] sm:$0xff] }
 0x61f   :  { %6259 = vtanh.f32 %v2686_v23  ;;  %5492 = vmatpush1.bf16.msra.mxu0 %v8216_v22  ;;  %5524 = vmatpush1.bf16.msra.mxu1 %v8217_v13  ;;  %v8278_v23 = vld [vmem:[#allocation27_spill] sm:$0xff] }
 0x620   :  { %5494 = vmatprep.subr.bf16.mxu0 %v8218_v36  ;;  %5526 = vmatprep.subr.bf16.mxu1 %v8219_v31 }
 0x623   :  { %5496 = vmatpush1.bf16.msra.mxu0 %v8220_v7  ;;  %5528 = vmatpush1.bf16.msra.mxu1 %v8168_v4 }
 0x624   :  { %5498 = vmatprep.subr.bf16.mxu0 %v8169_v30  ;;  %5530 = vmatprep.subr.bf16.mxu1 %v8170_v43 }
 0x627   :  { %5500 = vmatpush1.bf16.msra.mxu0 %v8221_v35  ;;  %5532 = vmatpush1.bf16.msra.mxu1 %v8172_v55 }
 0x628   :  { %v6258_v25 = vpop.eup %6257  ;;  %5502 = vmatprep.subr.bf16.mxu0 %v8173_v48  ;;  %5534 = vmatprep.subr.bf16.mxu1 %v8174_v21 }
 0x629   :  { %v2690_v39 = vrot.slane %v6258_v25, 1  ;;  %v6260_v42 = vpop.eup %6259 }
 0x62a   :  { %v2693_v50 = vmul.f32 %v6260_v42, %v6258_v25  ;;  %v8281_v42 = vld [vmem:[#allocation30_spill] sm:$0xff] }
 0x62b   :  { %v2692_v46 = vmul.f32 %v2690_v39, %v7300_v14  ;;  %5504 = vmatpush1.bf16.msra.mxu0 %v8175_v59  ;;  %5536 = vmatpush1.bf16.msra.mxu1 %v8123_v27  ;;  %v2696_v14 = vrot.slane %v6258_v25, 2  ;;  %v8279_v25 = vld [vmem:[#allocation28_spill] sm:$0xff]  ;;  %v8280_v39 = vld [vmem:[#allocation29_spill] sm:$0xff] }
 0x62c   :  { %5506 = vmatprep.subr.bf16.mxu0 %v8124_v53  ;;  %5538 = vmatprep.subr.bf16.mxu1 %v8125_v0 }
 0x62d   :  { %v7417_v51 = vadd.f32 %v2693_v50, %v2692_v46  ;;  %v8282_v50 = vld [vmem:[#allocation31_spill] sm:$0xff]  ;;  %v8283_v46 = vld [vmem:[#allocation32_spill] sm:$0xff] }
 0x62f   :  { %6261 = vtanh.f32 %v7417_v51  ;;  %5508 = vmatpush1.bf16.msra.mxu0 %v8126_v26  ;;  %5540 = vmatpush1.bf16.msra.mxu1 %v8127_v12 }
 0x630   :  { %5542 = vmatprep.subr.bf16.mxu0 %v8128_v61  ;;  %5574 = vmatprep.subr.bf16.mxu1 %v8129_v49 }
 0x639   :  { %v6262_v40 = vpop.eup %6261 }
 0x63a   :  { %v2698_v45 = vmul.f32 %v6262_v40, %v2696_v14  ;;  %v8284_v14 = vld [vmem:[#allocation33_spill] sm:$0xff]  ;;  %v8285_v40 = vld [vmem:[#allocation34_spill] sm:$0xff] }
 0x63c   :  { %2906 = vmatmul.mubr.f32.vlgmr.msra.gmra.mrb[20].mxu0 %v2698_v45  ;;  %2977 = vmatmul.mubr.f32.vlgmr.msra.gmra.mrb[20].mxu1 %v2698_v45 }
 0x63d   :  { %5544 = vmatpush1.bf16.msra.mxu0 %v6616_v15  ;;  %5576 = vmatpush1.bf16.msra.mxu1 %v6622_v19 }
 0x63e   :  { %5546 = vmatprep.subr.bf16.mxu0 %v6624_v20  ;;  %5578 = vmatprep.subr.bf16.mxu1 %v6627_v24 }
 0x63f   :  { %3077 = vmatprep.mubr.f32.mxu0 %v8039_v44  ;;  %3148 = vmatprep.mubr.f32.mxu1 %v8039_v44 }
 0x641   :  { %5548 = vmatpush1.bf16.msra.mxu0 %v6631_v28  ;;  %5580 = vmatpush1.bf16.msra.mxu1 %v6633_v29 }
 0x642   :  { %5550 = vmatprep.subr.bf16.mxu0 %v6636_v33  ;;  %5582 = vmatprep.subr.bf16.mxu1 %v6638_v37 }
 0x645   :  { %5552 = vmatpush1.bf16.msra.mxu0 %v6641_v41  ;;  %5584 = vmatpush1.bf16.msra.mxu1 %v8270_v18 }
 0x646   :  { %5554 = vmatprep.subr.bf16.mxu0 %v8271_v47  ;;  %5586 = vmatprep.subr.bf16.mxu1 %v8272_v57 }
 0x649   :  { %5556 = vmatpush1.bf16.msra.mxu0 %v8273_v62  ;;  %5588 = vmatpush1.bf16.msra.mxu1 %v8274_v58 }
 0x64a   :  { %5558 = vmatprep.subr.bf16.mxu0 %v8275_v6  ;;  %5590 = vmatprep.subr.bf16.mxu1 %v8276_v52  ;;  %v8286_v6 = vld [vmem:[#allocation35_spill] sm:$0xff]  ;;  %v8287_v52 = vld [vmem:[#allocation36_spill] sm:$0xff] }
 0x64d   :  { %5560 = vmatpush1.bf16.msra.mxu0 %v8277_v56  ;;  %5592 = vmatpush1.bf16.msra.mxu1 %v8278_v23  ;;  %v8288_v56 = vld [vmem:[#allocation37_spill] sm:$0xff]  ;;  %v8289_v23 = vld [vmem:[#allocation38_spill] sm:$0xff] }
 0x64e   :  { %5562 = vmatprep.subr.bf16.mxu0 %v8279_v25  ;;  %5594 = vmatprep.subr.bf16.mxu1 %v8280_v39  ;;  %v8290_v25 = vld [vmem:[#allocation39_spill] sm:$0xff]  ;;  %v8291_v39 = vld [vmem:[#allocation40_spill] sm:$0xff] }
 0x651   :  { %5564 = vmatpush1.bf16.msra.mxu0 %v8281_v42  ;;  %5596 = vmatpush1.bf16.msra.mxu1 %v8282_v50  ;;  %v8292_v42 = vld [vmem:[#allocation41_spill] sm:$0xff]  ;;  %v8325_v50 = vld [vmem:[#allocation104_spill] sm:$0xff] }
 0x652   :  { %5566 = vmatprep.subr.bf16.mxu0 %v8283_v46  ;;  %5598 = vmatprep.subr.bf16.mxu1 %v8284_v14  ;;  %v8293_v46 = vld [vmem:[#allocation42_spill] sm:$0xff]  ;;  %v8294_v14 = vld [vmem:[#allocation43_spill] sm:$0xff] }
 0x655   :  { %5568 = vmatpush1.bf16.msra.mxu0 %v8285_v40  ;;  %5600 = vmatpush1.bf16.msra.mxu1 %v8286_v6  ;;  %v8295_v40 = vld [vmem:[#allocation44_spill] sm:$0xff]  ;;  %v8296_v6 = vld [vmem:[#allocation45_spill] sm:$0xff] }
 0x656   :  { %5570 = vmatprep.subr.bf16.mxu0 %v8287_v52  ;;  %5602 = vmatprep.subr.bf16.mxu1 %v8288_v56  ;;  %v8306_v56 = vld [vmem:[#allocation55_spill] sm:$0xff]  ;;  %v8307_v52 = vld [vmem:[#allocation56_spill] sm:$0xff] }
 0x659   :  { %5572 = vmatpush1.bf16.msra.mxu0 %v8289_v23  ;;  %5604 = vmatpush1.bf16.msra.mxu1 %v8290_v25  ;;  %v8297_v23 = vld [vmem:[#allocation46_spill] sm:$0xff]  ;;  %v8298_v25 = vld [vmem:[#allocation47_spill] sm:$0xff] }
 0x65a   :  { %5606 = vmatprep.subr.bf16.mxu0 %v8291_v39  ;;  %5638 = vmatprep.subr.bf16.mxu1 %v8292_v42  ;;  %v8299_v39 = vld [vmem:[#allocation48_spill] sm:$0xff]  ;;  %v8300_v42 = vld [vmem:[#allocation49_spill] sm:$0xff] }
 0x65c   :  { %3078 = vmatmul.mubr.f32.vlgmr.msra.gmra.mrb[22].mxu0 %v2698_v45  ;;  %3149 = vmatmul.mubr.f32.vlgmr.msra.gmra.mrb[22].mxu1 %v2698_v45  ;;  %v8301_v45 = vld [vmem:[#allocation50_spill] sm:$0xff] }
 0x65d   :  { %5608 = vmatpush1.bf16.msra.mxu0 %v8293_v46  ;;  %5640 = vmatpush1.bf16.msra.mxu1 %v8294_v14  ;;  %v8302_v46 = vld [vmem:[#allocation51_spill] sm:$0xff]  ;;  %v8303_v14 = vld [vmem:[#allocation52_spill] sm:$0xff] }
 0x65e   :  { %5610 = vmatprep.subr.bf16.mxu0 %v8295_v40  ;;  %5642 = vmatprep.subr.bf16.mxu1 %v8296_v6  ;;  %v8304_v40 = vld [vmem:[#allocation53_spill] sm:$0xff]  ;;  %v8305_v6 = vld [vmem:[#allocation54_spill] sm:$0xff] }
 0x65f   :  { %3269 = vmatprep.mubr.f32.mxu0 %v8039_v44  ;;  %3340 = vmatprep.mubr.f32.mxu1 %v8039_v44 }
 0x661   :  { %5612 = vmatpush1.bf16.msra.mxu0 %v8297_v23  ;;  %5644 = vmatpush1.bf16.msra.mxu1 %v8298_v25  ;;  %v8308_v23 = vld [vmem:[#allocation57_spill] sm:$0xff]  ;;  %v8309_v25 = vld [vmem:[#allocation58_spill] sm:$0xff] }
 0x662   :  { %5614 = vmatprep.subr.bf16.mxu0 %v8299_v39  ;;  %5646 = vmatprep.subr.bf16.mxu1 %v8300_v42  ;;  %v8310_v39 = vld [vmem:[#allocation59_spill] sm:$0xff]  ;;  %v8311_v42 = vld [vmem:[#allocation60_spill] sm:$0xff] }
 0x665   :  { %5616 = vmatpush1.bf16.msra.mxu0 %v8301_v45  ;;  %5648 = vmatpush1.bf16.msra.mxu1 %v8302_v46  ;;  %v8312_v45 = vld [vmem:[#allocation61_spill] sm:$0xff]  ;;  %v8313_v46 = vld [vmem:[#allocation62_spill] sm:$0xff] }
 0x666   :  { %5618 = vmatprep.subr.bf16.mxu0 %v8303_v14  ;;  %5650 = vmatprep.subr.bf16.mxu1 %v8304_v40  ;;  %v8314_v14 = vld [vmem:[#allocation63_spill] sm:$0xff]  ;;  %v8315_v40 = vld [vmem:[#allocation64_spill] sm:$0xff] }
 0x669   :  { %5620 = vmatpush1.bf16.msra.mxu0 %v8305_v6  ;;  %5652 = vmatpush1.bf16.msra.mxu1 %v8306_v56  ;;  %v8316_v6 = vld [vmem:[#allocation65_spill] sm:$0xff]  ;;  %v8317_v56 = vld [vmem:[#allocation66_spill] sm:$0xff] }
 0x66a   :  { %5622 = vmatprep.subr.bf16.mxu0 %v8307_v52  ;;  %5654 = vmatprep.subr.bf16.mxu1 %v8308_v23  ;;  %v8318_v52 = vld [vmem:[#allocation67_spill] sm:$0xff]  ;;  %v8319_v23 = vld [vmem:[#allocation68_spill] sm:$0xff] }
 0x66d   :  { %5624 = vmatpush1.bf16.msra.mxu0 %v8309_v25  ;;  %5656 = vmatpush1.bf16.msra.mxu1 %v8310_v39  ;;  %v8320_v25 = vld [vmem:[#allocation69_spill] sm:$0xff]  ;;  %v8321_v39 = vld [vmem:[#allocation70_spill] sm:$0xff] }
 0x66e   :  { %5626 = vmatprep.subr.bf16.mxu0 %v8311_v42  ;;  %5658 = vmatprep.subr.bf16.mxu1 %v8312_v45  ;;  %v8322_v42 = vld [vmem:[#allocation71_spill] sm:$0xff]  ;;  %v8323_v45 = vld [vmem:[#allocation72_spill] sm:$0xff] }
 0x671   :  { %5628 = vmatpush1.bf16.msra.mxu0 %v8313_v46  ;;  %5660 = vmatpush1.bf16.msra.mxu1 %v8314_v14  ;;  %v8324_v46 = vld [vmem:[#allocation73_spill] sm:$0xff] }
 0x672   :  { %5630 = vmatprep.subr.bf16.mxu0 %v8315_v40  ;;  %5662 = vmatprep.subr.bf16.mxu1 %v8316_v6 }
 0x675   :  { %5632 = vmatpush1.bf16.msra.mxu0 %v8317_v56  ;;  %5664 = vmatpush1.bf16.msra.mxu1 %v8318_v52 }
 0x676   :  { %5634 = vmatprep.subr.bf16.mxu0 %v8319_v23  ;;  %5666 = vmatprep.subr.bf16.mxu1 %v8320_v25  ;;  %v8326_v25 = vld [vmem:[#allocation106_spill] sm:$0xff] }
 0x679   :  { %5636 = vmatpush1.bf16.msra.mxu0 %v8321_v39  ;;  %5668 = vmatpush1.bf16.msra.mxu1 %v8322_v42 }
 0x67a   :  { %5670 = vmatprep.subr.bf16.mxu0 %v8323_v45  ;;  %5702 = vmatprep.subr.bf16.mxu1 %v8324_v46 }
 0x70f   :  { %v2907_v14 = vpop.f32.mrb[20].mxu0  ;;  %v2978_v40 = vpop.f32.mrb[20].mxu1 }
 0x710   :  { %v2983_v6 = vadd.f32 %v2907_v14, %v8325_v50  ;;  %v2909_v58 = vpop.f32.mrb[21].mxu0  ;;  %v2980_v56 = vpop.f32.mrb[21].mxu1  ;;  %v2985_v39 = vadd.f32 %v2978_v40, %v8326_v25 }
 0x711   :  { %v2984_v52 = vadd.f32 %v2909_v58, %v8154_v9  ;;  %v2986_v42 = vadd.f32 %v2980_v56, %v7025_v10 }
 0x712   :  { %v4566_v62 = vmul.f32 -1.442695, %v2983_v6  ;;  %v4568_v57 = vmul.f32 -1.442695, %v2985_v39 }
 0x713   :  { %v4567_v23 = vmul.f32 -1.442695, %v2984_v52 }
 0x714   :  { %6263 = vpow2.f32 %v4566_v62 }
 0x715   :  { %6265 = vpow2.f32 %v4567_v23 }
 0x716   :  { %6267 = vtanh.f32 %v2986_v42 }
 0x717   :  { %6269 = vpow2.f32 %v4568_v57 }
 0x71e   :  { %v6264_v45 = vpop.eup %6263 }
 0x71f   :  { %v2996_v47 = vadd.f32 1.0, %v6264_v45  ;;  %v6266_v46 = vpop.eup %6265 }
 0x720   :  { %v2997_v14 = vadd.f32 1.0, %v6266_v46  ;;  %v6268_v50 = vpop.eup %6267 }
 0x721   :  { %6271 = vrcp.f32 %v2996_v47  ;;  %v6270_v18 = vpop.eup %6269 }
 0x722   :  { %6273 = vrcp.f32 %v2997_v14  ;;  %v2998_v62 = vadd.f32 1.0, %v6270_v18  ;;  %v3012_v14 = vld [vmem:[#allocation2 + $0x5] ss:$8 sm:$0xf] }
 0x724   :  { %6275 = vrcp.f32 %v2998_v62 }
 0x72b   :  { %v6272_v58 = vpop.eup %6271 }
 0x72c   :  { %v3007_v6 = vmul.f32 %v6272_v58, %v6268_v50  ;;  %v6274_v52 = vpop.eup %6273 }
 0x72d   :  { %v3006_v23 = vmul.f32 %v6274_v52, %v7380_v5 }
 0x72e   :  { %v6276_v58 = vpop.eup %6275 }
 0x72f   :  { %v3079_v40 = vpop.f32.mrb[22].mxu0  ;;  %v3150_v25 = vpop.f32.mrb[22].mxu1  ;;  %v7497_v56 = vadd.f32 %v3007_v6, %v3006_v23 }
 0x730   :  { %v3081_v39 = vpop.f32.mrb[23].mxu0  ;;  %v3152_v45 = vpop.f32.mrb[23].mxu1 }
 0x731   :  { %v3159_v42 = vcombine.low %v3079_v40, %v3081_v39  ;;  %v3160_v57 = vcombine.low %v3150_v25, %v3152_v45  ;;  %6277 = vtanh.f32 %v7497_v56 }
 0x733   :  { %v3167_v47 = vrot.slane %v3159_v42, %v6930_v63  ;;  %v3174_v46 = vrot.slane %v3160_v57, %v6930_v63 }
 0x735   :  { %v3175_v50 = vcombine.low %v3167_v47, %v3174_v46 }
 0x737   :  { %v3182_v18 = vrot.slane %v3175_v50, %v6930_v63 }
 0x739   :  { %v3184_v5 = vadd.f32 %v3182_v18, %v3012_v14  ;;  %v8327_v14 = vld [vmem:[#allocation19_spill] sm:$0xff] }
 0x73b   :  { %v4569_v52 = vmul.f32 -1.442695, %v3184_v5  ;;  %v6278_v6 = vpop.eup %6277  ;;  %v3192_v40 = vrot.slane %v3184_v5, 3  ;;  %v8328_v5 = vld [vmem:[#allocation20_spill] sm:$0xff] }
 0x73c   :  { %v3010_v23 = vmul.f32 %v6278_v6, %v6276_v58  ;;  %v8329_v58 = vld [vmem:[#allocation21_spill] sm:$0xff]  ;;  %v8331_v6 = vld [vmem:[#allocation23_spill] sm:$0xff] }
 0x73d   :  { %6279 = vpow2.f32 %v4569_v52  ;;  %v8330_v52 = vld [vmem:[#allocation22_spill] sm:$0xff] }
 0x73e   :  { %3270 = vmatmul.mubr.f32.vlgmr.msra.gmra.mrb[24].mxu0 %v3010_v23  ;;  %3341 = vmatmul.mubr.f32.vlgmr.msra.gmra.mrb[24].mxu1 %v3010_v23  ;;  %v8332_v23 = vld [vmem:[#allocation24_spill] sm:$0xff] }
 0x73f   :  { %5672 = vmatpush1.bf16.msra.mxu0 %v8099_v11  ;;  %5704 = vmatpush1.bf16.msra.mxu1 %v8100_v8 }
 0x740   :  { %5674 = vmatprep.subr.bf16.mxu0 %v8101_v60  ;;  %5706 = vmatprep.subr.bf16.mxu1 %v8102_v54 }
 0x741   :  { %3411 = vmatprep.mubr.f32.mxu0 %v8039_v44  ;;  %3482 = vmatprep.mubr.f32.mxu1 %v8039_v44 }
 0x743   :  { %5676 = vmatpush1.bf16.msra.mxu0 %v8103_v38  ;;  %5708 = vmatpush1.bf16.msra.mxu1 %v8156_v34 }
 0x744   :  { %5678 = vmatprep.subr.bf16.mxu0 %v8157_v2  ;;  %5710 = vmatprep.subr.bf16.mxu1 %v8158_v3 }
 0x747   :  { %v6280_v25 = vpop.eup %6279  ;;  %5680 = vmatpush1.bf16.msra.mxu0 %v8159_v1  ;;  %5712 = vmatpush1.bf16.msra.mxu1 %v8213_v16 }
 0x748   :  { %v3188_v62 = vadd.f32 1.0, %v6280_v25  ;;  %5682 = vmatprep.subr.bf16.mxu0 %v8214_v17  ;;  %5714 = vmatprep.subr.bf16.mxu1 %v8215_v32  ;;  %v8333_v25 = vld [vmem:[#allocation25_spill] sm:$0xff] }
 0x74a   :  { %6281 = vrcp.f32 %v3188_v62  ;;  %v8334_v62 = vld [vmem:[#allocation26_spill] sm:$0xff] }
 0x74b   :  { %6283 = vtanh.f32 %v3192_v40  ;;  %5684 = vmatpush1.bf16.msra.mxu0 %v8216_v22  ;;  %5716 = vmatpush1.bf16.msra.mxu1 %v8217_v13  ;;  %v8335_v40 = vld [vmem:[#allocation27_spill] sm:$0xff] }
 0x74c   :  { %5686 = vmatprep.subr.bf16.mxu0 %v8218_v36  ;;  %5718 = vmatprep.subr.bf16.mxu1 %v8219_v31 }
 0x74f   :  { %5688 = vmatpush1.bf16.msra.mxu0 %v8220_v7  ;;  %5720 = vmatpush1.bf16.msra.mxu1 %v8168_v4 }
 0x750   :  { %5690 = vmatprep.subr.bf16.mxu0 %v8169_v30  ;;  %5722 = vmatprep.subr.bf16.mxu1 %v8170_v43 }
 0x753   :  { %5692 = vmatpush1.bf16.msra.mxu0 %v8221_v35  ;;  %5724 = vmatpush1.bf16.msra.mxu1 %v8172_v55 }
 0x754   :  { %v6282_v39 = vpop.eup %6281  ;;  %5694 = vmatprep.subr.bf16.mxu0 %v8173_v48  ;;  %5726 = vmatprep.subr.bf16.mxu1 %v8174_v21 }
 0x755   :  { %v3196_v45 = vrot.slane %v6282_v39, 1  ;;  %v6284_v42 = vpop.eup %6283 }
 0x756   :  { %v3199_v57 = vmul.f32 %v6284_v42, %v6282_v39  ;;  %v8338_v42 = vld [vmem:[#allocation30_spill] sm:$0xff] }
 0x757   :  { %v3198_v47 = vmul.f32 %v3196_v45, %v7417_v51  ;;  %5696 = vmatpush1.bf16.msra.mxu0 %v8175_v59  ;;  %5728 = vmatpush1.bf16.msra.mxu1 %v8123_v27  ;;  %v3202_v51 = vrot.slane %v6282_v39, 2  ;;  %v8336_v39 = vld [vmem:[#allocation28_spill] sm:$0xff]  ;;  %v8337_v45 = vld [vmem:[#allocation29_spill] sm:$0xff] }
 0x758   :  { %5698 = vmatprep.subr.bf16.mxu0 %v8124_v53  ;;  %5730 = vmatprep.subr.bf16.mxu1 %v8125_v0 }
 0x759   :  { %v7534_v46 = vadd.f32 %v3199_v57, %v3198_v47  ;;  %v8339_v57 = vld [vmem:[#allocation31_spill] sm:$0xff]  ;;  %v8340_v47 = vld [vmem:[#allocation32_spill] sm:$0xff] }
 0x75b   :  { %6285 = vtanh.f32 %v7534_v46  ;;  %5700 = vmatpush1.bf16.msra.mxu0 %v8126_v26  ;;  %5732 = vmatpush1.bf16.msra.mxu1 %v8127_v12 }
 0x75c   :  { %5734 = vmatprep.subr.bf16.mxu0 %v8128_v61  ;;  %5766 = vmatprep.subr.bf16.mxu1 %v8129_v49 }
 0x765   :  { %v6286_v50 = vpop.eup %6285 }
 0x766   :  { %v3204_v18 = vmul.f32 %v6286_v50, %v3202_v51  ;;  %v8341_v51 = vld [vmem:[#allocation33_spill] sm:$0xff]  ;;  %v8342_v50 = vld [vmem:[#allocation34_spill] sm:$0xff] }
 0x768   :  { %3412 = vmatmul.mubr.f32.vlgmr.msra.gmra.mrb[24].mxu0 %v3204_v18  ;;  %3483 = vmatmul.mubr.f32.vlgmr.msra.gmra.mrb[24].mxu1 %v3204_v18 }
 0x769   :  { %5736 = vmatpush1.bf16.msra.mxu0 %v6616_v15  ;;  %5768 = vmatpush1.bf16.msra.mxu1 %v6622_v19 }
 0x76a   :  { %5738 = vmatprep.subr.bf16.mxu0 %v6624_v20  ;;  %5770 = vmatprep.subr.bf16.mxu1 %v6627_v24 }
 0x76b   :  { %3583 = vmatprep.mubr.f32.mxu0 %v8039_v44  ;;  %3654 = vmatprep.mubr.f32.mxu1 %v8039_v44 }
 0x76d   :  { %5740 = vmatpush1.bf16.msra.mxu0 %v6631_v28  ;;  %5772 = vmatpush1.bf16.msra.mxu1 %v6633_v29 }
 0x76e   :  { %5742 = vmatprep.subr.bf16.mxu0 %v6636_v33  ;;  %5774 = vmatprep.subr.bf16.mxu1 %v6638_v37 }
 0x771   :  { %5744 = vmatpush1.bf16.msra.mxu0 %v6641_v41  ;;  %5776 = vmatpush1.bf16.msra.mxu1 %v8327_v14 }
 0x772   :  { %5746 = vmatprep.subr.bf16.mxu0 %v8328_v5  ;;  %5778 = vmatprep.subr.bf16.mxu1 %v8329_v58 }
 0x775   :  { %5748 = vmatpush1.bf16.msra.mxu0 %v8330_v52  ;;  %5780 = vmatpush1.bf16.msra.mxu1 %v8331_v6 }
 0x776   :  { %5750 = vmatprep.subr.bf16.mxu0 %v8332_v23  ;;  %5782 = vmatprep.subr.bf16.mxu1 %v8333_v25  ;;  %v8343_v23 = vld [vmem:[#allocation35_spill] sm:$0xff]  ;;  %v8344_v25 = vld [vmem:[#allocation36_spill] sm:$0xff] }
 0x779   :  { %5752 = vmatpush1.bf16.msra.mxu0 %v8334_v62  ;;  %5784 = vmatpush1.bf16.msra.mxu1 %v8335_v40  ;;  %v8345_v62 = vld [vmem:[#allocation37_spill] sm:$0xff]  ;;  %v8346_v40 = vld [vmem:[#allocation38_spill] sm:$0xff] }
 0x77a   :  { %5754 = vmatprep.subr.bf16.mxu0 %v8336_v39  ;;  %5786 = vmatprep.subr.bf16.mxu1 %v8337_v45  ;;  %v8347_v39 = vld [vmem:[#allocation39_spill] sm:$0xff]  ;;  %v8348_v45 = vld [vmem:[#allocation40_spill] sm:$0xff] }
 0x77d   :  { %5756 = vmatpush1.bf16.msra.mxu0 %v8338_v42  ;;  %5788 = vmatpush1.bf16.msra.mxu1 %v8339_v57  ;;  %v8349_v42 = vld [vmem:[#allocation41_spill] sm:$0xff]  ;;  %v8382_v57 = vld [vmem:[#allocation104_spill] sm:$0xff] }
 0x77e   :  { %5758 = vmatprep.subr.bf16.mxu0 %v8340_v47  ;;  %5790 = vmatprep.subr.bf16.mxu1 %v8341_v51  ;;  %v8350_v47 = vld [vmem:[#allocation42_spill] sm:$0xff]  ;;  %v8351_v51 = vld [vmem:[#allocation43_spill] sm:$0xff] }
 0x781   :  { %5760 = vmatpush1.bf16.msra.mxu0 %v8342_v50  ;;  %5792 = vmatpush1.bf16.msra.mxu1 %v8343_v23  ;;  %v8352_v50 = vld [vmem:[#allocation44_spill] sm:$0xff]  ;;  %v8353_v23 = vld [vmem:[#allocation45_spill] sm:$0xff] }
 0x782   :  { %5762 = vmatprep.subr.bf16.mxu0 %v8344_v25  ;;  %5794 = vmatprep.subr.bf16.mxu1 %v8345_v62  ;;  %v8363_v62 = vld [vmem:[#allocation55_spill] sm:$0xff]  ;;  %v8364_v25 = vld [vmem:[#allocation56_spill] sm:$0xff] }
 0x785   :  { %5764 = vmatpush1.bf16.msra.mxu0 %v8346_v40  ;;  %5796 = vmatpush1.bf16.msra.mxu1 %v8347_v39  ;;  %v8354_v40 = vld [vmem:[#allocation46_spill] sm:$0xff]  ;;  %v8355_v39 = vld [vmem:[#allocation47_spill] sm:$0xff] }
 0x786   :  { %5798 = vmatprep.subr.bf16.mxu0 %v8348_v45  ;;  %5830 = vmatprep.subr.bf16.mxu1 %v8349_v42  ;;  %v8356_v45 = vld [vmem:[#allocation48_spill] sm:$0xff]  ;;  %v8357_v42 = vld [vmem:[#allocation49_spill] sm:$0xff] }
 0x788   :  { %3584 = vmatmul.mubr.f32.vlgmr.msra.gmra.mrb[26].mxu0 %v3204_v18  ;;  %3655 = vmatmul.mubr.f32.vlgmr.msra.gmra.mrb[26].mxu1 %v3204_v18  ;;  %v8358_v18 = vld [vmem:[#allocation50_spill] sm:$0xff] }
 0x789   :  { %5800 = vmatpush1.bf16.msra.mxu0 %v8350_v47  ;;  %5832 = vmatpush1.bf16.msra.mxu1 %v8351_v51  ;;  %v8359_v47 = vld [vmem:[#allocation51_spill] sm:$0xff]  ;;  %v8360_v51 = vld [vmem:[#allocation52_spill] sm:$0xff] }
 0x78a   :  { %5802 = vmatprep.subr.bf16.mxu0 %v8352_v50  ;;  %5834 = vmatprep.subr.bf16.mxu1 %v8353_v23  ;;  %v8361_v50 = vld [vmem:[#allocation53_spill] sm:$0xff]  ;;  %v8362_v23 = vld [vmem:[#allocation54_spill] sm:$0xff] }
 0x78b   :  { %3775 = vmatprep.mubr.f32.mxu0 %v8039_v44  ;;  %3846 = vmatprep.mubr.f32.mxu1 %v8039_v44 }
 0x78d   :  { %5804 = vmatpush1.bf16.msra.mxu0 %v8354_v40  ;;  %5836 = vmatpush1.bf16.msra.mxu1 %v8355_v39  ;;  %v8365_v40 = vld [vmem:[#allocation57_spill] sm:$0xff]  ;;  %v8366_v39 = vld [vmem:[#allocation58_spill] sm:$0xff] }
 0x78e   :  { %5806 = vmatprep.subr.bf16.mxu0 %v8356_v45  ;;  %5838 = vmatprep.subr.bf16.mxu1 %v8357_v42  ;;  %v8367_v45 = vld [vmem:[#allocation59_spill] sm:$0xff]  ;;  %v8368_v42 = vld [vmem:[#allocation60_spill] sm:$0xff] }
 0x791   :  { %5808 = vmatpush1.bf16.msra.mxu0 %v8358_v18  ;;  %5840 = vmatpush1.bf16.msra.mxu1 %v8359_v47  ;;  %v8369_v18 = vld [vmem:[#allocation61_spill] sm:$0xff]  ;;  %v8370_v47 = vld [vmem:[#allocation62_spill] sm:$0xff] }
 0x792   :  { %5810 = vmatprep.subr.bf16.mxu0 %v8360_v51  ;;  %5842 = vmatprep.subr.bf16.mxu1 %v8361_v50  ;;  %v8371_v51 = vld [vmem:[#allocation63_spill] sm:$0xff]  ;;  %v8372_v50 = vld [vmem:[#allocation64_spill] sm:$0xff] }
 0x795   :  { %5812 = vmatpush1.bf16.msra.mxu0 %v8362_v23  ;;  %5844 = vmatpush1.bf16.msra.mxu1 %v8363_v62  ;;  %v8373_v23 = vld [vmem:[#allocation65_spill] sm:$0xff]  ;;  %v8374_v62 = vld [vmem:[#allocation66_spill] sm:$0xff] }
 0x796   :  { %5814 = vmatprep.subr.bf16.mxu0 %v8364_v25  ;;  %5846 = vmatprep.subr.bf16.mxu1 %v8365_v40  ;;  %v8375_v25 = vld [vmem:[#allocation67_spill] sm:$0xff]  ;;  %v8376_v40 = vld [vmem:[#allocation68_spill] sm:$0xff] }
 0x799   :  { %5816 = vmatpush1.bf16.msra.mxu0 %v8366_v39  ;;  %5848 = vmatpush1.bf16.msra.mxu1 %v8367_v45  ;;  %v8377_v39 = vld [vmem:[#allocation69_spill] sm:$0xff]  ;;  %v8378_v45 = vld [vmem:[#allocation70_spill] sm:$0xff] }
 0x79a   :  { %5818 = vmatprep.subr.bf16.mxu0 %v8368_v42  ;;  %5850 = vmatprep.subr.bf16.mxu1 %v8369_v18  ;;  %v8379_v42 = vld [vmem:[#allocation71_spill] sm:$0xff]  ;;  %v8380_v18 = vld [vmem:[#allocation72_spill] sm:$0xff] }
 0x79d   :  { %5820 = vmatpush1.bf16.msra.mxu0 %v8370_v47  ;;  %5852 = vmatpush1.bf16.msra.mxu1 %v8371_v51  ;;  %v8381_v47 = vld [vmem:[#allocation73_spill] sm:$0xff] }
 0x79e   :  { %5822 = vmatprep.subr.bf16.mxu0 %v8372_v50  ;;  %5854 = vmatprep.subr.bf16.mxu1 %v8373_v23 }
 0x7a1   :  { %5824 = vmatpush1.bf16.msra.mxu0 %v8374_v62  ;;  %5856 = vmatpush1.bf16.msra.mxu1 %v8375_v25 }
 0x7a2   :  { %5826 = vmatprep.subr.bf16.mxu0 %v8376_v40  ;;  %5858 = vmatprep.subr.bf16.mxu1 %v8377_v39  ;;  %v8383_v39 = vld [vmem:[#allocation106_spill] sm:$0xff] }
 0x7a5   :  { %5828 = vmatpush1.bf16.msra.mxu0 %v8378_v45  ;;  %5860 = vmatpush1.bf16.msra.mxu1 %v8379_v42 }
 0x7a6   :  { %5862 = vmatprep.subr.bf16.mxu0 %v8380_v18  ;;  %5894 = vmatprep.subr.bf16.mxu1 %v8381_v47 }
 0x83b   :  { %v3413_v51 = vpop.f32.mrb[24].mxu0  ;;  %v3484_v50 = vpop.f32.mrb[24].mxu1 }
 0x83c   :  { %v3489_v23 = vadd.f32 %v3413_v51, %v8382_v57  ;;  %v3415_v6 = vpop.f32.mrb[25].mxu0  ;;  %v3486_v62 = vpop.f32.mrb[25].mxu1  ;;  %v3491_v45 = vadd.f32 %v3484_v50, %v8383_v39 }
 0x83d   :  { %v3490_v25 = vadd.f32 %v3415_v6, %v8154_v9  ;;  %v3492_v42 = vadd.f32 %v3486_v62, %v7025_v10 }
 0x83e   :  { %v4570_v52 = vmul.f32 -1.442695, %v3489_v23  ;;  %v4572_v58 = vmul.f32 -1.442695, %v3491_v45 }
 0x83f   :  { %v4571_v40 = vmul.f32 -1.442695, %v3490_v25 }
 0x840   :  { %6287 = vpow2.f32 %v4570_v52 }
 0x841   :  { %6289 = vpow2.f32 %v4571_v40 }
 0x842   :  { %6291 = vtanh.f32 %v3492_v42 }
 0x843   :  { %6293 = vpow2.f32 %v4572_v58 }
 0x84a   :  { %v6288_v18 = vpop.eup %6287 }
 0x84b   :  { %v3502_v5 = vadd.f32 1.0, %v6288_v18  ;;  %v6290_v47 = vpop.eup %6289 }
 0x84c   :  { %v3503_v51 = vadd.f32 1.0, %v6290_v47  ;;  %v6292_v57 = vpop.eup %6291 }
 0x84d   :  { %6295 = vrcp.f32 %v3502_v5  ;;  %v6294_v14 = vpop.eup %6293 }
 0x84e   :  { %6297 = vrcp.f32 %v3503_v51  ;;  %v3504_v52 = vadd.f32 1.0, %v6294_v14  ;;  %v3518_v51 = vld [vmem:[#allocation2 + $0x6] ss:$8 sm:$0xf] }
 0x850   :  { %6299 = vrcp.f32 %v3504_v52 }
 0x857   :  { %v6296_v6 = vpop.eup %6295 }
 0x858   :  { %v3513_v23 = vmul.f32 %v6296_v6, %v6292_v57  ;;  %v6298_v25 = vpop.eup %6297 }
 0x859   :  { %v3512_v40 = vmul.f32 %v6298_v25, %v7497_v56 }
 0x85a   :  { %v6300_v6 = vpop.eup %6299 }
 0x85b   :  { %v3585_v50 = vpop.f32.mrb[26].mxu0  ;;  %v3656_v39 = vpop.f32.mrb[26].mxu1  ;;  %v7614_v62 = vadd.f32 %v3513_v23, %v3512_v40 }
 0x85c   :  { %v3587_v45 = vpop.f32.mrb[27].mxu0  ;;  %v3658_v18 = vpop.f32.mrb[27].mxu1 }
 0x85d   :  { %v3665_v42 = vcombine.low %v3585_v50, %v3587_v45  ;;  %v3666_v58 = vcombine.low %v3656_v39, %v3658_v18  ;;  %6301 = vtanh.f32 %v7614_v62 }
 0x85f   :  { %v3673_v5 = vrot.slane %v3665_v42, %v6930_v63  ;;  %v3680_v47 = vrot.slane %v3666_v58, %v6930_v63 }
 0x861   :  { %v3681_v57 = vcombine.low %v3673_v5, %v3680_v47 }
 0x863   :  { %v3688_v14 = vrot.slane %v3681_v57, %v6930_v63 }
 0x865   :  { %v3690_v56 = vadd.f32 %v3688_v14, %v3518_v51  ;;  %v8395_v51 = vld [vmem:[#allocation30_spill] sm:$0xff] }
 0x867   :  { %v4573_v25 = vmul.f32 -1.442695, %v3690_v56  ;;  %v6302_v23 = vpop.eup %6301  ;;  %v3698_v50 = vrot.slane %v3690_v56, 3  ;;  %v8396_v56 = vld [vmem:[#allocation31_spill] sm:$0xff] }
 0x868   :  { %v3516_v40 = vmul.f32 %v6302_v23, %v6300_v6  ;;  %v8397_v6 = vld [vmem:[#allocation32_spill] sm:$0xff]  ;;  %v8399_v23 = vld [vmem:[#allocation34_spill] sm:$0xff] }
 0x869   :  { %6303 = vpow2.f32 %v4573_v25  ;;  %v8398_v25 = vld [vmem:[#allocation33_spill] sm:$0xff] }
 0x86a   :  { %3776 = vmatmul.mubr.f32.vlgmr.msra.gmra.mrb[28].mxu0 %v3516_v40  ;;  %3847 = vmatmul.mubr.f32.vlgmr.msra.gmra.mrb[28].mxu1 %v3516_v40  ;;  %v8400_v40 = vld [vmem:[#allocation35_spill] sm:$0xff] }
 0x86b   :  { %5864 = vmatpush1.bf16.msra.mxu0 %v8099_v11  ;;  %5896 = vmatpush1.bf16.msra.mxu1 %v8100_v8 }
 0x86c   :  { %5866 = vmatprep.subr.bf16.mxu0 %v8101_v60  ;;  %5898 = vmatprep.subr.bf16.mxu1 %v8102_v54 }
 0x86d   :  { %3917 = vmatprep.mubr.f32.mxu0 %v8039_v44  ;;  %3988 = vmatprep.mubr.f32.mxu1 %v8039_v44 }
 0x86f   :  { %5868 = vmatpush1.bf16.msra.mxu0 %v8103_v38  ;;  %5900 = vmatpush1.bf16.msra.mxu1 %v8156_v34 }
 0x870   :  { %5870 = vmatprep.subr.bf16.mxu0 %v8157_v2  ;;  %5902 = vmatprep.subr.bf16.mxu1 %v8158_v3 }
 0x873   :  { %v6304_v39 = vpop.eup %6303  ;;  %5872 = vmatpush1.bf16.msra.mxu0 %v8159_v1  ;;  %5904 = vmatpush1.bf16.msra.mxu1 %v8213_v16 }
 0x874   :  { %v3694_v52 = vadd.f32 1.0, %v6304_v39  ;;  %5874 = vmatprep.subr.bf16.mxu0 %v8214_v17  ;;  %5906 = vmatprep.subr.bf16.mxu1 %v8215_v32  ;;  %v8401_v39 = vld [vmem:[#allocation36_spill] sm:$0xff] }
 0x876   :  { %6305 = vrcp.f32 %v3694_v52  ;;  %v8402_v52 = vld [vmem:[#allocation37_spill] sm:$0xff] }
 0x877   :  { %6307 = vtanh.f32 %v3698_v50  ;;  %5876 = vmatpush1.bf16.msra.mxu0 %v8216_v22  ;;  %5908 = vmatpush1.bf16.msra.mxu1 %v8217_v13  ;;  %v8403_v50 = vld [vmem:[#allocation38_spill] sm:$0xff] }
 0x878   :  { %5878 = vmatprep.subr.bf16.mxu0 %v8218_v36  ;;  %5910 = vmatprep.subr.bf16.mxu1 %v8219_v31 }
 0x87b   :  { %5880 = vmatpush1.bf16.msra.mxu0 %v8220_v7  ;;  %5912 = vmatpush1.bf16.msra.mxu1 %v8168_v4 }
 0x87c   :  { %5882 = vmatprep.subr.bf16.mxu0 %v8169_v30  ;;  %5914 = vmatprep.subr.bf16.mxu1 %v8170_v43 }
 0x87f   :  { %5884 = vmatpush1.bf16.msra.mxu0 %v8221_v35  ;;  %5916 = vmatpush1.bf16.msra.mxu1 %v8172_v55 }
 0x880   :  { %v6306_v45 = vpop.eup %6305  ;;  %5886 = vmatprep.subr.bf16.mxu0 %v8173_v48  ;;  %5918 = vmatprep.subr.bf16.mxu1 %v8174_v21 }
 0x881   :  { %v3702_v18 = vrot.slane %v6306_v45, 1  ;;  %v6308_v42 = vpop.eup %6307 }
 0x882   :  { %v3705_v58 = vmul.f32 %v6308_v42, %v6306_v45  ;;  %v8406_v42 = vld [vmem:[#allocation41_spill] sm:$0xff] }
 0x883   :  { %v3704_v5 = vmul.f32 %v3702_v18, %v7534_v46  ;;  %5888 = vmatpush1.bf16.msra.mxu0 %v8175_v59  ;;  %5920 = vmatpush1.bf16.msra.mxu1 %v8123_v27  ;;  %v3708_v46 = vrot.slane %v6306_v45, 2  ;;  %v8404_v45 = vld [vmem:[#allocation39_spill] sm:$0xff]  ;;  %v8405_v18 = vld [vmem:[#allocation40_spill] sm:$0xff] }
 0x884   :  { %5890 = vmatprep.subr.bf16.mxu0 %v8124_v53  ;;  %5922 = vmatprep.subr.bf16.mxu1 %v8125_v0 }
 0x885   :  { %v7651_v47 = vadd.f32 %v3705_v58, %v3704_v5  ;;  %v8407_v58 = vld [vmem:[#allocation42_spill] sm:$0xff]  ;;  %v8408_v5 = vld [vmem:[#allocation43_spill] sm:$0xff] }
 0x887   :  { %6309 = vtanh.f32 %v7651_v47  ;;  %5892 = vmatpush1.bf16.msra.mxu0 %v8126_v26  ;;  %5924 = vmatpush1.bf16.msra.mxu1 %v8127_v12 }
 0x888   :  { %5926 = vmatprep.subr.bf16.mxu0 %v8128_v61  ;;  %5958 = vmatprep.subr.bf16.mxu1 %v8129_v49  ;;  %v8388_v61 = vld [vmem:[#allocation23_spill] sm:$0xff]  ;;  %v8389_v49 = vld [vmem:[#allocation24_spill] sm:$0xff] }
 0x891   :  { %v6310_v57 = vpop.eup %6309 }
 0x892   :  { %v3710_v14 = vmul.f32 %v6310_v57, %v3708_v46  ;;  %v8409_v46 = vld [vmem:[#allocation44_spill] sm:$0xff]  ;;  %v8410_v57 = vld [vmem:[#allocation45_spill] sm:$0xff] }
 0x894   :  { %3918 = vmatmul.mubr.f32.vlgmr.msra.gmra.mrb[28].mxu0 %v3710_v14  ;;  %3989 = vmatmul.mubr.f32.vlgmr.msra.gmra.mrb[28].mxu1 %v3710_v14 }
 0x895   :  { %5928 = vmatpush1.bf16.msra.mxu0 %v6616_v15  ;;  %5960 = vmatpush1.bf16.msra.mxu1 %v6622_v19  ;;  %v8384_v15 = vld [vmem:[#allocation19_spill] sm:$0xff]  ;;  %v8385_v19 = vld [vmem:[#allocation20_spill] sm:$0xff] }
 0x896   :  { %5930 = vmatprep.subr.bf16.mxu0 %v6624_v20  ;;  %5962 = vmatprep.subr.bf16.mxu1 %v6627_v24  ;;  %v8386_v20 = vld [vmem:[#allocation21_spill] sm:$0xff]  ;;  %v8387_v24 = vld [vmem:[#allocation22_spill] sm:$0xff] }
 0x897   :  { %4089 = vmatprep.mubr.f32.mxu0 %v8039_v44  ;;  %4160 = vmatprep.mubr.f32.mxu1 %v8039_v44 }
 0x899   :  { %5932 = vmatpush1.bf16.msra.mxu0 %v6631_v28  ;;  %5964 = vmatpush1.bf16.msra.mxu1 %v6633_v29  ;;  %v8390_v28 = vld [vmem:[#allocation25_spill] sm:$0xff]  ;;  %v8391_v29 = vld [vmem:[#allocation26_spill] sm:$0xff] }
 0x89a   :  { %5934 = vmatprep.subr.bf16.mxu0 %v6636_v33  ;;  %5966 = vmatprep.subr.bf16.mxu1 %v6638_v37  ;;  %v8392_v33 = vld [vmem:[#allocation27_spill] sm:$0xff]  ;;  %v8393_v37 = vld [vmem:[#allocation28_spill] sm:$0xff] }
 0x89d   :  { %5936 = vmatpush1.bf16.msra.mxu0 %v6641_v41  ;;  %5968 = vmatpush1.bf16.msra.mxu1 %v8384_v15  ;;  %v8394_v41 = vld [vmem:[#allocation29_spill] sm:$0xff]  ;;  %v8411_v15 = vld [vmem:[#allocation46_spill] sm:$0xff] }
 0x89e   :  { %5938 = vmatprep.subr.bf16.mxu0 %v8385_v19  ;;  %5970 = vmatprep.subr.bf16.mxu1 %v8386_v20  ;;  %v8412_v19 = vld [vmem:[#allocation47_spill] sm:$0xff]  ;;  %v8413_v20 = vld [vmem:[#allocation48_spill] sm:$0xff] }
 0x8a1   :  { %5940 = vmatpush1.bf16.msra.mxu0 %v8387_v24  ;;  %5972 = vmatpush1.bf16.msra.mxu1 %v8388_v61  ;;  %v8414_v24 = vld [vmem:[#allocation49_spill] sm:$0xff]  ;;  %v8416_v61 = vld [vmem:[#allocation51_spill] sm:$0xff] }
 0x8a2   :  { %5942 = vmatprep.subr.bf16.mxu0 %v8389_v49  ;;  %5974 = vmatprep.subr.bf16.mxu1 %v8390_v28  ;;  %v8417_v49 = vld [vmem:[#allocation52_spill] sm:$0xff]  ;;  %v8418_v28 = vld [vmem:[#allocation53_spill] sm:$0xff] }
 0x8a5   :  { %5944 = vmatpush1.bf16.msra.mxu0 %v8391_v29  ;;  %5976 = vmatpush1.bf16.msra.mxu1 %v8392_v33  ;;  %v8419_v29 = vld [vmem:[#allocation54_spill] sm:$0xff]  ;;  %v8420_v33 = vld [vmem:[#allocation55_spill] sm:$0xff] }
 0x8a6   :  { %5946 = vmatprep.subr.bf16.mxu0 %v8393_v37  ;;  %5978 = vmatprep.subr.bf16.mxu1 %v8394_v41  ;;  %v8421_v37 = vld [vmem:[#allocation56_spill] sm:$0xff]  ;;  %v8422_v41 = vld [vmem:[#allocation57_spill] sm:$0xff] }
 0x8a9   :  { %5948 = vmatpush1.bf16.msra.mxu0 %v8395_v51  ;;  %5980 = vmatpush1.bf16.msra.mxu1 %v8396_v56  ;;  %v8423_v51 = vld [vmem:[#allocation58_spill] sm:$0xff]  ;;  %v8424_v56 = vld [vmem:[#allocation59_spill] sm:$0xff] }
 0x8aa   :  { %5950 = vmatprep.subr.bf16.mxu0 %v8397_v6  ;;  %5982 = vmatprep.subr.bf16.mxu1 %v8398_v25  ;;  %v8425_v6 = vld [vmem:[#allocation60_spill] sm:$0xff]  ;;  %v8426_v25 = vld [vmem:[#allocation61_spill] sm:$0xff] }
 0x8ad   :  { %5952 = vmatpush1.bf16.msra.mxu0 %v8399_v23  ;;  %5984 = vmatpush1.bf16.msra.mxu1 %v8400_v40  ;;  %v8427_v23 = vld [vmem:[#allocation62_spill] sm:$0xff]  ;;  %v8428_v40 = vld [vmem:[#allocation63_spill] sm:$0xff] }
 0x8ae   :  { %5954 = vmatprep.subr.bf16.mxu0 %v8401_v39  ;;  %5986 = vmatprep.subr.bf16.mxu1 %v8402_v52  ;;  %v8429_v39 = vld [vmem:[#allocation64_spill] sm:$0xff]  ;;  %v8430_v52 = vld [vmem:[#allocation65_spill] sm:$0xff] }
 0x8b1   :  { %5956 = vmatpush1.bf16.msra.mxu0 %v8403_v50  ;;  %5988 = vmatpush1.bf16.msra.mxu1 %v8404_v45  ;;  %v8431_v50 = vld [vmem:[#allocation66_spill] sm:$0xff]  ;;  %v8432_v45 = vld [vmem:[#allocation67_spill] sm:$0xff] }
 0x8b2   :  { %5990 = vmatprep.subr.bf16.mxu0 %v8405_v18  ;;  %6022 = vmatprep.subr.bf16.mxu1 %v8406_v42  ;;  %v8433_v18 = vld [vmem:[#allocation68_spill] sm:$0xff]  ;;  %v8434_v42 = vld [vmem:[#allocation69_spill] sm:$0xff] }
 0x8b4   :  { %4090 = vmatmul.mubr.f32.vlgmr.msra.gmra.mrb[30].mxu0 %v3710_v14  ;;  %4161 = vmatmul.mubr.f32.vlgmr.msra.gmra.mrb[30].mxu1 %v3710_v14  ;;  %v8415_v14 = vld [vmem:[#allocation50_spill] sm:$0xff] }
 0x8b5   :  { %5992 = vmatpush1.bf16.msra.mxu0 %v8407_v58  ;;  %6024 = vmatpush1.bf16.msra.mxu1 %v8408_v5  ;;  %v8435_v58 = vld [vmem:[#allocation70_spill] sm:$0xff]  ;;  %v8436_v5 = vld [vmem:[#allocation71_spill] sm:$0xff] }
 0x8b6   :  { %5994 = vmatprep.subr.bf16.mxu0 %v8409_v46  ;;  %6026 = vmatprep.subr.bf16.mxu1 %v8410_v57  ;;  %v8437_v46 = vld [vmem:[#allocation72_spill] sm:$0xff]  ;;  %v8438_v57 = vld [vmem:[#allocation73_spill] sm:$0xff] }
 0x8b7   :  { %4281 = vmatprep.mubr.f32.mxu0 %v8039_v44  ;;  %4352 = vmatprep.mubr.f32.mxu1 %v8039_v44 }
 0x8b9   :  { %5996 = vmatpush1.bf16.msra.mxu0 %v8411_v15  ;;  %6028 = vmatpush1.bf16.msra.mxu1 %v8412_v19 }
 0x8ba   :  { %5998 = vmatprep.subr.bf16.mxu0 %v8413_v20  ;;  %6030 = vmatprep.subr.bf16.mxu1 %v8414_v24  ;;  %v8439_v20 = vld [vmem:[#allocation104_spill] sm:$0xff] }
 0x8bd   :  { %6000 = vmatpush1.bf16.msra.mxu0 %v8415_v14  ;;  %6032 = vmatpush1.bf16.msra.mxu1 %v8416_v61 }
 0x8be   :  { %6002 = vmatprep.subr.bf16.mxu0 %v8417_v49  ;;  %6034 = vmatprep.subr.bf16.mxu1 %v8418_v28 }
 0x8c1   :  { %6004 = vmatpush1.bf16.msra.mxu0 %v8419_v29  ;;  %6036 = vmatpush1.bf16.msra.mxu1 %v8420_v33  ;;  %v8440_v33 = vld [vmem:[#allocation106_spill] sm:$0xff] }
 0x8c2   :  { %6006 = vmatprep.subr.bf16.mxu0 %v8421_v37  ;;  %6038 = vmatprep.subr.bf16.mxu1 %v8422_v41 }
 0x8c5   :  { %6008 = vmatpush1.bf16.msra.mxu0 %v8423_v51  ;;  %6040 = vmatpush1.bf16.msra.mxu1 %v8424_v56 }
 0x8c6   :  { %6010 = vmatprep.subr.bf16.mxu0 %v8425_v6  ;;  %6042 = vmatprep.subr.bf16.mxu1 %v8426_v25 }
 0x8c9   :  { %6012 = vmatpush1.bf16.msra.mxu0 %v8427_v23  ;;  %6044 = vmatpush1.bf16.msra.mxu1 %v8428_v40 }
 0x8ca   :  { %6014 = vmatprep.subr.bf16.mxu0 %v8429_v39  ;;  %6046 = vmatprep.subr.bf16.mxu1 %v8430_v52 }
 0x8cd   :  { %6016 = vmatpush1.bf16.msra.mxu0 %v8431_v50  ;;  %6048 = vmatpush1.bf16.msra.mxu1 %v8432_v45 }
 0x8ce   :  { %6018 = vmatprep.subr.bf16.mxu0 %v8433_v18  ;;  %6050 = vmatprep.subr.bf16.mxu1 %v8434_v42 }
 0x8d1   :  { %6020 = vmatpush1.bf16.msra.mxu0 %v8435_v58  ;;  %6052 = vmatpush1.bf16.msra.mxu1 %v8436_v5 }
 0x8d2   :  { %6054 = vmatprep.subr.bf16.mxu0 %v8437_v46  ;;  %6086 = vmatprep.subr.bf16.mxu1 %v8438_v57 }
 0x967   :  { %v3919_v15 = vpop.f32.mrb[28].mxu0  ;;  %v3990_v19 = vpop.f32.mrb[28].mxu1 }
 0x968   :  { %v3995_v24 = vadd.f32 %v3919_v15, %v8439_v20  ;;  %v3921_v14 = vpop.f32.mrb[29].mxu0  ;;  %v3992_v61 = vpop.f32.mrb[29].mxu1  ;;  %v3997_v37 = vadd.f32 %v3990_v19, %v8440_v33 }
 0x969   :  { %v3996_v49 = vadd.f32 %v3921_v14, %v8154_v9  ;;  %v3998_v41 = vadd.f32 %v3992_v61, %v7025_v10 }
 0x96a   :  { %v4574_v28 = vmul.f32 -1.442695, %v3995_v24  ;;  %v4576_v51 = vmul.f32 -1.442695, %v3997_v37 }
 0x96b   :  { %v4575_v29 = vmul.f32 -1.442695, %v3996_v49 }
 0x96c   :  { %6311 = vpow2.f32 %v4574_v28 }
 0x96d   :  { %6313 = vpow2.f32 %v4575_v29  ;;  %v4024_v29 = vld [vmem:[#allocation2 + $0x7] ss:$8 sm:$0xf] }
 0x96e   :  { %6315 = vtanh.f32 %v3998_v41 }
 0x96f   :  { %6317 = vpow2.f32 %v4576_v51 }
 0x976   :  { %v6312_v56 = vpop.eup %6311 }
 0x977   :  { %v4008_v6 = vadd.f32 1.0, %v6312_v56  ;;  %v6314_v25 = vpop.eup %6313 }
 0x978   :  { %v4009_v23 = vadd.f32 1.0, %v6314_v25  ;;  %v6316_v40 = vpop.eup %6315 }
 0x979   :  { %6319 = vrcp.f32 %v4008_v6  ;;  %v6318_v39 = vpop.eup %6317 }
 0x97a   :  { %6321 = vrcp.f32 %v4009_v23  ;;  %v4010_v18 = vadd.f32 1.0, %v6318_v39 }
 0x97c   :  { %6323 = vrcp.f32 %v4010_v18 }
 0x983   :  { %v6320_v52 = vpop.eup %6319 }
 0x984   :  { %v4019_v50 = vmul.f32 %v6320_v52, %v6316_v40  ;;  %v6322_v45 = vpop.eup %6321 }
 0x985   :  { %v4018_v42 = vmul.f32 %v6322_v45, %v7614_v62 }
 0x986   :  { %v6324_v37 = vpop.eup %6323 }
 0x987   :  { %v4091_v58 = vpop.f32.mrb[30].mxu0  ;;  %v4162_v5 = vpop.f32.mrb[30].mxu1  ;;  %v7731_v46 = vadd.f32 %v4019_v50, %v4018_v42 }
 0x988   :  { %v4093_v57 = vpop.f32.mrb[31].mxu0  ;;  %v4164_v15 = vpop.f32.mrb[31].mxu1 }
 0x989   :  { %v4171_v19 = vcombine.low %v4091_v58, %v4093_v57  ;;  %v4172_v24 = vcombine.low %v4162_v5, %v4164_v15  ;;  %6325 = vtanh.f32 %v7731_v46 }
 0x98b   :  { %v4179_v14 = vrot.slane %v4171_v19, %v6930_v63  ;;  %v4186_v61 = vrot.slane %v4172_v24, %v6930_v63 }
 0x98d   :  { %v4187_v49 = vcombine.low %v4179_v14, %v4186_v61 }
 0x98f   :  { %v4194_v28 = vrot.slane %v4187_v49, %v6930_v63 }
 0x991   :  { %v4196_v62 = vadd.f32 %v4194_v28, %v4024_v29 }
 0x993   :  { %v4577_v41 = vmul.f32 -1.442695, %v4196_v62  ;;  %v6326_v51 = vpop.eup %6325  ;;  %v4204_v6 = vrot.slane %v4196_v62, 3 }
 0x994   :  { %v4022_v56 = vmul.f32 %v6326_v51, %v6324_v37 }
 0x995   :  { %6327 = vpow2.f32 %v4577_v41 }
 0x996   :  { %4282 = vmatmul.mubr.f32.vlgmr.msra.gmra.mrb[32].mxu0 %v4022_v56  ;;  %4353 = vmatmul.mubr.f32.vlgmr.msra.gmra.mrb[32].mxu1 %v4022_v56 }
 0x997   :  { %6056 = vmatpush1.bf16.msra.mxu0 %v8099_v11  ;;  %6088 = vmatpush1.bf16.msra.mxu1 %v8100_v8 }
 0x998   :  { %6058 = vmatprep.subr.bf16.mxu0 %v8101_v60  ;;  %6090 = vmatprep.subr.bf16.mxu1 %v8102_v54 }
 0x999   :  { %4423 = vmatprep.mubr.f32.mxu0 %v8039_v44  ;;  %4494 = vmatprep.mubr.f32.mxu1 %v8039_v44 }
 0x99b   :  { %6060 = vmatpush1.bf16.msra.mxu0 %v8103_v38  ;;  %6092 = vmatpush1.bf16.msra.mxu1 %v8156_v34 }
 0x99c   :  { %6062 = vmatprep.subr.bf16.mxu0 %v8157_v2  ;;  %6094 = vmatprep.subr.bf16.mxu1 %v8158_v3 }
 0x99f   :  { %v6328_v63 = vpop.eup %6327  ;;  %6064 = vmatpush1.bf16.msra.mxu0 %v8159_v1  ;;  %6096 = vmatpush1.bf16.msra.mxu1 %v8213_v16 }
 0x9a0   :  { %v4200_v11 = vadd.f32 1.0, %v6328_v63  ;;  %6066 = vmatprep.subr.bf16.mxu0 %v8214_v17  ;;  %6098 = vmatprep.subr.bf16.mxu1 %v8215_v32 }
 0x9a2   :  { %6329 = vrcp.f32 %v4200_v11 }
 0x9a3   :  { %6331 = vtanh.f32 %v4204_v6  ;;  %6068 = vmatpush1.bf16.msra.mxu0 %v8216_v22  ;;  %6100 = vmatpush1.bf16.msra.mxu1 %v8217_v13 }
 0x9a4   :  { %6070 = vmatprep.subr.bf16.mxu0 %v8218_v36  ;;  %6102 = vmatprep.subr.bf16.mxu1 %v8219_v31 }
 0x9a7   :  { %6072 = vmatpush1.bf16.msra.mxu0 %v8220_v7  ;;  %6104 = vmatpush1.bf16.msra.mxu1 %v8168_v4 }
 0x9a8   :  { %6074 = vmatprep.subr.bf16.mxu0 %v8169_v30  ;;  %6106 = vmatprep.subr.bf16.mxu1 %v8170_v43 }
 0x9ab   :  { %6076 = vmatpush1.bf16.msra.mxu0 %v8221_v35  ;;  %6108 = vmatpush1.bf16.msra.mxu1 %v8172_v55 }
 0x9ac   :  { %v6330_v44 = vpop.eup %6329  ;;  %6078 = vmatprep.subr.bf16.mxu0 %v8173_v48  ;;  %6110 = vmatprep.subr.bf16.mxu1 %v8174_v21 }
 0x9ad   :  { %v4208_v8 = vrot.slane %v6330_v44, 1  ;;  %v6332_v60 = vpop.eup %6331  ;;  %v4214_v2 = vrot.slane %v6330_v44, 2 }
 0x9ae   :  { %v4211_v38 = vmul.f32 %v6332_v60, %v6330_v44 }
 0x9af   :  { %v4210_v54 = vmul.f32 %v4208_v8, %v7651_v47  ;;  %6080 = vmatpush1.bf16.msra.mxu0 %v8175_v59  ;;  %6112 = vmatpush1.bf16.msra.mxu1 %v8123_v27 }
 0x9b0   :  { %6082 = vmatprep.subr.bf16.mxu0 %v8124_v53  ;;  %6114 = vmatprep.subr.bf16.mxu1 %v8125_v0 }
 0x9b1   :  { %v4212_v34 = vadd.f32 %v4211_v38, %v4210_v54 }
 0x9b3   :  { %6333 = vtanh.f32 %v4212_v34  ;;  %6084 = vmatpush1.bf16.msra.mxu0 %v8126_v26  ;;  %6116 = vmatpush1.bf16.msra.mxu1 %v8127_v12 }
 0x9bd   :  { %v6334_v3 = vpop.eup %6333 }
 0x9be   :  { %v4216_v1 = vmul.f32 %v6334_v3, %v4214_v2 }
 0x9c0   :  { %4424 = vmatmul.mubr.f32.vlgmr.msra.gmra.mrb[32].mxu0 %v4216_v1  ;;  %4495 = vmatmul.mubr.f32.vlgmr.msra.gmra.mrb[32].mxu1 %v4216_v1 }
 0xa93   :  { %v4425_v21 = vpop.f32.mrb[32].mxu0  ;;  %v4496_v4 = vpop.f32.mrb[32].mxu1 }
 0xa94   :  { %v4501_v59 = vadd.f32 %v4425_v21, %v8439_v20  ;;  %v4427_v27 = vpop.f32.mrb[33].mxu0  ;;  %v4498_v30 = vpop.f32.mrb[33].mxu1  ;;  %v4503_v26 = vadd.f32 %v4496_v4, %v8440_v33 }
 0xa95   :  { %v4502_v53 = vadd.f32 %v4427_v27, %v8154_v9  ;;  %v4504_v12 = vadd.f32 %v4498_v30, %v7025_v10 }
 0xa96   :  { %v4578_v0 = vmul.f32 -1.442695, %v4501_v59  ;;  %v4580_v55 = vmul.f32 -1.442695, %v4503_v26 }
 0xa97   :  { %v4579_v43 = vmul.f32 -1.442695, %v4502_v53 }
 0xa98   :  { %6335 = vpow2.f32 %v4578_v0 }
 0xa99   :  { %6337 = vpow2.f32 %v4579_v43 }
 0xa9a   :  { %6339 = vtanh.f32 %v4504_v12 }
 0xa9b   :  { %6341 = vpow2.f32 %v4580_v55 }
 0xaa2   :  { %v6336_v48 = vpop.eup %6335 }
 0xaa3   :  { %v4514_v16 = vadd.f32 1.0, %v6336_v48  ;;  %v6338_v17 = vpop.eup %6337 }
 0xaa4   :  { %v4515_v32 = vadd.f32 1.0, %v6338_v17  ;;  %v6340_v22 = vpop.eup %6339 }
 0xaa5   :  { %6343 = vrcp.f32 %v4514_v16  ;;  %v6342_v13 = vpop.eup %6341 }
 0xaa6   :  { %6345 = vrcp.f32 %v4515_v32  ;;  %v4516_v7 = vadd.f32 1.0, %v6342_v13 }
 0xaa8   :  { %6347 = vrcp.f32 %v4516_v7 }
 0xaaf   :  { %v6344_v9 = vpop.eup %6343 }
 0xab0   :  { %v4525_v36 = vmul.f32 %v6344_v9, %v6340_v22  ;;  %v6346_v31 = vpop.eup %6345 }
 0xab1   :  { %v4524_v35 = vmul.f32 %v6346_v31, %v7731_v46 }
 0xab2   :  { %v6348_v10 = vpop.eup %6347 }
 0xab3   :  { %v4526_v47 = vadd.f32 %v4525_v36, %v4524_v35 }
 0xab5   :  { %6349 = vtanh.f32 %v4526_v47 }
 0xabf   :  { %v6350_v20 = vpop.eup %6349 }
 0xac0   :  { %v4528_v33 = vmul.f32 %v6350_v20, %v6348_v10 }
 0xac2   :  { %4529 = vst [vmem:[#allocation12] sm:$0x1] %v4528_v33 }
 0xac3   :  { %6472 = shalt.err (!%p6469_p2)
}
 0xac4   :  { %s6473_s19 = scalar_lea.hbm %s7794_s7, 16 }
 0xac5   :  { %p6474_p3 = scmp.ne.s32.totalorder %s7794_s7, %s6473_s19  ;;  %p6477_p4 = scmp.lt.u32.totalorder %s6473_s19, %s7794_s7 }
 0xac7   :  { %p6479_p5 = pnand %p6477_p4, %p6474_p3 }
 0xac9   :  { %6482 = shalt.err (!%p6479_p5)
}
 0xaca   :  { %4539 = dma.vmem_to_hbm [thread:$0]  %s4537_s13, 16, %s7794_s7, [#allocation5]  }
 0xacb   :  { %6489 = dma.done.wait [#allocation5], 16  }
 0xacc   :  { %6490 = vsyncadd [#allocation5], 4294967280 }
 0xacd   :  { %4543 = vsyncpa [#allocation4], 1 }
 0xace   :  { %4544 = vsyncpa [#allocation7], 1 }
 0xacf   :  { %4545 = vsyncpa [#allocation10], 1 }
 0xad0   :  { %4546 = vsyncpa [#allocation5], 1 }

</bundles_post_ra>
